<compile_context>
chip_gen: v5e
topology: v5e:2x2
jax: 0.10.0
libtpu: 0.0.40
codegen_flags: <defaults>
</compile_context>

<pallas_src>
import jax
import jax.numpy as jnp
from jax.experimental import pallas as pl
from jax.experimental.pallas import tpu as pltpu

_LANE = 128     # pad Cout up to a multiple of the TPU lane width
_PAD_COL = 8    # sublane-aligned column offset of the interior inside the ycat scratch


def _round_up(x, m):
    return (x + m - 1) // m * m


def _double_conv_kernel(x9_ref, w1_ref, b1_ref, w2_ref, b2_ref, o_ref, ycat_ref):
    # x9_ref  : (1, H*W, 9*Cin)          im2col'ed input (tiny; built in the wrapper)
    # w1_ref  : (9*Cin, Cp)              conv1 weights, (dy,dx,ci) flattened into K
    # b1_ref  : (1, Cp)
    # w2_ref  : (3, 3*Cp, Cp)            conv2 weights, dx taps folded into K
    # b2_ref  : (1, Cp)
    # o_ref   : (1, H*W, Cp)             lane-dense output slab (Cp % 128 == 0)
    # ycat_ref: (H+2, W+16, 3*Cp) VMEM   dx-folded conv1 output with zero halo
    H = ycat_ref.shape[0] - 2
    W = ycat_ref.shape[1] - 2 * _PAD_COL
    Cp = o_ref.shape[2]
    c0 = _PAD_COL               # interior columns live at [c0, c0+W)
    dt = ycat_ref.dtype

    # ---- conv1: single im2col matmul (K = 9*Cin) + bias + ReLU ----------------------
    acc1 = jnp.dot(x9_ref[0], w1_ref[...], preferred_element_type=jnp.float32)
    y = jnp.maximum(acc1 + b1_ref[...].astype(jnp.float32), 0.0)        # (H*W, Cp) f32
    y3 = y.reshape(H, W, Cp).astype(dt)

    # ---- zero ONLY the halo cells conv2 reads (megacore-safe, re-done per image) ----
    zrow = jnp.zeros((1, W, 3 * Cp), dt)
    ycat_ref[0:1, c0:c0 + W, :] = zrow                                  # top halo row
    ycat_ref[H + 1:H + 2, c0:c0 + W, :] = zrow                          # bottom halo row
    zcol = jnp.zeros((H, 1, Cp), dt)
    ycat_ref[1:H + 1, c0:c0 + 1, 0:Cp] = zcol                           # dx=0 slab, col 0
    ycat_ref[1:H + 1, c0 + W - 1:c0 + W, 2 * Cp:3 * Cp] = zcol          # dx=2 slab, col W-1

    # ---- hoisted dx-fold: write the 3 dx-shifted slabs of y ONCE (stays in VMEM) ----
    # Read later as ycat[r, c0+j, dx*Cp+ch] == y_padded[r, j+dx, ch].
    ycat_ref[1:H + 1, c0:c0 + W, Cp:2 * Cp] = y3                        # dx = 1 (aligned)
    ycat_ref[1:H + 1, c0 + 1:c0 + 1 + W, 0:Cp] = y3                     # dx = 0 (+1 shift)
    ycat_ref[1:H + 1, c0 - 1:c0 - 1 + W, 2 * Cp:3 * Cp] = y3            # dx = 2 (-1 shift)

    # ---- conv2: 3 fat MXU matmuls (K = 3*Cp) + bias + ReLU ---------------------------
    acc2 = jnp.zeros((H * W, Cp), jnp.float32)
    for dy in range(3):
        cols = ycat_ref[dy:dy + H, c0:c0 + W, :].reshape(H * W, 3 * Cp)  # aligned load
        acc2 = acc2 + jnp.dot(cols, w2_ref[dy], preferred_element_type=jnp.float32)
    z = jnp.maximum(acc2 + b2_ref[...].astype(jnp.float32), 0.0)

    o_ref[0] = z.astype(o_ref.dtype)                                     # lane-dense store


def double_conv(x_nchw, params):
    """DoubleConv forward.  x_nchw: (N, Cin, H, W) -> (N, Cout, H, W)."""
    w1, b1, w2, b2 = params                          # HWIO weights
    N, Cin, H, W = x_nchw.shape
    Cout = w1.shape[-1]
    Cp = _round_up(Cout, _LANE)
    dt = x_nchw.dtype

    x = jnp.transpose(x_nchw, (0, 2, 3, 1))          # NCHW -> NHWC (channels on lanes)

    # conv1 im2col unfold (tiny for small Cin): (N, H*W, 9*Cin), order (dy, dx, ci).
    xp = jnp.pad(x, ((0, 0), (1, 1), (1, 1), (0, 0)))
    x9 = jnp.concatenate(
        [xp[:, dy:dy + H, dx:dx + W, :] for dy in range(3) for dx in range(3)],
        axis=-1).reshape(N, H * W, 9 * Cin)

    # Weight / bias packing (tiny glue, cacheable). Cout zero-padded to Cp so every
    # store and the conv1->conv2 intermediate are lane-dense.
    w1p = jnp.pad(w1.reshape(9 * Cin, Cout), ((0, 0), (0, Cp - Cout)))   # (9*Cin, Cp)
    b1p = jnp.pad(b1, (0, Cp - Cout)).reshape(1, Cp)
    w2p = jnp.pad(w2, ((0, 0), (0, 0), (0, Cp - Cout), (0, Cp - Cout)))  # (3,3,Cp,Cp)
    w2p = w2p.reshape(3, 3 * Cp, Cp)                                     # [dy, dx*Cp+ci, co]
    b2p = jnp.pad(b2, (0, Cp - Cout)).reshape(1, Cp)

    out = pl.pallas_call(
        _double_conv_kernel,
        out_shape=jax.ShapeDtypeStruct((N, H * W, Cp), dt),
        grid_spec=pltpu.PrefetchScalarGridSpec(
            num_scalar_prefetch=0,
            grid=(N,),
            in_specs=[
                pl.BlockSpec((1, H * W, 9 * Cin), lambda n: (n, 0, 0)),
                pl.BlockSpec((9 * Cin, Cp), lambda n: (0, 0)),
                pl.BlockSpec((1, Cp), lambda n: (0, 0)),
                pl.BlockSpec((3, 3 * Cp, Cp), lambda n: (0, 0, 0)),
                pl.BlockSpec((1, Cp), lambda n: (0, 0)),
            ],
            out_specs=pl.BlockSpec((1, H * W, Cp), lambda n: (n, 0, 0)),
            scratch_shapes=[
                pltpu.VMEM((H + 2, W + 2 * _PAD_COL, 3 * Cp), dt),       # ycat
            ],
        ),
        compiler_params=pltpu.CompilerParams(
            dimension_semantics=("parallel",),
            vmem_limit_bytes=16 * 1024 * 1024,     # ample here; modest enough for v7x
        ),
    )(x9, w1p, b1p, w2p, b2p)

    out = out.reshape(N, H, W, Cp)[..., :Cout]       # drop channel padding
    return jnp.transpose(out, (0, 3, 1, 2))          # NHWC -> NCHW (spec parity only)


def init_params(key, in_channels, out_channels, dtype=jnp.float32):
    k1, k2, k3, k4 = jax.random.split(key, 4)
    # PyTorch Conv2d weight shape is (Cout, Cin, 3, 3); we store HWIO (3,3,Cin,Cout).
    fan1 = in_channels * 9
    fan2 = out_channels * 9
    w1 = jax.random.uniform(k1, (3, 3, in_channels, out_channels), dtype,
                            minval=-1.0, maxval=1.0) / jnp.sqrt(fan1).astype(dtype)
    b1 = jax.random.uniform(k2, (out_channels,), dtype, minval=-0.1, maxval=0.1)
    w2 = jax.random.uniform(k3, (3, 3, out_channels, out_channels), dtype,
                            minval=-1.0, maxval=1.0) / jnp.sqrt(fan2).astype(dtype)
    b2 = jax.random.uniform(k4, (out_channels,), dtype, minval=-0.1, maxval=0.1)
    return w1, b1, w2, b2


def _reference(x_nchw, params):
    """Pure-JAX reference (lax conv) for correctness check."""
    w1, b1, w2, b2 = params

    def conv(x, w, b):
        y = jax.lax.conv_general_dilated(
            x, w, window_strides=(1, 1), padding=((1, 1), (1, 1)),
            dimension_numbers=("NCHW", "HWIO", "NCHW"))
        return jax.nn.relu(y + b[None, :, None, None])

    return conv(conv(x_nchw, w1, b1), w2, b2)


if __name__ == "__main__":
    key = jax.random.PRNGKey(0)
    kx, kp = jax.random.split(key)

    N, Cin, Cout, H, W = 2, 4, 8, 16, 16
    x = jax.random.normal(kx, (N, Cin, H, W), jnp.float32)
    params = init_params(kp, Cin, Cout)

    out = double_conv(x, params)
    out = jax.block_until_ready(out)

    ref = _reference(x, params)
    assert out.shape == (N, Cout, H, W)
    assert jnp.allclose(out, ref, atol=1e-4, rtol=1e-4), "mismatch vs reference"

    print("KERNEL_OK")
</pallas_src>

<mosaic_0001>
module attributes {stable_mosaic.version = 11 : i64} {
  func.func @_double_conv_kernel(%arg0: i32, %arg1: memref<1x256x36xf32, #tpu.memory_space<vmem>>, %arg2: memref<36x128xf32, #tpu.memory_space<vmem>>, %arg3: memref<1x128xf32, #tpu.memory_space<vmem>>, %arg4: memref<3x384x128xf32, #tpu.memory_space<vmem>>, %arg5: memref<1x128xf32, #tpu.memory_space<vmem>>, %arg6: memref<1x256x128xf32, #tpu.memory_space<vmem>>, %arg7: memref<18x32x384xf32, #tpu.memory_space<vmem>>) attributes {dimension_semantics = [#tpu.dimension_semantics<parallel>], iteration_bounds = array<i64: 2>, scalar_prefetch = 0 : i64, scratch_operands = 1 : i64, tpu.core_type = #tpu.core_type<tc>, window_params = [{transform_indices = @transform_0, window_bounds = array<i64: 1, 256, 36>}, {pipeline_mode = #tpu.pipeline_mode<synchronous>, transform_indices = @transform_1, window_bounds = array<i64: 36, 128>}, {pipeline_mode = #tpu.pipeline_mode<synchronous>, transform_indices = @transform_2, window_bounds = array<i64: 1, 128>}, {pipeline_mode = #tpu.pipeline_mode<synchronous>, transform_indices = @transform_3, window_bounds = array<i64: 3, 384, 128>}, {pipeline_mode = #tpu.pipeline_mode<synchronous>, transform_indices = @transform_4, window_bounds = array<i64: 1, 128>}, {transform_indices = @transform_5, window_bounds = array<i64: 1, 256, 128>}]} {
    %c0 = arith.constant 0 : index
    %c0_0 = arith.constant 0 : index
    %c0_1 = arith.constant 0 : index
    %0 = vector.load %arg1[%c0, %c0_0, %c0_1] : memref<1x256x36xf32, #tpu.memory_space<vmem>>, vector<1x256x36xf32>
    %1 = vector.shape_cast %0 : vector<1x256x36xf32> to vector<256x36xf32>
    %c0_2 = arith.constant 0 : index
    %c0_3 = arith.constant 0 : index
    %2 = vector.load %arg2[%c0_2, %c0_3] : memref<36x128xf32, #tpu.memory_space<vmem>>, vector<36x128xf32>
    %cst = arith.constant dense<0.000000e+00> : vector<256x128xf32>
    %3 = tpu.matmul %1, %2, %cst {dimension_numbers = #tpu.dot_dimension_numbers<[1], [0], [0], [1], [0, 0, 1, 1], [], []>} : vector<256x36xf32>, vector<36x128xf32>, vector<256x128xf32> -> vector<256x128xf32>
    %c0_4 = arith.constant 0 : index
    %c0_5 = arith.constant 0 : index
    %4 = vector.load %arg3[%c0_4, %c0_5] : memref<1x128xf32, #tpu.memory_space<vmem>>, vector<1x128xf32>
    %5 = vector.broadcast %4 : vector<1x128xf32> to vector<256x128xf32>
    %6 = arith.addf %3, %5 : vector<256x128xf32>
    %cst_6 = arith.constant 0.000000e+00 : f32
    %7 = vector.broadcast %cst_6 : f32 to vector<256x128xf32>
    %8 = arith.maximumf %6, %7 : vector<256x128xf32>
    %9 = vector.shape_cast %8 : vector<256x128xf32> to vector<16x16x128xf32>
    %cst_7 = arith.constant 0.000000e+00 : f32
    %10 = vector.broadcast %cst_7 : f32 to vector<1x16x384xf32>
    %c0_8 = arith.constant 0 : index
    %c8 = arith.constant 8 : index
    %c0_9 = arith.constant 0 : index
    %11 = vector.load %arg7[%c0_8, %c8, %c0_9] : memref<18x32x384xf32, #tpu.memory_space<vmem>>, vector<1x16x384xf32>
    tpu.vector_store %arg7[%c0_8, %c8, %c0_9], %10 {strides = array<i32>} : memref<18x32x384xf32, #tpu.memory_space<vmem>>, vector<1x16x384xf32>,
    %c17 = arith.constant 17 : index
    %c8_10 = arith.constant 8 : index
    %c0_11 = arith.constant 0 : index
    %12 = vector.load %arg7[%c17, %c8_10, %c0_11] : memref<18x32x384xf32, #tpu.memory_space<vmem>>, vector<1x16x384xf32>
    tpu.vector_store %arg7[%c17, %c8_10, %c0_11], %10 {strides = array<i32>} : memref<18x32x384xf32, #tpu.memory_space<vmem>>, vector<1x16x384xf32>,
    %cst_12 = arith.constant 0.000000e+00 : f32
    %13 = vector.broadcast %cst_12 : f32 to vector<16x1x128xf32>
    %c1 = arith.constant 1 : index
    %c8_13 = arith.constant 8 : index
    %c0_14 = arith.constant 0 : index
    %14 = vector.load %arg7[%c1, %c8_13, %c0_14] : memref<18x32x384xf32, #tpu.memory_space<vmem>>, vector<16x1x128xf32>
    tpu.vector_store %arg7[%c1, %c8_13, %c0_14], %13 {strides = array<i32>} : memref<18x32x384xf32, #tpu.memory_space<vmem>>, vector<16x1x128xf32>,
    %c1_15 = arith.constant 1 : index
    %c23 = arith.constant 23 : index
    %c256 = arith.constant 256 : index
    %15 = vector.load %arg7[%c1_15, %c23, %c256] : memref<18x32x384xf32, #tpu.memory_space<vmem>>, vector<16x1x128xf32>
    tpu.vector_store %arg7[%c1_15, %c23, %c256], %13 {strides = array<i32>} : memref<18x32x384xf32, #tpu.memory_space<vmem>>, vector<16x1x128xf32>,
    %c1_16 = arith.constant 1 : index
    %c8_17 = arith.constant 8 : index
    %c128 = arith.constant 128 : index
    %16 = vector.load %arg7[%c1_16, %c8_17, %c128] : memref<18x32x384xf32, #tpu.memory_space<vmem>>, vector<16x16x128xf32>
    tpu.vector_store %arg7[%c1_16, %c8_17, %c128], %9 {strides = array<i32>} : memref<18x32x384xf32, #tpu.memory_space<vmem>>, vector<16x16x128xf32>,
    %c1_18 = arith.constant 1 : index
    %c9 = arith.constant 9 : index
    %c0_19 = arith.constant 0 : index
    %17 = vector.load %arg7[%c1_18, %c9, %c0_19] : memref<18x32x384xf32, #tpu.memory_space<vmem>>, vector<16x16x128xf32>
    tpu.vector_store %arg7[%c1_18, %c9, %c0_19], %9 {strides = array<i32>} : memref<18x32x384xf32, #tpu.memory_space<vmem>>, vector<16x16x128xf32>,
    %c1_20 = arith.constant 1 : index
    %c7 = arith.constant 7 : index
    %c256_21 = arith.constant 256 : index
    %18 = vector.load %arg7[%c1_20, %c7, %c256_21] : memref<18x32x384xf32, #tpu.memory_space<vmem>>, vector<16x16x128xf32>
    tpu.vector_store %arg7[%c1_20, %c7, %c256_21], %9 {strides = array<i32>} : memref<18x32x384xf32, #tpu.memory_space<vmem>>, vector<16x16x128xf32>,
    %cst_22 = arith.constant 0.000000e+00 : f32
    %19 = vector.broadcast %cst_22 : f32 to vector<256x128xf32>
    %c0_23 = arith.constant 0 : index
    %c8_24 = arith.constant 8 : index
    %c0_25 = arith.constant 0 : index
    %20 = vector.load %arg7[%c0_23, %c8_24, %c0_25] : memref<18x32x384xf32, #tpu.memory_space<vmem>>, vector<16x16x384xf32>
    %21 = vector.shape_cast %20 : vector<16x16x384xf32> to vector<256x384xf32>
    %c0_26 = arith.constant 0 : index
    %c0_27 = arith.constant 0 : index
    %c0_28 = arith.constant 0 : index
    %22 = vector.load %arg4[%c0_26, %c0_27, %c0_28] : memref<3x384x128xf32, #tpu.memory_space<vmem>>, vector<1x384x128xf32>
    %23 = vector.shape_cast %22 : vector<1x384x128xf32> to vector<384x128xf32>
    %cst_29 = arith.constant dense<0.000000e+00> : vector<256x128xf32>
    %24 = tpu.matmul %21, %23, %cst_29 {dimension_numbers = #tpu.dot_dimension_numbers<[1], [0], [0], [1], [0, 0, 1, 1], [], []>} : vector<256x384xf32>, vector<384x128xf32>, vector<256x128xf32> -> vector<256x128xf32>
    %25 = arith.addf %19, %24 : vector<256x128xf32>
    %c1_30 = arith.constant 1 : index
    %c8_31 = arith.constant 8 : index
    %c0_32 = arith.constant 0 : index
    %26 = vector.load %arg7[%c1_30, %c8_31, %c0_32] : memref<18x32x384xf32, #tpu.memory_space<vmem>>, vector<16x16x384xf32>
    %27 = vector.shape_cast %26 : vector<16x16x384xf32> to vector<256x384xf32>
    %c1_33 = arith.constant 1 : index
    %c0_34 = arith.constant 0 : index
    %c0_35 = arith.constant 0 : index
    %28 = vector.load %arg4[%c1_33, %c0_34, %c0_35] : memref<3x384x128xf32, #tpu.memory_space<vmem>>, vector<1x384x128xf32>
    %29 = vector.shape_cast %28 : vector<1x384x128xf32> to vector<384x128xf32>
    %cst_36 = arith.constant dense<0.000000e+00> : vector<256x128xf32>
    %30 = tpu.matmul %27, %29, %cst_36 {dimension_numbers = #tpu.dot_dimension_numbers<[1], [0], [0], [1], [0, 0, 1, 1], [], []>} : vector<256x384xf32>, vector<384x128xf32>, vector<256x128xf32> -> vector<256x128xf32>
    %31 = arith.addf %25, %30 : vector<256x128xf32>
    %c2 = arith.constant 2 : index
    %c8_37 = arith.constant 8 : index
    %c0_38 = arith.constant 0 : index
    %32 = vector.load %arg7[%c2, %c8_37, %c0_38] : memref<18x32x384xf32, #tpu.memory_space<vmem>>, vector<16x16x384xf32>
    %33 = vector.shape_cast %32 : vector<16x16x384xf32> to vector<256x384xf32>
    %c2_39 = arith.constant 2 : index
    %c0_40 = arith.constant 0 : index
    %c0_41 = arith.constant 0 : index
    %34 = vector.load %arg4[%c2_39, %c0_40, %c0_41] : memref<3x384x128xf32, #tpu.memory_space<vmem>>, vector<1x384x128xf32>
    %35 = vector.shape_cast %34 : vector<1x384x128xf32> to vector<384x128xf32>
    %cst_42 = arith.constant dense<0.000000e+00> : vector<256x128xf32>
    %36 = tpu.matmul %33, %35, %cst_42 {dimension_numbers = #tpu.dot_dimension_numbers<[1], [0], [0], [1], [0, 0, 1, 1], [], []>} : vector<256x384xf32>, vector<384x128xf32>, vector<256x128xf32> -> vector<256x128xf32>
    %37 = arith.addf %31, %36 : vector<256x128xf32>
    %c0_43 = arith.constant 0 : index
    %c0_44 = arith.constant 0 : index
    %38 = vector.load %arg5[%c0_43, %c0_44] : memref<1x128xf32, #tpu.memory_space<vmem>>, vector<1x128xf32>
    %39 = vector.broadcast %38 : vector<1x128xf32> to vector<256x128xf32>
    %40 = arith.addf %37, %39 : vector<256x128xf32>
    %cst_45 = arith.constant 0.000000e+00 : f32
    %41 = vector.broadcast %cst_45 : f32 to vector<256x128xf32>
    %42 = arith.maximumf %40, %41 : vector<256x128xf32>
    %c0_46 = arith.constant 0 : index
    %c0_47 = arith.constant 0 : index
    %c0_48 = arith.constant 0 : index
    %43 = vector.load %arg6[%c0_46, %c0_47, %c0_48] : memref<1x256x128xf32, #tpu.memory_space<vmem>>, vector<1x256x128xf32>
    %44 = vector.shape_cast %43 : vector<1x256x128xf32> to vector<256x128xf32>
    %45 = vector.shape_cast %42 : vector<256x128xf32> to vector<1x256x128xf32>
    tpu.vector_store %arg6[%c0_46, %c0_47, %c0_48], %45 {strides = array<i32>} : memref<1x256x128xf32, #tpu.memory_space<vmem>>, vector<1x256x128xf32>,
    return
  }
  func.func @transform_0(%arg0: i32) -> (i32, i32, i32) {
    %c0_i32 = arith.constant 0 : i32
    %c0_i32_0 = arith.constant 0 : i32
    %c0_i32_1 = arith.constant 0 : i32
    return %arg0, %c0_i32, %c0_i32_0 : i32, i32, i32
  }
  func.func @transform_1(%arg0: i32) -> (i32, i32) {
    %c0_i32 = arith.constant 0 : i32
    %c0_i32_0 = arith.constant 0 : i32
    %c0_i32_1 = arith.constant 0 : i32
    return %c0_i32, %c0_i32_0 : i32, i32
  }
  func.func @transform_2(%arg0: i32) -> (i32, i32) {
    %c0_i32 = arith.constant 0 : i32
    %c0_i32_0 = arith.constant 0 : i32
    %c0_i32_1 = arith.constant 0 : i32
    return %c0_i32, %c0_i32_0 : i32, i32
  }
  func.func @transform_3(%arg0: i32) -> (i32, i32, i32) {
    %c0_i32 = arith.constant 0 : i32
    %c0_i32_0 = arith.constant 0 : i32
    %c0_i32_1 = arith.constant 0 : i32
    %c0_i32_2 = arith.constant 0 : i32
    return %c0_i32, %c0_i32_0, %c0_i32_1 : i32, i32, i32
  }
  func.func @transform_4(%arg0: i32) -> (i32, i32) {
    %c0_i32 = arith.constant 0 : i32
    %c0_i32_0 = arith.constant 0 : i32
    %c0_i32_1 = arith.constant 0 : i32
    return %c0_i32, %c0_i32_0 : i32, i32
  }
  func.func @transform_5(%arg0: i32) -> (i32, i32, i32) {
    %c0_i32 = arith.constant 0 : i32
    %c0_i32_0 = arith.constant 0 : i32
    %c0_i32_1 = arith.constant 0 : i32
    return %arg0, %c0_i32, %c0_i32_0 : i32, i32, i32
  }
}

</mosaic_0001>

<bundles_post_ra>
// kernel: tpu_custom_call.1
= control target key start
LH: loop header
LB: loop body
LE: loop exit
PB: predicated region body
PF: predicated region fallthrough
CT: control target
= control target key end

     0   :  { %10 = vsyncpa [#allocation4], 0  ;;  %s4252_s0 = inlined_call_operand.vmem [shape: f32[2,256,36], index: 0, kind: input, shape index: {}]   ;;  %s4253_s1 = inlined_call_operand.vmem [shape: f32[36,128], index: 1, kind: input, shape index: {}]   ;;  %s4254_s2 = inlined_call_operand.vmem [shape: f32[1,128], index: 2, kind: input, shape index: {}]   ;;  %s4255_s3 = inlined_call_operand.hbm [shape: f32[3,384,128], index: 3, kind: input, shape index: {}]   ;;  %s4256_s4 = inlined_call_operand.vmem [shape: f32[1,128], index: 4, kind: input, shape index: {}]   ;;  %s4257_s5 = inlined_call_operand.hbm [shape: f32[2,256,128], index: 5, kind: output, shape index: {}]  }
   0x1   :  { %11 = vsyncpa [#allocation5], 0 }
   0x2   :  { %13 = vsyncpa [#allocation5 + $0x1], 0  ;;  %s2880_s18 = smov 0   ;;  %s2882_s19 = smov 0  }
   0x3   :  { %s2884_s20 = smov 0   ;;  %s2886_s21 = smov 0  }
   0x4 LB: > { %s2901_s22 = sadd.s32 4294967295, %s2842_s21   ;;  %s2601_s23 = sadd.s32 4294967294, %s2842_s21   ;;  %s2842_s21 = sphi %s2886_s21, %s4538_s21   ;;  %s2838_s20 = sphi %s2884_s20, %s4537_s20   ;;  %s2834_s19 = sphi %s2882_s19, %s4536_s19   ;;  %s2830_s18 = sphi %s2880_s18, %s4535_s18  }
   0x5   : > { %s2905_s24 = sadd.s32 1, %s2842_s21   ;;  %s136_s25 = sadd.s32 1, %s2838_s20 }
   0x6   : > { %s133_s26 = ssub.s32 %s2842_s21, %s2905_s24  ;;  %p146_p0 = scmp.ne.s32.totalorder %s2838_s20, %s2834_s19 }
   0x7   : > { %p134_p1 = scmp.eq.s32.totalorder %s133_s26, 0  ;;  %p147_p2 = scmp.eq.s32.totalorder %s2901_s22, 1 }
   0x8   : > { %p152_p3 = scmp.ne.s32.totalorder %s2834_s19, %s2830_s18  ;;  %p153_p4 = scmp.eq.s32.totalorder %s2601_s23, 1 }
   0x9   : > { %s2916_s27 = scalar_select %p134_p1, %s2838_s20, %s136_s25  }
   0xa   : > { %p2918_p5 = por %p147_p2, %p146_p0  ;;  %p2922_p6 = por %p153_p4, %p152_p3 }
   0xb   : > { %p2602_p7 = scmp.ge.s32.totalorder %s2842_s21, 1  ;;  %p160_p8 = scmp.lt.s32.totalorder %s2842_s21, 3 }
   0xc   : > { %p2701_p9 = scmp.eq.s32.totalorder %s2901_s22, 0  ;;  %s177_s7 = sshll.u32 %s4255_s3, 4  ;;  %s178_s7 = int_to_ptr.hbm [resolvable:$true] %s177_s7 }
   0xd   : > { %p161_p10 = pnand %p2602_p7, %p160_p8  ;;  %s2844_s8 = smov [#allocation3]  }
   0xe   : > { %s179_s9 = sshll.u32 %s2844_s8, 4  ;;  %s2845_s10 = smov 128   ;;  %s180_s9 = int_to_ptr.vmem [resolvable:$true] %s179_s9 }
   0xf   : > { %p2693_p11 = pneg %p161_p10  ;;  %s2846_s11 = smov 8  }
  0x10   : > { %206 = sbr.rel (%p161_p10) target bundleno = 1076 (0x434), region = 40 }
  0x11   : > { %p2694_p12 = pnand %p2701_p9, %p2693_p11 }
  0x13   : > { %2696 = dma.hbm_to_vmem [thread:$0]  (!%p2694_p12), %s178_s7, 18432, %s180_s9, [#allocation4], %s2845_s10, %s2845_s10, %s2846_s11  }
  0x15   : > { %2821 = dma.done.wait (%p2701_p9), [#allocation4], 18432  }
  0x16   : > { %2823 = vsyncadd (%p2701_p9), [#allocation4], 4294948864  ;;  %p235_p13 = scmp.lt.s32.totalorder %s2901_s22, 1  ;;  %vm378_vm0 = vcmask 1043456   ;;  %v276_v0 = vld [vmem:[%s4253_s1 + $0x20] sm:$0xf] }
  0x17   : > { %v275_v1 = vld [vmem:[%s4253_s1 + $0x18] sm:$0xff]  ;;  %2610 = vmatpush.msk.msra.mxu0 %vm378_vm0, %v276_v0  ;;  %2650 = vmatpush.msk.msra.mxu3 %vm378_vm0, %v276_v0  ;;  %v274_v2 = vld [vmem:[%s4253_s1 + $0x10] sm:$0xff]  ;;  %v273_v3 = vld [vmem:[%s4253_s1 + $0x8] sm:$0xff]  ;;  %vm281_vm1 = vcmask 293888   ;;  %vm637_vm2 = vcmask 1040384   ;;  %vm782_vm3 = vcmask 1046528  }
  0x18   : > { %s236_s12 = scalar_select %p235_p13, %s2901_s22, 1  ;;  %v272_v4 = vld [vmem:[%s4253_s1] sm:$0xff]  ;;  %v1183_v25 = vld [vmem:[#allocation3 + $0x1f8] sm:$0xff]  ;;  %v1182_v26 = vld [vmem:[#allocation3 + $0x1f0] sm:$0xff] }
  0x19   : > { %394 = vmatpush.msra.mxu0 %v275_v1  ;;  %2651 = vmatpush.msra.mxu3 %v275_v1  ;;  %v1215_v29 = vld [vmem:[#allocation3 + $0x2f8] sm:$0xff]  ;;  %v1214_v30 = vld [vmem:[#allocation3 + $0x2f0] sm:$0xff]  ;;  %v1181_v31 = vld [vmem:[#allocation3 + $0x1e8] sm:$0xff]  ;;  %s232_s13 = sand.u32 1, %s2834_s19   ;;  %s2649_s23 = sshll.u32 %s2901_s22, 8 }
  0x1a   : > { %s2648_s17 = sshll.u32 %s236_s12, 8  ;;  %1216 = vmatpush.msra.mxu1 %v1183_v25  ;;  %2655 = vmatpush.msra.mxu2 %v1183_v25  ;;  %v1038_v32 = vld [vmem:[#allocation3 + $0x78] sm:$0xff]  ;;  %v1180_v33 = vld [vmem:[#allocation3 + $0x1e0] sm:$0xff]  ;;  %v1037_v34 = vld [vmem:[#allocation3 + $0x70] sm:$0xff]  ;;  %s2607_s16 = sshll.u32 %s232_s13, 8 }
  0x1b   : > { %s2955_s8 = scalar_lea.vmem %s4252_s0, %s2648_s17  ;;  %395 = vmatpush.msra.mxu0 %v274_v2  ;;  %2652 = vmatpush.msra.mxu3 %v274_v2  ;;  %v1179_v35 = vld [vmem:[#allocation3 + $0x1d8] sm:$0xff]  ;;  %v1036_v36 = vld [vmem:[#allocation3 + $0x68] sm:$0xff]  ;;  %v1212_v38 = vld [vmem:[#allocation3 + $0x2e0] sm:$0xff]  ;;  %s3902_s17 = scalar_lea.vmem [#allocation6], %s2607_s16 }
  0x1c   : > { %v240_v5 = vld [vmem:[%s2955_s8] sm:$0xff]  ;;  %v258_v6 = vld [vmem:[%s2955_s8 + $0x90] sm:$0xff]  ;;  %v241_v7 = vld [vmem:[%s2955_s8 + $0x8] sm:$0xff]  ;;  %1217 = vmatpush.msra.mxu1 %v1182_v26  ;;  %2656 = vmatpush.msra.mxu2 %v1182_v26  ;;  %s2523_s30 = scalar_lea.hbm %s4257_s5, %s2649_s23  ;;  %s2524_s6 = sshll.u32 %s3902_s17, 4  ;;  %s2525_s6 = int_to_ptr.vmem [resolvable:$true] %s2524_s6 }
  0x1d   : > { %396 = vmatpush.msra.mxu0 %v273_v3  ;;  %2653 = vmatpush.msra.mxu3 %v273_v3  ;;  %v259_v8 = vld [vmem:[%s2955_s8 + $0x98] sm:$0xff]  ;;  %v242_v9 = vld [vmem:[%s2955_s8 + $0x10] sm:$0xff]  ;;  %v260_v10 = vld [vmem:[%s2955_s8 + $0xa0] sm:$0xff]  ;;  %s2526_s7 = sshll.u32 %s2523_s30, 4  ;;  %s2512_s22 = scalar_lea.sflag [#allocation5], %s232_s13  ;;  %s2527_s7 = int_to_ptr.hbm [resolvable:$true] %s2526_s7 }
  0x1e   : > { %v243_v11 = vld [vmem:[%s2955_s8 + $0x18] sm:$0xff]  ;;  %v261_v12 = vld [vmem:[%s2955_s8 + $0xa8] sm:$0xff]  ;;  %v244_v13 = vld [vmem:[%s2955_s8 + $0x20] sm:$0xff]  ;;  %1218 = vmatpush.msra.mxu1 %v1181_v31  ;;  %2657 = vmatpush.msra.mxu2 %v1181_v31  ;;  %s2796_s12 = scalar_lea.hbm %s4257_s5, 512 }
  0x1f   : > { %397 = vmatpush.msra.mxu0 %v272_v4  ;;  %2654 = vmatpush.msra.mxu3 %v272_v4  ;;  %v262_v14 = vld [vmem:[%s2955_s8 + $0xb0] sm:$0xff]  ;;  %v245_v15 = vld [vmem:[%s2955_s8 + $0x28] sm:$0xff]  ;;  %v263_v16 = vld [vmem:[%s2955_s8 + $0xb8] sm:$0xff]  ;;  %v2847_v4 = vmov 0.0  }
  0x20   : > { %2611 = vmatmul.msk.f32.vlgmr.msra.gmra.mxu0 %vm281_vm1, %v240_v5  ;;  %2629 = vmatmul.msk.f32.vlgmr.msra.gmra.mxu3 %vm281_vm1, %v258_v6  ;;  %v246_v17 = vld [vmem:[%s2955_s8 + $0x30] sm:$0xff]  ;;  %v264_v18 = vld [vmem:[%s2955_s8 + $0xc0] sm:$0xff]  ;;  %v247_v19 = vld [vmem:[%s2955_s8 + $0x38] sm:$0xff]  ;;  %541 = vst [vmem:[#allocation2 + $0x78] sm:$0x1] %v2847_v4 }
  0x21   : > { %v265_v20 = vld [vmem:[%s2955_s8 + $0xc8] sm:$0xff]  ;;  %v248_v21 = vld [vmem:[%s2955_s8 + $0x40] sm:$0xff]  ;;  %v266_v22 = vld [vmem:[%s2955_s8 + $0xd0] sm:$0xff]  ;;  %1442 = vmatpush.msrb.mxu3 %v1215_v29  ;;  %1555 = vmatpush.msrb.mxu0 %v1038_v32  ;;  %527 = vst [vmem:[#allocation2 + $0x18] sm:$0xff] %v2847_v4 }
  0x22   : > { %v249_v23 = vld [vmem:[%s2955_s8 + $0x48] sm:$0xff]  ;;  %v267_v24 = vld [vmem:[%s2955_s8 + $0xd8] sm:$0xff]  ;;  %v250_v27 = vld [vmem:[%s2955_s8 + $0x50] sm:$0xff]  ;;  %1219 = vmatpush.msra.mxu1 %v1180_v33  ;;  %2658 = vmatpush.msra.mxu2 %v1180_v33  ;;  %542 = vst [vmem:[#allocation2 + $0xd8] sm:$0x1] %v2847_v4 }
  0x23   : > { %v268_v28 = vld [vmem:[%s2955_s8 + $0xe0] sm:$0xff]  ;;  %1443 = vmatpush.msrb.mxu3 %v1214_v30  ;;  %1556 = vmatpush.msrb.mxu0 %v1037_v34  ;;  %v1213_v37 = vld [vmem:[#allocation3 + $0x2e8] sm:$0xff]  ;;  %v1178_v39 = vld [vmem:[#allocation3 + $0x1d0] sm:$0xff]  ;;  %543 = vst [vmem:[#allocation2 + $0x138] sm:$0x1] %v2847_v4 }
  0x24   : > { %v1035_v40 = vld [vmem:[#allocation3 + $0x60] sm:$0xff]  ;;  %v251_v41 = vld [vmem:[%s2955_s8 + $0x58] sm:$0xff]  ;;  %1220 = vmatpush.msra.mxu1 %v1179_v35  ;;  %v269_v42 = vld [vmem:[%s2955_s8 + $0xe8] sm:$0xff]  ;;  %2659 = vmatpush.msra.mxu2 %v1179_v35  ;;  %544 = vst [vmem:[#allocation2 + $0x198] sm:$0x1] %v2847_v4 }
  0x25   : > { %1444 = vmatpush.msrb.mxu3 %v1213_v37  ;;  %1557 = vmatpush.msrb.mxu0 %v1036_v36  ;;  %v1211_v43 = vld [vmem:[#allocation3 + $0x2d8] sm:$0xff]  ;;  %v1177_v44 = vld [vmem:[#allocation3 + $0x1c8] sm:$0xff]  ;;  %v1176_v46 = vld [vmem:[#allocation3 + $0x1c0] sm:$0xff]  ;;  %545 = vst [vmem:[#allocation2 + $0x1f8] sm:$0x1] %v2847_v4 }
  0x26   : > { %1221 = vmatpush.msra.mxu1 %v1178_v39  ;;  %v1034_v45 = vld [vmem:[#allocation3 + $0x58] sm:$0xff]  ;;  %v1033_v47 = vld [vmem:[#allocation3 + $0x50] sm:$0xff]  ;;  %2660 = vmatpush.msra.mxu2 %v1178_v39  ;;  %v1209_v49 = vld [vmem:[#allocation3 + $0x2c8] sm:$0xff]  ;;  %546 = vst [vmem:[#allocation2 + $0x258] sm:$0x1] %v2847_v4 }
  0x27   : > { %1445 = vmatpush.msrb.mxu3 %v1212_v38  ;;  %1558 = vmatpush.msrb.mxu0 %v1035_v40  ;;  %v1210_v48 = vld [vmem:[#allocation3 + $0x2d0] sm:$0xff]  ;;  %v252_v50 = vld [vmem:[%s2955_s8 + $0x60] sm:$0xff]  ;;  %v1175_v51 = vld [vmem:[#allocation3 + $0x1b8] sm:$0xff]  ;;  %547 = vst [vmem:[#allocation2 + $0x2b8] sm:$0x1] %v2847_v4 }
  0x28   : > { %2612 = vmatmul.msk.f32.gmra.mxu0 %vm281_vm1, %v241_v7  ;;  %2630 = vmatmul.msk.f32.gmra.mxu3 %vm281_vm1, %v259_v8  ;;  %v1032_v52 = vld [vmem:[#allocation3 + $0x48] sm:$0xff]  ;;  %v1208_v53 = vld [vmem:[#allocation3 + $0x2c0] sm:$0xff]  ;;  %v1174_v54 = vld [vmem:[#allocation3 + $0x1b0] sm:$0xff]  ;;  %548 = vst [vmem:[#allocation2 + $0x318] sm:$0x1] %v2847_v4 }
  0x29   : > { %1222 = vmatpush.msra.mxu1 %v1177_v44  ;;  %1559 = vmatpush.msrb.mxu0 %v1034_v45  ;;  %v1031_v55 = vld [vmem:[#allocation3 + $0x40] sm:$0xff]  ;;  %v270_v56 = vld [vmem:[%s2955_s8 + $0xf0] sm:$0xff]  ;;  %v1207_v57 = vld [vmem:[#allocation3 + $0x2b8] sm:$0xff]  ;;  %549 = vst [vmem:[#allocation2 + $0x378] sm:$0x1] %v2847_v4 }
  0x2a   : > { %1446 = vmatpush.msrb.mxu3 %v1211_v43  ;;  %2661 = vmatpush.msra.mxu2 %v1177_v44  ;;  %v1173_v58 = vld [vmem:[#allocation3 + $0x1a8] sm:$0xff]  ;;  %v1030_v59 = vld [vmem:[#allocation3 + $0x38] sm:$0xff]  ;;  %v1206_v60 = vld [vmem:[#allocation3 + $0x2b0] sm:$0xff]  ;;  %550 = vst [vmem:[#allocation2 + $0x3d8] sm:$0x1] %v2847_v4 }
  0x2b   : > { %1223 = vmatpush.msra.mxu1 %v1176_v46  ;;  %1560 = vmatpush.msrb.mxu0 %v1033_v47  ;;  %v1172_v61 = vld [vmem:[#allocation3 + $0x1a0] sm:$0xff]  ;;  %v1029_v62 = vld [vmem:[#allocation3 + $0x30] sm:$0xff]  ;;  %v1205_v63 = vld [vmem:[#allocation3 + $0x2a8] sm:$0xff]  ;;  %551 = vst [vmem:[#allocation2 + $0x438] sm:$0x1] %v2847_v4 }
  0x2c   : > { %1447 = vmatpush.msrb.mxu3 %v1210_v48  ;;  %2662 = vmatpush.msra.mxu2 %v1176_v46  ;;  %v253_v0 = vld [vmem:[%s2955_s8 + $0x68] sm:$0xff]  ;;  %v1204_v1 = vld [vmem:[#allocation3 + $0x2a0] sm:$0xff]  ;;  %v1171_v2 = vld [vmem:[#allocation3 + $0x198] sm:$0xff]  ;;  %552 = vst [vmem:[#allocation2 + $0x498] sm:$0x1] %v2847_v4 }
  0x2d   : > { %1224 = vmatpush.msra.mxu1 %v1175_v51  ;;  %1561 = vmatpush.msrb.mxu0 %v1032_v52  ;;  %v1028_v3 = vld [vmem:[#allocation3 + $0x28] sm:$0xff]  ;;  %v1170_v5 = vld [vmem:[#allocation3 + $0x190] sm:$0xff]  ;;  %v1027_v6 = vld [vmem:[#allocation3 + $0x20] sm:$0xff]  ;;  %553 = vst [vmem:[#allocation2 + $0x4f8] sm:$0x1] %v2847_v4 }
  0x2e   : > { %1448 = vmatpush.msrb.mxu3 %v1209_v49  ;;  %2663 = vmatpush.msra.mxu2 %v1175_v51  ;;  %v1169_v7 = vld [vmem:[#allocation3 + $0x188] sm:$0xff]  ;;  %v1026_v8 = vld [vmem:[#allocation3 + $0x18] sm:$0xff]  ;;  %554 = vst [vmem:[#allocation2 + $0x558] sm:$0x1] %v2847_v4 }
  0x2f   : > { %1225 = vmatpush.msra.mxu1 %v1174_v54  ;;  %1562 = vmatpush.msrb.mxu0 %v1031_v55  ;;  %555 = vst [vmem:[#allocation2 + $0x5b8] sm:$0x1] %v2847_v4 }
  0x30   : > { %2613 = vmatmul.msk.f32.gmra.mxu0 %vm281_vm1, %v242_v9  ;;  %2631 = vmatmul.msk.f32.gmra.mxu3 %vm281_vm1, %v260_v10  ;;  %v254_v9 = vld [vmem:[%s2955_s8 + $0x70] sm:$0xff]  ;;  %v1168_v10 = vld [vmem:[#allocation3 + $0x180] sm:$0xff]  ;;  %556 = vst [vmem:[#allocation2 + $0x618] sm:$0x1] %v2847_v4 }
  0x31   : > { %1449 = vmatpush.msrb.mxu3 %v1208_v53  ;;  %1226 = vmatpush.msra.mxu1 %v1173_v58  ;;  %557 = vst [vmem:[#allocation2 + $0xa7] sm:$0x1] %v2847_v4 }
  0x32   : > { %1563 = vmatpush.msrb.mxu0 %v1030_v59  ;;  %2664 = vmatpush.msra.mxu2 %v1174_v54  ;;  %558 = vst [vmem:[#allocation2 + $0x107] sm:$0x1] %v2847_v4 }
  0x33   : > { %1450 = vmatpush.msrb.mxu3 %v1207_v57  ;;  %1227 = vmatpush.msra.mxu1 %v1172_v61  ;;  %559 = vst [vmem:[#allocation2 + $0x167] sm:$0x1] %v2847_v4 }
  0x34   : > { %1564 = vmatpush.msrb.mxu0 %v1029_v62  ;;  %2665 = vmatpush.msra.mxu2 %v1173_v58  ;;  %560 = vst [vmem:[#allocation2 + $0x1c7] sm:$0x1] %v2847_v4 }
  0x35   : > { %1451 = vmatpush.msrb.mxu3 %v1206_v60  ;;  %1228 = vmatpush.msra.mxu1 %v1171_v2  ;;  %561 = vst [vmem:[#allocation2 + $0x227] sm:$0x1] %v2847_v4 }
  0x36   : > { %1565 = vmatpush.msrb.mxu0 %v1028_v3  ;;  %2666 = vmatpush.msra.mxu2 %v1172_v61  ;;  %562 = vst [vmem:[#allocation2 + $0x287] sm:$0x1] %v2847_v4 }
  0x37   : > { %1452 = vmatpush.msrb.mxu3 %v1205_v63  ;;  %1229 = vmatpush.msra.mxu1 %v1170_v5  ;;  %563 = vst [vmem:[#allocation2 + $0x2e7] sm:$0x1] %v2847_v4 }
  0x38   : > { %2614 = vmatmul.msk.f32.gmra.mxu0 %vm281_vm1, %v243_v11  ;;  %2632 = vmatmul.msk.f32.gmra.mxu3 %vm281_vm1, %v261_v12  ;;  %v1025_v11 = vld [vmem:[#allocation3 + $0x10] sm:$0xff]  ;;  %v271_v12 = vld [vmem:[%s2955_s8 + $0xf8] sm:$0xff]  ;;  %564 = vst [vmem:[#allocation2 + $0x347] sm:$0x1] %v2847_v4 }
  0x39   : > { %1453 = vmatpush.msrb.mxu3 %v1204_v1  ;;  %1566 = vmatpush.msrb.mxu0 %v1027_v6  ;;  %565 = vst [vmem:[#allocation2 + $0x3a7] sm:$0x1] %v2847_v4 }
  0x3a   : > { %1230 = vmatpush.msra.mxu1 %v1169_v7  ;;  %2667 = vmatpush.msra.mxu2 %v1171_v2  ;;  %566 = vst [vmem:[#allocation2 + $0x407] sm:$0x1] %v2847_v4 }
  0x3b   : > { %1567 = vmatpush.msrb.mxu0 %v1026_v8  ;;  %567 = vst [vmem:[#allocation2 + $0x467] sm:$0x1] %v2847_v4 }
  0x3c   : > { %1231 = vmatpush.msra.mxu1 %v1168_v10  ;;  %2668 = vmatpush.msra.mxu2 %v1170_v5  ;;  %568 = vst [vmem:[#allocation2 + $0x4c7] sm:$0x1] %v2847_v4 }
  0x3d   : > { %1568 = vmatpush.msrb.mxu0 %v1025_v11  ;;  %569 = vst [vmem:[#allocation2 + $0x527] sm:$0x1] %v2847_v4 }
  0x3e   : > { %2669 = vmatpush.msra.mxu2 %v1169_v7  ;;  %570 = vst [vmem:[#allocation2 + $0x587] sm:$0x1] %v2847_v4 }
  0x3f   : > { %571 = vst [vmem:[#allocation2 + $0x5e7] sm:$0x1] %v2847_v4 }
  0x40   : > { %2615 = vmatmul.msk.f32.gmra.mxu0 %vm281_vm1, %v244_v13  ;;  %2633 = vmatmul.msk.f32.gmra.mxu3 %vm281_vm1, %v262_v14  ;;  %v1203_v13 = vld [vmem:[#allocation3 + $0x298] sm:$0xff]  ;;  %v1202_v14 = vld [vmem:[#allocation3 + $0x290] sm:$0xff]  ;;  %572 = vst [vmem:[#allocation2 + $0x647] sm:$0x1] %v2847_v4 }
  0x41   : > { %1454 = vmatpush.msrb.mxu3 %v1203_v13  ;;  %2670 = vmatpush.msra.mxu2 %v1168_v10 }
  0x43   : > { %1455 = vmatpush.msrb.mxu3 %v1202_v14 }
  0x48   : > { %2616 = vmatmul.msk.f32.gmra.mxu0 %vm281_vm1, %v245_v15  ;;  %2634 = vmatmul.msk.f32.gmra.mxu3 %vm281_vm1, %v263_v16  ;;  %v1201_v15 = vld [vmem:[#allocation3 + $0x288] sm:$0xff]  ;;  %v1200_v16 = vld [vmem:[#allocation3 + $0x280] sm:$0xff] }
  0x49   : > { %1456 = vmatpush.msrb.mxu3 %v1201_v15 }
  0x4b   : > { %1457 = vmatpush.msrb.mxu3 %v1200_v16 }
  0x50   : > { %2617 = vmatmul.msk.f32.gmra.mxu0 %vm281_vm1, %v246_v17  ;;  %2635 = vmatmul.msk.f32.gmra.mxu3 %vm281_vm1, %v264_v18  ;;  %v255_v17 = vld [vmem:[%s2955_s8 + $0x78] sm:$0xff]  ;;  %v1024_v18 = vld [vmem:[#allocation3 + $0x8] sm:$0xff] }
  0x51   : > { %1569 = vmatpush.msrb.mxu0 %v1024_v18 }
  0x58   : > { %2618 = vmatmul.msk.f32.gmra.mxu0 %vm281_vm1, %v247_v19  ;;  %2636 = vmatmul.msk.f32.gmra.mxu3 %vm281_vm1, %v265_v20  ;;  %v1023_v19 = vld [vmem:[#allocation3] sm:$0xff] }
  0x59   : > { %1570 = vmatpush.msrb.mxu0 %v1023_v19  ;;  %v3031_v20 = vld [vmem:[%s4254_s2] ss:$0 sm:$0xff] }
  0x60   : > { %2619 = vmatmul.msk.f32.gmra.mxu0 %vm281_vm1, %v248_v21  ;;  %2637 = vmatmul.msk.f32.gmra.mxu3 %vm281_vm1, %v266_v22  ;;  %v256_v22 = vld [vmem:[%s2955_s8 + $0x80] sm:$0xff] }
  0x68   : > { %2620 = vmatmul.msk.f32.gmra.mxu0 %vm281_vm1, %v249_v23  ;;  %2638 = vmatmul.msk.f32.gmra.mxu3 %vm281_vm1, %v267_v24 }
  0x70   : > { %2621 = vmatmul.msk.f32.gmra.mxu0 %vm281_vm1, %v250_v27  ;;  %2639 = vmatmul.msk.f32.gmra.mxu3 %vm281_vm1, %v268_v28  ;;  %v257_v28 = vld [vmem:[%s2955_s8 + $0x88] sm:$0xff]  ;;  %s2790_s8 = sshra.s32 %s2527_s7, 4  ;;  %s2791_s8 = int_to_ptr.hbm [resolvable:$true] %s2790_s8 }
  0x71   : > { %s2792_s9 = scalar_lea.hbm %s2791_s8, 256  ;;  %p2797_p3 = scmp.lt.s32.totalorder %s2791_s8, %s4257_s5 }
  0x72   : > { %p2793_p0 = scmp.ne.s32.totalorder %s2791_s8, %s2792_s9  ;;  %p2798_p4 = scmp.lt.s32.totalorder %s2796_s12, %s2792_s9 }
  0x74   : > { %p2794_p1 = pnand %p2793_p0, %p2918_p5  ;;  %p2799_p7 = por %p2798_p4, %p2797_p3 }
  0x76   : > { %p2795_p2 = pneg %p2794_p1 }
  0x78   : > { %2622 = vmatmul.msk.f32.gmra.mxu0 %vm281_vm1, %v251_v41  ;;  %2640 = vmatmul.msk.f32.gmra.mxu3 %vm281_vm1, %v269_v42  ;;  %p2800_p8 = pnand %p2799_p7, %p2795_p2 }
  0x80   : > { %2623 = vmatmul.msk.f32.gmra.mxu0 %vm281_vm1, %v252_v50  ;;  %2641 = vmatmul.msk.f32.gmra.mxu3 %vm281_vm1, %v270_v56 }
  0x88   : > { %2624 = vmatmul.msk.f32.gmra.mxu0 %vm281_vm1, %v253_v0  ;;  %2642 = vmatmul.msk.f32.gmra.mxu3 %vm281_vm1, %v271_v12 }
  0x90   : > { %2625 = vmatmul.msk.f32.gmra.mxu0 %vm281_vm1, %v254_v9 }
  0x98   : > { %2626 = vmatmul.msk.f32.gmra.mxu0 %vm281_vm1, %v255_v17 }
  0x9d   : > { %v399_v21 = vpop.f32.mrf.mxu0 }
  0x9e   : > { %v400_v23 = vadd.f32 %v3031_v20, %v399_v21 }
  0xa0   : > { %v495_v24 = vmax.f32 %v400_v23, 0.0  ;;  %2627 = vmatmul.msk.f32.gmra.mxu0 %vm281_vm1, %v256_v22 }
  0xa2   : > { %573 = vst [vmem:[#allocation2 + $0x80] sm:$0xff] %v495_v24  ;;  %v638_v25 = vrot.slane %v495_v24, 7  ;;  %v783_v26 = vrot.slane %v495_v24, 1 }
  0xa3   : > { %v453_v31 = vpop.f32.mrf.mxu3 }
  0xa4   : > { %734 = vst [vmem:[#allocation2 + $0x78] sm:$0xfe] %v638_v25  ;;  %v454_v50 = vadd.f32 %v3031_v20, %v453_v31 }
  0xa5   : > { %v402_v27 = vpop.f32.mrf.mxu0 }
  0xa6   : > { %v403_v29 = vadd.f32 %v3031_v20, %v402_v27  ;;  %v513_v56 = vmax.f32 %v454_v50, 0.0 }
  0xa8   : > { %v496_v30 = vmax.f32 %v403_v29, 0.0  ;;  %2628 = vmatmul.msk.f32.gmra.mxu0 %vm281_vm1, %v257_v28  ;;  %v665_v63 = vrot.slane %v513_v56, 7  ;;  %v810_v0 = vrot.slane %v513_v56, 1  ;;  %591 = vst [vmem:[#allocation2 + $0x3e0] sm:$0xff] %v513_v56 }
  0xaa   : > { %574 = vst [vmem:[#allocation2 + $0x98] sm:$0xff] %v496_v30  ;;  %v639_v32 = vrot.slane %v496_v30, 7  ;;  %v784_v33 = vrot.slane %v496_v30, 1 }
  0xab   : > { %v1071_v34 = vld [vmem:[#allocation2 + $0x78] sm:$0xff]  ;;  %v456_v39 = vpop.f32.mrf.mxu3  ;;  %761 = vst [vmem:[#allocation2 + $0x3d8] sm:$0xfe] %v665_v63 }
  0xac   : > { %v3054_v35 = vsel %vm637_vm2, %v638_v25, %v639_v32  ;;  %v785_v36 = vsel %vm782_vm3, %v783_v26, %v784_v33  ;;  %1232 = vmatmul.f32.vlgmr.msra.gmra.mxu1 %v1071_v34  ;;  %881 = vst [vmem:[#allocation2 + $0xa0] sm:$0x7f] %v784_v33  ;;  %v457_v53 = vadd.f32 %v3031_v20, %v456_v39 }
  0xad   : > { %v405_v37 = vpop.f32.mrf.mxu0  ;;  %1458 = vmatmul.f32.vlgmr.msrb.gmra.mxu3 %v785_v36  ;;  %880 = vst [vmem:[#allocation2 + $0x88] sm:$0xff] %v785_v36 }
  0xae   : > { %v406_v38 = vadd.f32 %v3031_v20, %v405_v37  ;;  %v514_v58 = vmax.f32 %v457_v53, 0.0 }
  0xb0   : > { %1571 = vmatmul.f32.vlgmr.msrb.gmra.mxu0 %v2847_v4  ;;  %v3064_v40 = vmax.f32 %v406_v38, 0.0  ;;  %v666_v1 = vrot.slane %v514_v58, 7  ;;  %592 = vst [vmem:[#allocation2 + $0x3f8] sm:$0xff] %v514_v58  ;;  %v811_v10 = vrot.slane %v514_v58, 1 }
  0xb2   : > { %v641_v44 = vrot.slane %v3064_v40, 7  ;;  %v786_v46 = vrot.slane %v3064_v40, 1  ;;  %575 = vst [vmem:[#allocation2 + $0xe0] sm:$0xff] %v3064_v40  ;;  %v3101_v5 = vsel %vm637_vm2, %v665_v63, %v666_v1  ;;  %v3117_v17 = vsel %vm782_vm3, %v810_v0, %v811_v10 }
  0xb3   : > { %v1076_v43 = vld [vmem:[#allocation2 + $0xa0] sm:$0xff]  ;;  %v459_v47 = vpop.f32.mrf.mxu3  ;;  %762 = vst [vmem:[#allocation2 + $0x3f0] sm:$0xff] %v3101_v5 }
  0xb4   : > { %1235 = vmatmul.f32.gmra.mxu1 %v3054_v35  ;;  %737 = vst [vmem:[#allocation2 + $0xd8] sm:$0xfe] %v641_v44  ;;  %v460_v11 = vadd.f32 %v3031_v20, %v459_v47 }
  0xb5   : > { %v408_v41 = vpop.f32.mrf.mxu0  ;;  %1461 = vmatmul.f32.gmra.mxu3 %v1076_v43  ;;  %907 = vst [vmem:[#allocation2 + $0x3e8] sm:$0xff] %v3117_v17 }
  0xb6   : > { %v409_v42 = vadd.f32 %v3031_v20, %v408_v41  ;;  %v515_v18 = vmax.f32 %v460_v11, 0.0  ;;  %908 = vst [vmem:[#allocation2 + $0x400] sm:$0x7f] %v811_v10 }
  0xb8   : > { %v3073_v45 = vmax.f32 %v409_v42, 0.0  ;;  %1574 = vmatmul.f32.gmra.mxu0 %v2847_v4  ;;  %v668_v26 = vrot.slane %v515_v18, 7  ;;  %v813_v27 = vrot.slane %v515_v18, 1  ;;  %593 = vst [vmem:[#allocation2 + $0x440] sm:$0xff] %v515_v18 }
  0xba   : > { %v642_v48 = vrot.slane %v3073_v45, 7  ;;  %v787_v49 = vrot.slane %v3073_v45, 1  ;;  %576 = vst [vmem:[#allocation2 + $0xf8] sm:$0xff] %v3073_v45 }
  0xbb   : > { %v462_v59 = vpop.f32.mrf.mxu3  ;;  %v1077_v62 = vld [vmem:[#allocation2 + $0xd8] sm:$0xff]  ;;  %764 = vst [vmem:[#allocation2 + $0x438] sm:$0xfe] %v668_v26 }
  0xbc   : > { %v3084_v51 = vsel %vm637_vm2, %v641_v44, %v642_v48  ;;  %v788_v52 = vsel %vm782_vm3, %v786_v46, %v787_v49  ;;  %884 = vst [vmem:[#allocation2 + $0x100] sm:$0x7f] %v787_v49  ;;  %1238 = vmatmul.f32.gmra.mxu1 %v1077_v62  ;;  %v463_v14 = vadd.f32 %v3031_v20, %v462_v59 }
  0xbd   : > { %v411_v54 = vpop.f32.mrf.mxu0  ;;  %738 = vst [vmem:[#allocation2 + $0xf0] sm:$0xff] %v3084_v51  ;;  %1464 = vmatmul.f32.gmra.mxu3 %v788_v52 }
  0xbe   : > { %v412_v55 = vadd.f32 %v3031_v20, %v411_v54  ;;  %883 = vst [vmem:[#allocation2 + $0xe8] sm:$0xff] %v788_v52  ;;  %v516_v21 = vmax.f32 %v463_v14, 0.0 }
  0xc0   : > { %v3091_v57 = vmax.f32 %v412_v55, 0.0  ;;  %1577 = vmatmul.f32.gmra.mxu0 %v1071_v34  ;;  %v669_v28 = vrot.slane %v516_v21, 7  ;;  %594 = vst [vmem:[#allocation2 + $0x458] sm:$0xff] %v516_v21  ;;  %v814_v37 = vrot.slane %v516_v21, 1 }
  0xc2   : > { %v644_v60 = vrot.slane %v3091_v57, 7  ;;  %v789_v61 = vrot.slane %v3091_v57, 1  ;;  %577 = vst [vmem:[#allocation2 + $0x140] sm:$0xff] %v3091_v57  ;;  %v3130_v33 = vsel %vm637_vm2, %v668_v26, %v669_v28  ;;  %v3146_v46 = vsel %vm782_vm3, %v813_v27, %v814_v37  ;;  %v1054_v26 = vld [vmem:[#allocation3 + $0xf8] sm:$0xff]  ;;  %v1053_v27 = vld [vmem:[#allocation3 + $0xf0] sm:$0xff] }
  0xc3   : > { %v1082_v6 = vld [vmem:[#allocation2 + $0x100] sm:$0xff]  ;;  %v465_v7 = vpop.f32.mrf.mxu3  ;;  %765 = vst [vmem:[#allocation2 + $0x450] sm:$0xff] %v3130_v33  ;;  %1668 = vmatpush.msrb.mxu1 %v1054_v26 }
  0xc4   : > { %740 = vst [vmem:[#allocation2 + $0x138] sm:$0xfe] %v644_v60  ;;  %1241 = vmatmul.f32.gmra.mxu1 %v3084_v51  ;;  %v466_v38 = vadd.f32 %v3031_v20, %v465_v7 }
  0xc5   : > { %v414_v2 = vpop.f32.mrf.mxu0  ;;  %1467 = vmatmul.f32.gmra.mxu3 %v1082_v6  ;;  %910 = vst [vmem:[#allocation2 + $0x448] sm:$0xff] %v3146_v46  ;;  %1669 = vmatpush.msrb.mxu1 %v1053_v27 }
  0xc6   : > { %v415_v3 = vadd.f32 %v3031_v20, %v414_v2  ;;  %v517_v47 = vmax.f32 %v466_v38, 0.0  ;;  %911 = vst [vmem:[#allocation2 + $0x460] sm:$0x7f] %v814_v37  ;;  %v1051_v38 = vld [vmem:[#allocation3 + $0xe0] sm:$0xff] }
  0xc8   : > { %v3097_v4 = vmax.f32 %v415_v3, 0.0  ;;  %1580 = vmatmul.f32.gmra.mxu0 %v3054_v35  ;;  %v671_v54 = vrot.slane %v517_v47, 7  ;;  %v816_v55 = vrot.slane %v517_v47, 1  ;;  %595 = vst [vmem:[#allocation2 + $0x4a0] sm:$0xff] %v517_v47  ;;  %v1050_v47 = vld [vmem:[#allocation3 + $0xd8] sm:$0xff] }
  0xca   : > { %578 = vst [vmem:[#allocation2 + $0x158] sm:$0xff] %v3097_v4  ;;  %v645_v8 = vrot.slane %v3097_v4, 7  ;;  %v790_v9 = vrot.slane %v3097_v4, 1 }
  0xcb   : > { %v1083_v22 = vld [vmem:[#allocation2 + $0x138] sm:$0xff]  ;;  %v468_v23 = vpop.f32.mrf.mxu3  ;;  %767 = vst [vmem:[#allocation2 + $0x498] sm:$0xfe] %v671_v54 }
  0xcc   : > { %v3109_v12 = vsel %vm637_vm2, %v644_v60, %v645_v8  ;;  %v791_v13 = vsel %vm782_vm3, %v789_v61, %v790_v9  ;;  %887 = vst [vmem:[#allocation2 + $0x160] sm:$0x7f] %v790_v9  ;;  %1244 = vmatmul.f32.gmra.mxu1 %v1083_v22  ;;  %v469_v42 = vadd.f32 %v3031_v20, %v468_v23 }
  0xcd   : > { %741 = vst [vmem:[#allocation2 + $0x150] sm:$0xff] %v3109_v12  ;;  %v417_v15 = vpop.f32.mrf.mxu0  ;;  %1470 = vmatmul.f32.gmra.mxu3 %v791_v13 }
  0xce   : > { %886 = vst [vmem:[#allocation2 + $0x148] sm:$0xff] %v791_v13  ;;  %v418_v16 = vadd.f32 %v3031_v20, %v417_v15  ;;  %v518_v49 = vmax.f32 %v469_v42, 0.0 }
  0xd0   : > { %v3119_v19 = vmax.f32 %v418_v16, 0.0  ;;  %1583 = vmatmul.f32.gmra.mxu0 %v1077_v62  ;;  %v672_v56 = vrot.slane %v518_v49, 7  ;;  %596 = vst [vmem:[#allocation2 + $0x4b8] sm:$0xff] %v518_v49  ;;  %v817_v2 = vrot.slane %v518_v49, 1 }
  0xd2   : > { %579 = vst [vmem:[#allocation2 + $0x1a0] sm:$0xff] %v3119_v19  ;;  %v647_v24 = vrot.slane %v3119_v19, 7  ;;  %v792_v25 = vrot.slane %v3119_v19, 1  ;;  %v3159_v62 = vsel %vm637_vm2, %v671_v54, %v672_v56  ;;  %v3175_v11 = vsel %vm782_vm3, %v816_v55, %v817_v2  ;;  %v1048_v56 = vld [vmem:[#allocation3 + $0xc8] sm:$0xff] }
  0xd3   : > { %v1088_v31 = vld [vmem:[#allocation2 + $0x160] sm:$0xff]  ;;  %v471_v34 = vpop.f32.mrf.mxu3  ;;  %768 = vst [vmem:[#allocation2 + $0x4b0] sm:$0xff] %v3159_v62 }
  0xd4   : > { %743 = vst [vmem:[#allocation2 + $0x198] sm:$0xfe] %v647_v24  ;;  %1247 = vmatmul.f32.gmra.mxu1 %v3109_v12  ;;  %v472_v3 = vadd.f32 %v3031_v20, %v471_v34 }
  0xd5   : > { %v420_v29 = vpop.f32.mrf.mxu0  ;;  %1473 = vmatmul.f32.gmra.mxu3 %v1088_v31  ;;  %913 = vst [vmem:[#allocation2 + $0x4a8] sm:$0xff] %v3175_v11 }
  0xd6   : > { %v421_v30 = vadd.f32 %v3031_v20, %v420_v29  ;;  %914 = vst [vmem:[#allocation2 + $0x4c0] sm:$0x7f] %v817_v2 }
  0xd8   : > { %v3126_v32 = vmax.f32 %v421_v30, 0.0  ;;  %1586 = vmatmul.f32.gmra.mxu0 %v3084_v51  ;;  %v1052_v30 = vld [vmem:[#allocation3 + $0xe8] sm:$0xff] }
  0xd9   : > { %1670 = vmatpush.msrb.mxu1 %v1052_v30 }
  0xda   : > { %580 = vst [vmem:[#allocation2 + $0x1b8] sm:$0xff] %v3126_v32  ;;  %v648_v35 = vrot.slane %v3126_v32, 7  ;;  %v793_v36 = vrot.slane %v3126_v32, 1 }
  0xdb   : > { %v1089_v50 = vld [vmem:[#allocation2 + $0x198] sm:$0xff]  ;;  %v474_v51 = vpop.f32.mrf.mxu3  ;;  %1671 = vmatpush.msrb.mxu1 %v1051_v38 }
  0xdc   : > { %v3138_v39 = vsel %vm637_vm2, %v647_v24, %v648_v35  ;;  %v794_v41 = vsel %vm782_vm3, %v792_v25, %v793_v36  ;;  %890 = vst [vmem:[#allocation2 + $0x1c0] sm:$0x7f] %v793_v36  ;;  %1250 = vmatmul.f32.gmra.mxu1 %v1089_v50  ;;  %v475_v8 = vadd.f32 %v3031_v20, %v474_v51 }
  0xdd   : > { %744 = vst [vmem:[#allocation2 + $0x1b0] sm:$0xff] %v3138_v39  ;;  %v423_v43 = vpop.f32.mrf.mxu0  ;;  %1476 = vmatmul.f32.gmra.mxu3 %v794_v41  ;;  %1672 = vmatpush.msrb.mxu1 %v1050_v47 }
  0xde   : > { %889 = vst [vmem:[#allocation2 + $0x1a8] sm:$0xff] %v794_v41  ;;  %v424_v44 = vadd.f32 %v3031_v20, %v423_v43  ;;  %v3179_v14 = vmax.f32 %v475_v8, 0.0 }
  0xe0   : > { %v3148_v48 = vmax.f32 %v424_v44, 0.0  ;;  %1589 = vmatmul.f32.gmra.mxu0 %v1083_v22  ;;  %v675_v24 = vrot.slane %v3179_v14, 7  ;;  %598 = vst [vmem:[#allocation2 + $0x518] sm:$0xff] %v3179_v14  ;;  %v820_v37 = vrot.slane %v3179_v14, 1 }
  0xe2   : > { %581 = vst [vmem:[#allocation2 + $0x200] sm:$0xff] %v3148_v48  ;;  %v650_v52 = vrot.slane %v3148_v48, 7  ;;  %v795_v53 = vrot.slane %v3148_v48, 1 }
  0xe3   : > { %v1094_v60 = vld [vmem:[#allocation2 + $0x1c0] sm:$0xff]  ;;  %v477_v63 = vpop.f32.mrf.mxu3  ;;  %917 = vst [vmem:[#allocation2 + $0x520] sm:$0x7f] %v820_v37 }
  0xe4   : > { %746 = vst [vmem:[#allocation2 + $0x1f8] sm:$0xfe] %v650_v52  ;;  %1253 = vmatmul.f32.gmra.mxu1 %v3138_v39 }
  0xe5   : > { %v426_v58 = vpop.f32.mrf.mxu0  ;;  %1479 = vmatmul.f32.gmra.mxu3 %v1094_v60 }
  0xe6   : > { %v427_v59 = vadd.f32 %v3031_v20, %v426_v58 }
  0xe8   : > { %v3155_v61 = vmax.f32 %v427_v59, 0.0  ;;  %1592 = vmatmul.f32.gmra.mxu0 %v3109_v12  ;;  %v519_v12 = vmax.f32 %v472_v3, 0.0 }
  0xea   : > { %582 = vst [vmem:[#allocation2 + $0x218] sm:$0xff] %v3155_v61  ;;  %v651_v0 = vrot.slane %v3155_v61, 7  ;;  %v796_v1 = vrot.slane %v3155_v61, 1  ;;  %v674_v21 = vrot.slane %v519_v12, 7  ;;  %v819_v23 = vrot.slane %v519_v12, 1 }
  0xeb   : > { %v1095_v15 = vld [vmem:[#allocation2 + $0x1f8] sm:$0xff]  ;;  %v480_v22 = vpop.f32.mrf.mxu3  ;;  %597 = vst [vmem:[#allocation2 + $0x500] sm:$0xff] %v519_v12 }
  0xec   : > { %v3167_v6 = vsel %vm637_vm2, %v650_v52, %v651_v0  ;;  %v797_v7 = vsel %vm782_vm3, %v795_v53, %v796_v1  ;;  %893 = vst [vmem:[#allocation2 + $0x220] sm:$0x7f] %v796_v1  ;;  %1256 = vmatmul.f32.gmra.mxu1 %v1095_v15  ;;  %v3191_v34 = vsel %vm637_vm2, %v674_v21, %v675_v24  ;;  %v1049_v53 = vld [vmem:[#allocation3 + $0xd0] sm:$0xff] }
  0xed   : > { %747 = vst [vmem:[#allocation2 + $0x210] sm:$0xff] %v3167_v6  ;;  %v429_v9 = vpop.f32.mrf.mxu0  ;;  %1482 = vmatmul.f32.gmra.mxu3 %v797_v7  ;;  %v481_v43 = vadd.f32 %v3031_v20, %v480_v22  ;;  %v3209_v51 = vsel %vm782_vm3, %v819_v23, %v820_v37  ;;  %1673 = vmatpush.msrb.mxu1 %v1049_v53  ;;  %v1043_v23 = vld [vmem:[#allocation3 + $0xa0] sm:$0xff] }
  0xee   : > { %892 = vst [vmem:[#allocation2 + $0x208] sm:$0xff] %v797_v7  ;;  %v430_v10 = vadd.f32 %v3031_v20, %v429_v9  ;;  %v1046_v7 = vld [vmem:[#allocation3 + $0xb8] sm:$0xff]  ;;  %v1045_v9 = vld [vmem:[#allocation3 + $0xb0] sm:$0xff] }
  0xef   : > { %770 = vst [vmem:[#allocation2 + $0x4f8] sm:$0xfe] %v674_v21  ;;  %v3213_v55 = vmax.f32 %v481_v43, 0.0  ;;  %1674 = vmatpush.msrb.mxu1 %v1048_v56  ;;  %v1198_v56 = vld [vmem:[#allocation3 + $0x270] sm:$0xff] }
  0xf0   : > { %v3177_v13 = vmax.f32 %v430_v10, 0.0  ;;  %1595 = vmatmul.f32.gmra.mxu0 %v1089_v50  ;;  %771 = vst [vmem:[#allocation2 + $0x510] sm:$0xff] %v3191_v34 }
  0xf1   : > { %916 = vst [vmem:[#allocation2 + $0x508] sm:$0xff] %v3209_v51  ;;  %v678_v2 = vrot.slane %v3213_v55, 7  ;;  %v823_v22 = vrot.slane %v3213_v55, 1 }
  0xf2   : > { %583 = vst [vmem:[#allocation2 + $0x260] sm:$0xff] %v3177_v13  ;;  %v653_v16 = vrot.slane %v3177_v13, 7  ;;  %v798_v18 = vrot.slane %v3177_v13, 1 }
  0xf3   : > { %v1100_v29 = vld [vmem:[#allocation2 + $0x220] sm:$0xff]  ;;  %v483_v49 = vpop.f32.mrf.mxu3  ;;  %600 = vst [vmem:[#allocation2 + $0x578] sm:$0xff] %v3213_v55 }
  0xf4   : > { %749 = vst [vmem:[#allocation2 + $0x258] sm:$0xfe] %v653_v16  ;;  %1259 = vmatmul.f32.gmra.mxu1 %v3167_v6 }
  0xf5   : > { %v432_v25 = vpop.f32.mrf.mxu0  ;;  %1485 = vmatmul.f32.gmra.mxu3 %v1100_v29  ;;  %920 = vst [vmem:[#allocation2 + $0x580] sm:$0x7f] %v823_v22 }
  0xf6   : > { %v433_v28 = vadd.f32 %v3031_v20, %v432_v25 }
  0xf8   : > { %v3187_v31 = vmax.f32 %v433_v28, 0.0  ;;  %1598 = vmatmul.f32.gmra.mxu0 %v3138_v39  ;;  %v478_v39 = vadd.f32 %v3031_v20, %v477_v63  ;;  %v1047_v63 = vld [vmem:[#allocation3 + $0xc0] sm:$0xff]  ;;  %v1042_v28 = vld [vmem:[#allocation3 + $0x98] sm:$0xff] }
  0xf9   : > { %1675 = vmatpush.msrb.mxu1 %v1047_v63 }
  0xfa   : > { %584 = vst [vmem:[#allocation2 + $0x278] sm:$0xff] %v3187_v31  ;;  %v654_v35 = vrot.slane %v3187_v31, 7  ;;  %v799_v36 = vrot.slane %v3187_v31, 1  ;;  %v521_v52 = vmax.f32 %v478_v39, 0.0  ;;  %v1040_v39 = vld [vmem:[#allocation3 + $0x88] sm:$0xff] }
  0xfb   : > { %v1101_v58 = vld [vmem:[#allocation2 + $0x258] sm:$0xff]  ;;  %1676 = vmatpush.msrb.mxu1 %v1046_v7  ;;  %v486_v12 = vpop.f32.mrf.mxu3 }
  0xfc   : > { %v3201_v41 = vsel %vm637_vm2, %v653_v16, %v654_v35  ;;  %v800_v42 = vsel %vm782_vm3, %v798_v18, %v799_v36  ;;  %896 = vst [vmem:[#allocation2 + $0x280] sm:$0x7f] %v799_v36  ;;  %v677_v0 = vrot.slane %v521_v52, 7  ;;  %1262 = vmatmul.f32.gmra.mxu1 %v1101_v58  ;;  %v822_v1 = vrot.slane %v521_v52, 1  ;;  %v1044_v16 = vld [vmem:[#allocation3 + $0xa8] sm:$0xff]  ;;  %v1041_v36 = vld [vmem:[#allocation3 + $0x90] sm:$0xff] }
  0xfd   : > { %750 = vst [vmem:[#allocation2 + $0x270] sm:$0xff] %v3201_v41  ;;  %v435_v44 = vpop.f32.mrf.mxu0  ;;  %1488 = vmatmul.f32.gmra.mxu3 %v800_v42  ;;  %1677 = vmatpush.msrb.mxu1 %v1045_v9  ;;  %v487_v26 = vadd.f32 %v3031_v20, %v486_v12 }
  0xfe   : > { %895 = vst [vmem:[#allocation2 + $0x268] sm:$0xff] %v800_v42  ;;  %v436_v50 = vadd.f32 %v3031_v20, %v435_v44  ;;  %v3243_v30 = vsel %vm782_vm3, %v822_v1, %v823_v22  ;;  %v1199_v42 = vld [vmem:[#allocation3 + $0x278] sm:$0xff] }
  0xff   : > { %599 = vst [vmem:[#allocation2 + $0x560] sm:$0xff] %v521_v52  ;;  %1678 = vmatpush.msrb.mxu1 %v1044_v16  ;;  %v524_v38 = vmax.f32 %v487_v26, 0.0  ;;  %1329 = vmatpush.msrb.mxu2 %v1199_v42 }
 0x100   : > { %v3211_v54 = vmax.f32 %v436_v50, 0.0  ;;  %1601 = vmatmul.f32.gmra.mxu0 %v1095_v15  ;;  %773 = vst [vmem:[#allocation2 + $0x558] sm:$0xfe] %v677_v0  ;;  %v3225_v15 = vsel %vm637_vm2, %v677_v0, %v678_v2  ;;  %v1039_v50 = vld [vmem:[#allocation3 + $0x80] sm:$0xff] }
 0x101   : > { %774 = vst [vmem:[#allocation2 + $0x570] sm:$0xff] %v3225_v15  ;;  %1679 = vmatpush.msrb.mxu1 %v1043_v23  ;;  %v681_v55 = vrot.slane %v524_v38, 7  ;;  %1330 = vmatpush.msrb.mxu2 %v1198_v56 }
 0x102   : > { %585 = vst [vmem:[#allocation2 + $0x2c0] sm:$0xff] %v3211_v54  ;;  %v656_v59 = vrot.slane %v3211_v54, 7  ;;  %v801_v60 = vrot.slane %v3211_v54, 1 }
 0x103   : > { %v1106_v10 = vld [vmem:[#allocation2 + $0x280] sm:$0xff]  ;;  %1680 = vmatpush.msrb.mxu1 %v1042_v28  ;;  %919 = vst [vmem:[#allocation2 + $0x568] sm:$0xff] %v3243_v30  ;;  %v489_v44 = vpop.f32.mrf.mxu3 }
 0x104   : > { %752 = vst [vmem:[#allocation2 + $0x2b8] sm:$0xfe] %v656_v59  ;;  %1265 = vmatmul.f32.gmra.mxu1 %v3201_v41  ;;  %v490_v7 = vadd.f32 %v3031_v20, %v489_v44  ;;  %v1196_v44 = vld [vmem:[#allocation3 + $0x260] sm:$0xff] }
 0x105   : > { %v438_v3 = vpop.f32.mrf.mxu0  ;;  %1491 = vmatmul.f32.gmra.mxu3 %v1106_v10  ;;  %1681 = vmatpush.msrb.mxu1 %v1041_v36  ;;  %602 = vst [vmem:[#allocation2 + $0x5d8] sm:$0xff] %v524_v38 }
 0x106   : > { %v439_v8 = vadd.f32 %v3031_v20, %v438_v3  ;;  %v826_v3 = vrot.slane %v524_v38, 1 }
 0x107   : > { %1682 = vmatpush.msrb.mxu1 %v1040_v39 }
 0x108   : > { %v3221_v14 = vmax.f32 %v439_v8, 0.0  ;;  %1604 = vmatmul.f32.gmra.mxu0 %v3167_v6  ;;  %v484_v6 = vadd.f32 %v3031_v20, %v483_v49  ;;  %923 = vst [vmem:[#allocation2 + $0x5e0] sm:$0x7f] %v826_v3 }
 0x109   : > { %1683 = vmatpush.msrb.mxu1 %v1039_v50 }
 0x10a   : > { %586 = vst [vmem:[#allocation2 + $0x2d8] sm:$0xff] %v3221_v14  ;;  %v657_v18 = vrot.slane %v3221_v14, 7  ;;  %v802_v21 = vrot.slane %v3221_v14, 1  ;;  %v523_v35 = vmax.f32 %v484_v6, 0.0 }
 0x10b   : > { %v1107_v43 = vld [vmem:[#allocation2 + $0x2b8] sm:$0xff]  ;;  %v492_v8 = vpop.f32.mrf.mxu3 }
 0x10c   : > { %v3235_v24 = vsel %vm637_vm2, %v656_v59, %v657_v18  ;;  %v803_v25 = vsel %vm782_vm3, %v801_v60, %v802_v21  ;;  %899 = vst [vmem:[#allocation2 + $0x2e0] sm:$0x7f] %v802_v21  ;;  %v680_v52 = vrot.slane %v523_v35, 7  ;;  %1268 = vmatmul.f32.gmra.mxu1 %v1107_v43  ;;  %v825_v53 = vrot.slane %v523_v35, 1 }
 0x10d   : > { %753 = vst [vmem:[#allocation2 + $0x2d0] sm:$0xff] %v3235_v24  ;;  %v441_v27 = vpop.f32.mrf.mxu0  ;;  %1494 = vmatmul.f32.gmra.mxu3 %v803_v25  ;;  %v493_v10 = vadd.f32 %v3031_v20, %v492_v8  ;;  %v525_v21 = vmax.f32 %v490_v7, 0.0  ;;  %v3312_v7 = vld [vmem:[#allocation2 + $0x3d8] sm:$0xff]  ;;  %v1194_v8 = vld [vmem:[#allocation3 + $0x250] sm:$0xff] }
 0x10e   : > { %898 = vst [vmem:[#allocation2 + $0x2c8] sm:$0xff] %v803_v25  ;;  %v442_v29 = vadd.f32 %v3031_v20, %v441_v27  ;;  %v3256_v0 = vsel %vm637_vm2, %v680_v52, %v681_v55  ;;  %v3272_v18 = vsel %vm782_vm3, %v825_v53, %v826_v3  ;;  %v1197_v25 = vld [vmem:[#allocation3 + $0x268] sm:$0xff] }
 0x10f   : > { %601 = vst [vmem:[#allocation2 + $0x5c0] sm:$0xff] %v523_v35  ;;  %v526_v23 = vmax.f32 %v493_v10, 0.0  ;;  %1331 = vmatpush.msrb.mxu2 %v1197_v25  ;;  %v683_v28 = vrot.slane %v525_v21, 7 }
 0x110   : > { %v3245_v37 = vmax.f32 %v442_v29, 0.0  ;;  %1607 = vmatmul.f32.gmra.mxu0 %v1101_v58  ;;  %776 = vst [vmem:[#allocation2 + $0x5b8] sm:$0xfe] %v680_v52  ;;  %v828_v29 = vrot.slane %v525_v21, 1 }
 0x111   : > { %777 = vst [vmem:[#allocation2 + $0x5d0] sm:$0xff] %v3256_v0  ;;  %v684_v35 = vrot.slane %v526_v23, 7  ;;  %1332 = vmatpush.msrb.mxu2 %v1196_v44  ;;  %v1136_v44 = vld [vmem:[#allocation2 + $0x460] sm:$0xff] }
 0x112   : > { %587 = vst [vmem:[#allocation2 + $0x320] sm:$0xff] %v3245_v37  ;;  %v659_v47 = vrot.slane %v3245_v37, 7  ;;  %v804_v49 = vrot.slane %v3245_v37, 1 }
 0x113   : > { %v1112_v60 = vld [vmem:[#allocation2 + $0x2e0] sm:$0xff]  ;;  %922 = vst [vmem:[#allocation2 + $0x5c8] sm:$0xff] %v3272_v18 }
 0x114   : > { %755 = vst [vmem:[#allocation2 + $0x318] sm:$0xfe] %v659_v47  ;;  %1271 = vmatmul.f32.gmra.mxu1 %v3235_v24 }
 0x115   : > { %v444_v58 = vpop.f32.mrf.mxu0  ;;  %1497 = vmatmul.f32.gmra.mxu3 %v1112_v60  ;;  %603 = vst [vmem:[#allocation2 + $0x620] sm:$0xff] %v525_v21  ;;  %v2744_v60 = vld [vmem:[#allocation2 + $0x18] sm:$0xff] }
 0x116   : > { %v445_v59 = vadd.f32 %v3031_v20, %v444_v58  ;;  %779 = vst [vmem:[#allocation2 + $0x618] sm:$0xfe] %v683_v28 }
 0x117   : > { %604 = vst [vmem:[#allocation2 + $0x638] sm:$0xff] %v526_v23 }
 0x118   : > { %v3252_v63 = vmax.f32 %v445_v59, 0.0  ;;  %1610 = vmatmul.f32.gmra.mxu0 %v3201_v41  ;;  %v1195_v59 = vld [vmem:[#allocation3 + $0x258] sm:$0xff] }
 0x119   : > { %1333 = vmatpush.msrb.mxu2 %v1195_v59  ;;  %v1142_v59 = vld [vmem:[#allocation2 + $0x4c0] sm:$0xff] }
 0x11a   : > { %588 = vst [vmem:[#allocation2 + $0x338] sm:$0xff] %v3252_v63  ;;  %v660_v1 = vrot.slane %v3252_v63, 7  ;;  %v805_v2 = vrot.slane %v3252_v63, 1 }
 0x11b   : > { %v1113_v6 = vld [vmem:[#allocation2 + $0x318] sm:$0xff]  ;;  %1334 = vmatpush.msrb.mxu2 %v1194_v8  ;;  %v1188_v8 = vld [vmem:[#allocation3 + $0x220] sm:$0xff] }
 0x11c   : > { %v3264_v9 = vsel %vm637_vm2, %v659_v47, %v660_v1  ;;  %v806_v41 = vsel %vm782_vm3, %v804_v49, %v805_v2  ;;  %902 = vst [vmem:[#allocation2 + $0x340] sm:$0x7f] %v805_v2  ;;  %1274 = vmatmul.f32.gmra.mxu1 %v1113_v6 }
 0x11d   : > { %756 = vst [vmem:[#allocation2 + $0x330] sm:$0xff] %v3264_v9  ;;  %v447_v12 = vpop.f32.mrf.mxu0  ;;  %1500 = vmatmul.f32.gmra.mxu3 %v806_v41 }
 0x11e   : > { %901 = vst [vmem:[#allocation2 + $0x328] sm:$0xff] %v806_v41  ;;  %v448_v16 = vadd.f32 %v3031_v20, %v447_v12 }
 0x120   : > { %v3274_v22 = vmax.f32 %v448_v16, 0.0  ;;  %1613 = vmatmul.f32.gmra.mxu0 %v1107_v43  ;;  %v3285_v43 = vsel %vm637_vm2, %v683_v28, %v684_v35  ;;  %v1193_v16 = vld [vmem:[#allocation3 + $0x248] sm:$0xff] }
 0x121   : > { %780 = vst [vmem:[#allocation2 + $0x630] sm:$0xff] %v3285_v43  ;;  %1335 = vmatpush.msrb.mxu2 %v1193_v16 }
 0x122   : > { %589 = vst [vmem:[#allocation2 + $0x380] sm:$0xff] %v3274_v22  ;;  %v662_v26 = vrot.slane %v3274_v22, 7  ;;  %v807_v27 = vrot.slane %v3274_v22, 1 }
 0x123   : > { %v1118_v39 = vld [vmem:[#allocation2 + $0x340] sm:$0xff] }
 0x124   : > { %758 = vst [vmem:[#allocation2 + $0x378] sm:$0xfe] %v662_v26  ;;  %1277 = vmatmul.f32.gmra.mxu1 %v3264_v9 }
 0x125   : > { %v450_v36 = vpop.f32.mrf.mxu0  ;;  %1503 = vmatmul.f32.gmra.mxu3 %v1118_v39 }
 0x126   : > { %v451_v38 = vadd.f32 %v3031_v20, %v450_v36  ;;  %v829_v20 = vrot.slane %v526_v23, 1  ;;  %v1191_v36 = vld [vmem:[#allocation3 + $0x238] sm:$0xff] }
 0x128   : > { %v3281_v42 = vmax.f32 %v451_v38, 0.0  ;;  %1616 = vmatmul.f32.gmra.mxu0 %v3235_v24  ;;  %v3302_v56 = vsel %vm782_vm3, %v828_v29, %v829_v20  ;;  %926 = vst [vmem:[#allocation2 + $0x640] sm:$0x7f] %v829_v20  ;;  %v1190_v20 = vld [vmem:[#allocation3 + $0x230] sm:$0xff] }
 0x129   : > { %v3297_v53 = vpop.f32.mrf.mxu1  ;;  %925 = vst [vmem:[#allocation2 + $0x628] sm:$0xff] %v3302_v56 }
 0x12a   : > { %590 = vst [vmem:[#allocation2 + $0x398] sm:$0xff] %v3281_v42  ;;  %v663_v47 = vrot.slane %v3281_v42, 7  ;;  %v808_v49 = vrot.slane %v3281_v42, 1 }
 0x12b   : > { %v3290_v50 = vld [vmem:[#allocation2 + $0x378] sm:$0xff] }
 0x12c   : > { %v664_v24 = vsel %vm637_vm2, %v662_v26, %v663_v47  ;;  %v809_v52 = vsel %vm782_vm3, %v807_v27, %v808_v49  ;;  %1280 = vmatmul.f32.vlgmr.msra.gmra.mxu2 %v3290_v50  ;;  %905 = vst [vmem:[#allocation2 + $0x3a0] sm:$0x7f] %v808_v49  ;;  %1684 = vmatmul.f32.vlgmr.msrb.gmra.mxu1 %v2744_v60  ;;  %v3333_v26 = vld [vmem:[#allocation2 + $0x438] sm:$0xff]  ;;  %v1192_v27 = vld [vmem:[#allocation3 + $0x240] sm:$0xff] }
 0x12d   : > { %759 = vst [vmem:[#allocation2 + $0x390] sm:$0xff] %v664_v24  ;;  %v3299_v55 = vpop.f32.mrf.mxu0  ;;  %1506 = vmatmul.f32.gmra.mxu3 %v809_v52  ;;  %1336 = vmatpush.msrb.mxu2 %v1192_v27  ;;  %v1137_v49 = vld [vmem:[#allocation2 + $0x498] sm:$0xff] }
 0x12e   : > { %904 = vst [vmem:[#allocation2 + $0x388] sm:$0xff] %v809_v52  ;;  %v1189_v52 = vld [vmem:[#allocation3 + $0x228] sm:$0xff] }
 0x12f   : > { %1337 = vmatpush.msrb.mxu2 %v1191_v36  ;;  %v2007_v36 = vld [vmem:[#allocation3 + $0x378] sm:$0xff] }
 0x130   : > { %1619 = vmatmul.f32.gmra.mxu0 %v1113_v6  ;;  %v3304_v58 = vpop.f32.mrf.mxu3  ;;  %v1130_v6 = vld [vmem:[#allocation2 + $0x400] sm:$0xff]  ;;  %2040 = vmatpush.msra.mxu3 %v2007_v36 }
 0x131   : > { %v3309_v2 = vpop.f32.mrf.mxu1  ;;  %1338 = vmatpush.msrb.mxu2 %v1190_v20  ;;  %v2004_v36 = vld [vmem:[#allocation3 + $0x360] sm:$0xff] }
 0x133   : > { %v1124_v3 = vld [vmem:[#allocation2 + $0x3a0] sm:$0xff]  ;;  %1339 = vmatpush.msrb.mxu2 %v1189_v52  ;;  %v2022_v52 = vld [vmem:[#allocation3 + $0x3f0] sm:$0xff] }
 0x134   : > { %1283 = vmatmul.f32.gmra.mxu2 %v664_v24  ;;  %1687 = vmatmul.f32.gmra.mxu1 %v2744_v60 }
 0x135   : > { %v3307_v1 = vpop.f32.mrf.mxu0  ;;  %1509 = vmatmul.f32.gmra.mxu3 %v1124_v3  ;;  %v1143_v3 = vld [vmem:[#allocation2 + $0x4f8] sm:$0xff]  ;;  %1340 = vmatpush.msrb.mxu2 %v1188_v8  ;;  %v2021_v8 = vld [vmem:[#allocation3 + $0x3e8] sm:$0xff] }
 0x138   : > { %1622 = vmatmul.f32.gmra.mxu0 %v3264_v9  ;;  %v3314_v41 = vpop.f32.mrf.mxu3  ;;  %v3323_v9 = vld [vmem:[#allocation2 + $0x80] sm:$0xff] }
 0x139   : > { %v3320_v12 = vpop.f32.mrf.mxu1 }
 0x13c   : > { %1286 = vmatmul.f32.gmra.mxu2 %v3312_v7  ;;  %1690 = vmatmul.f32.gmra.mxu1 %v3323_v9 }
 0x13d   : > { %v3317_v10 = vpop.f32.mrf.mxu0  ;;  %1512 = vmatmul.f32.gmra.mxu3 %v3117_v17  ;;  %v3335_v17 = vld [vmem:[#allocation2 + $0x98] sm:$0xff] }
 0x140   : > { %1625 = vmatmul.f32.gmra.mxu0 %v3290_v50  ;;  %v3325_v21 = vpop.f32.mrf.mxu3 }
 0x141   : > { %v3331_v25 = vpop.f32.mrf.mxu1 }
 0x144   : > { %1289 = vmatmul.f32.gmra.mxu2 %v3101_v5  ;;  %1693 = vmatmul.f32.gmra.mxu1 %v3335_v17 }
 0x145   : > { %v3329_v23 = vpop.f32.mrf.mxu0  ;;  %1515 = vmatmul.f32.gmra.mxu3 %v1130_v6  ;;  %v1187_v6 = vld [vmem:[#allocation3 + $0x218] sm:$0xff] }
 0x146   : > { %1341 = vmatpush.msrb.mxu2 %v1187_v6  ;;  %v2020_v6 = vld [vmem:[#allocation3 + $0x3e0] sm:$0xff] }
 0x148   : > { %1628 = vmatmul.f32.gmra.mxu0 %v664_v24  ;;  %v3341_v29 = vpop.f32.mrf.mxu3 }
 0x149   : > { %v3344_v35 = vpop.f32.mrf.mxu1 }
 0x14c   : > { %1292 = vmatmul.f32.gmra.mxu2 %v3333_v26  ;;  %1696 = vmatmul.f32.gmra.mxu1 %v3064_v40 }
 0x14d   : > { %v3339_v28 = vpop.f32.mrf.mxu0  ;;  %1518 = vmatmul.f32.gmra.mxu3 %v3146_v46 }
 0x150   : > { %1631 = vmatmul.f32.gmra.mxu0 %v3312_v7  ;;  %v3351_v39 = vpop.f32.mrf.mxu3 }
 0x151   : > { %v3354_v47 = vpop.f32.mrf.mxu1 }
 0x154   : > { %1295 = vmatmul.f32.gmra.mxu2 %v3130_v33  ;;  %1699 = vmatmul.f32.gmra.mxu1 %v3073_v45 }
 0x155   : > { %v3349_v38 = vpop.f32.mrf.mxu0  ;;  %1521 = vmatmul.f32.gmra.mxu3 %v1136_v44  ;;  %v1148_v44 = vld [vmem:[#allocation2 + $0x520] sm:$0xff] }
 0x158   : > { %1634 = vmatmul.f32.gmra.mxu0 %v3101_v5  ;;  %v3359_v40 = vpop.f32.mrf.mxu3 }
 0x159   : > { %v3362_v24 = vpop.f32.mrf.mxu1 }
 0x15c   : > { %1298 = vmatmul.f32.gmra.mxu2 %v1137_v49  ;;  %1702 = vmatmul.f32.gmra.mxu1 %v3091_v57 }
 0x15d   : > { %v3357_v46 = vpop.f32.mrf.mxu0  ;;  %1524 = vmatmul.f32.gmra.mxu3 %v3175_v11 }
 0x15e   : > { %4265 = vst [vmem:[#allocation9_spill] sm:$0xff] %v3357_v46 }
 0x160   : > { %1637 = vmatmul.f32.gmra.mxu0 %v3333_v26  ;;  %v3369_v45 = vpop.f32.mrf.mxu3 }
 0x161   : > { %v3372_v60 = vpop.f32.mrf.mxu1 }
 0x162   : > { %4267 = vst [vmem:[#allocation11_spill] sm:$0xff] %v3372_v60  ;;  %v3791_v60 = vld [vmem:[#allocation2 + $0x448] sm:$0xff] }
 0x164   : > { %1301 = vmatmul.f32.gmra.mxu2 %v3159_v62  ;;  %1705 = vmatmul.f32.gmra.mxu1 %v3097_v4 }
 0x165   : > { %v3367_v5 = vpop.f32.mrf.mxu0  ;;  %1527 = vmatmul.f32.gmra.mxu3 %v1142_v59  ;;  %v2005_v59 = vld [vmem:[#allocation3 + $0x368] sm:$0xff] }
 0x166   : > { %4266 = vst [vmem:[#allocation10_spill] sm:$0xff] %v3367_v5  ;;  %v3673_v5 = vld [vmem:[#allocation2 + $0x1c0] sm:$0xff] }
 0x168   : > { %1640 = vmatmul.f32.gmra.mxu0 %v3130_v33  ;;  %v3377_v57 = vpop.f32.mrf.mxu3  ;;  %v2023_v33 = vld [vmem:[#allocation3 + $0x3f8] sm:$0xff] }
 0x169   : > { %4269 = vst [vmem:[#allocation13_spill] sm:$0xff] %v3377_v57  ;;  %v3379_v16 = vpop.f32.mrf.mxu1  ;;  %2153 = vmatpush.msra.mxu0 %v2023_v33 }
 0x16a   : > { %4270 = vst [vmem:[#allocation14_spill] sm:$0xff] %v3379_v16  ;;  %v3684_v16 = vld [vmem:[#allocation2 + $0x208] sm:$0xff] }
 0x16b   : > { %2154 = vmatpush.msra.mxu0 %v2022_v52 }
 0x16c   : > { %1304 = vmatmul.f32.gmra.mxu2 %v1143_v3  ;;  %1708 = vmatmul.f32.gmra.mxu1 %v3119_v19  ;;  %v1186_v19 = vld [vmem:[#allocation3 + $0x210] sm:$0xff] }
 0x16d   : > { %v3375_v11 = vpop.f32.mrf.mxu0  ;;  %1530 = vmatmul.f32.gmra.mxu3 %v3209_v51  ;;  %v3391_v51 = vld [vmem:[#allocation2 + $0x558] sm:$0xff]  ;;  %1342 = vmatpush.msrb.mxu2 %v1186_v19  ;;  %v1185_v19 = vld [vmem:[#allocation3 + $0x208] sm:$0xff] }
 0x16e   : > { %4268 = vst [vmem:[#allocation12_spill] sm:$0xff] %v3375_v11  ;;  %2155 = vmatpush.msra.mxu0 %v2021_v8  ;;  %v2017_v8 = vld [vmem:[#allocation3 + $0x3c8] sm:$0xff] }
 0x16f   : > { %1343 = vmatpush.msrb.mxu2 %v1185_v19  ;;  %v2014_v19 = vld [vmem:[#allocation3 + $0x3b0] sm:$0xff] }
 0x170   : > { %1643 = vmatmul.f32.gmra.mxu0 %v1137_v49  ;;  %v3386_v4 = vpop.f32.mrf.mxu3  ;;  %v2006_v49 = vld [vmem:[#allocation3 + $0x370] sm:$0xff] }
 0x171   : > { %4272 = vst [vmem:[#allocation16_spill] sm:$0xff] %v3386_v4  ;;  %v3389_v20 = vpop.f32.mrf.mxu1  ;;  %2041 = vmatpush.msra.mxu3 %v2006_v49  ;;  %v2003_v49 = vld [vmem:[#allocation3 + $0x358] sm:$0xff]  ;;  %2156 = vmatpush.msra.mxu0 %v2020_v6  ;;  %v2016_v6 = vld [vmem:[#allocation3 + $0x3c0] sm:$0xff]  ;;  %v1958_v4 = vld [vmem:[#allocation2 + $0x4b0] sm:$0xff] }
 0x172   : > { %4273 = vst [vmem:[#allocation17_spill] sm:$0xff] %v3389_v20 }
 0x173   : > { %2042 = vmatpush.msra.mxu3 %v2005_v59  ;;  %v2001_v59 = vld [vmem:[#allocation3 + $0x348] sm:$0xff] }
 0x174   : > { %1307 = vmatmul.f32.gmra.mxu2 %v3191_v34  ;;  %1711 = vmatmul.f32.gmra.mxu1 %v3126_v32  ;;  %v2018_v32 = vld [vmem:[#allocation3 + $0x3d0] sm:$0xff] }
 0x175   : > { %v3384_v27 = vpop.f32.mrf.mxu0  ;;  %1533 = vmatmul.f32.gmra.mxu3 %v1148_v44  ;;  %v2002_v44 = vld [vmem:[#allocation3 + $0x350] sm:$0xff] }
 0x176   : > { %4271 = vst [vmem:[#allocation15_spill] sm:$0xff] %v3384_v27  ;;  %v2019_v27 = vld [vmem:[#allocation3 + $0x3d8] sm:$0xff]  ;;  %2043 = vmatpush.msra.mxu3 %v2004_v36 }
 0x177   : > { %2157 = vmatpush.msra.mxu0 %v2019_v27  ;;  %v2000_v27 = vld [vmem:[#allocation3 + $0x340] sm:$0xff] }
 0x178   : > { %1646 = vmatmul.f32.gmra.mxu0 %v3159_v62  ;;  %v3397_v33 = vpop.f32.mrf.mxu3  ;;  %2044 = vmatpush.msra.mxu3 %v2003_v49  ;;  %v2015_v49 = vld [vmem:[#allocation3 + $0x3b8] sm:$0xff] }
 0x179   : > { %4275 = vst [vmem:[#allocation19_spill] sm:$0xff] %v3397_v33  ;;  %v3399_v52 = vpop.f32.mrf.mxu1  ;;  %2158 = vmatpush.msra.mxu0 %v2018_v32  ;;  %v1155_v32 = vld [vmem:[#allocation2 + $0x5b8] sm:$0xff] }
 0x17a   : > { %4276 = vst [vmem:[#allocation20_spill] sm:$0xff] %v3399_v52  ;;  %2045 = vmatpush.msra.mxu3 %v2002_v44  ;;  %v1998_v44 = vld [vmem:[#allocation3 + $0x330] sm:$0xff]  ;;  %v1184_v52 = vld [vmem:[#allocation3 + $0x200] sm:$0xff] }
 0x17b   : > { %2159 = vmatpush.msra.mxu0 %v2017_v8  ;;  %1344 = vmatpush.msrb.mxu2 %v1184_v52  ;;  %v1997_v8 = vld [vmem:[#allocation3 + $0x328] sm:$0xff] }
 0x17c   : > { %1310 = vmatmul.f32.gmra.mxu2 %v3391_v51  ;;  %1714 = vmatmul.f32.gmra.mxu1 %v3148_v48 }
 0x17d   : > { %v3395_v62 = vpop.f32.mrf.mxu0  ;;  %1536 = vmatmul.f32.gmra.mxu3 %v3243_v30  ;;  %v1154_v30 = vld [vmem:[#allocation2 + $0x580] sm:$0xff]  ;;  %2160 = vmatpush.msra.mxu0 %v2016_v6 }
 0x17e   : > { %4274 = vst [vmem:[#allocation18_spill] sm:$0xff] %v3395_v62  ;;  %2046 = vmatpush.msra.mxu3 %v2001_v59  ;;  %v1999_v62 = vld [vmem:[#allocation3 + $0x338] sm:$0xff]  ;;  %v2013_v59 = vld [vmem:[#allocation3 + $0x3a8] sm:$0xff]  ;;  %v2012_v6 = vld [vmem:[#allocation3 + $0x3a0] sm:$0xff] }
 0x17f   : > { %2161 = vmatpush.msra.mxu0 %v2015_v49  ;;  %v1996_v49 = vld [vmem:[#allocation3 + $0x320] sm:$0xff] }
 0x180   : > { %1649 = vmatmul.f32.gmra.mxu0 %v1143_v3  ;;  %v3406_v36 = vpop.f32.mrf.mxu3  ;;  %2047 = vmatpush.msra.mxu3 %v2000_v27 }
 0x181   : > { %4278 = vst [vmem:[#allocation22_spill] sm:$0xff] %v3406_v36  ;;  %v3409_v48 = vpop.f32.mrf.mxu1  ;;  %2162 = vmatpush.msra.mxu0 %v2014_v19  ;;  %v2009_v19 = vld [vmem:[#allocation3 + $0x388] sm:$0xff]  ;;  %v3630_v36 = vld [vmem:[#allocation2 + $0x100] sm:$0xff] }
 0x182   : > { %4279 = vst [vmem:[#allocation23_spill] sm:$0xff] %v3409_v48  ;;  %2048 = vmatpush.msra.mxu3 %v1999_v62  ;;  %v1995_v48 = vld [vmem:[#allocation3 + $0x318] sm:$0xff]  ;;  %v1994_v62 = vld [vmem:[#allocation3 + $0x310] sm:$0xff] }
 0x183   : > { %2163 = vmatpush.msra.mxu0 %v2013_v59 }
 0x184   : > { %1313 = vmatmul.f32.gmra.mxu2 %v3225_v15  ;;  %2049 = vmatpush.msra.mxu3 %v1998_v44  ;;  %v1070_v44 = vld [vmem:[#allocation3 + $0x178] sm:$0xff] }
 0x185   : > { %v3404_v3 = vpop.f32.mrf.mxu0  ;;  %1539 = vmatmul.f32.gmra.mxu3 %v1154_v30  ;;  %1717 = vmatmul.f32.gmra.mxu1 %v3155_v61  ;;  %v2010_v61 = vld [vmem:[#allocation3 + $0x390] sm:$0xff]  ;;  %v1993_v30 = vld [vmem:[#allocation3 + $0x308] sm:$0xff] }
 0x186   : > { %4277 = vst [vmem:[#allocation21_spill] sm:$0xff] %v3404_v3  ;;  %2050 = vmatpush.msra.mxu3 %v1997_v8  ;;  %v2011_v3 = vld [vmem:[#allocation3 + $0x398] sm:$0xff]  ;;  %2164 = vmatpush.msra.mxu0 %v2012_v6  ;;  %v2008_v8 = vld [vmem:[#allocation3 + $0x380] sm:$0xff] }
 0x187   : > { %1781 = vmatpush.msra.mxu2 %v1070_v44  ;;  %v1166_v44 = vld [vmem:[#allocation2 + $0x640] sm:$0xff] }
 0x188   : > { %1652 = vmatmul.f32.gmra.mxu0 %v3191_v34  ;;  %v3414_v34 = vpop.f32.mrf.mxu3  ;;  %2051 = vmatpush.msra.mxu3 %v1996_v49 }
 0x189   : > { %4281 = vst [vmem:[#allocation25_spill] sm:$0xff] %v3414_v34  ;;  %v3417_v52 = vpop.f32.mrf.mxu1  ;;  %2165 = vmatpush.msra.mxu0 %v2011_v3  ;;  %v1992_v3 = vld [vmem:[#allocation3 + $0x300] sm:$0xff]  ;;  %v1062_v34 = vld [vmem:[#allocation3 + $0x138] sm:$0xff] }
 0x18a   : > { %4282 = vst [vmem:[#allocation26_spill] sm:$0xff] %v3417_v52  ;;  %2052 = vmatpush.msra.mxu3 %v1995_v48  ;;  %v1160_v48 = vld [vmem:[#allocation2 + $0x5e0] sm:$0xff]  ;;  %v3566_v52 = vld [vmem:[#allocation2 + $0x518] sm:$0xff] }
 0x18b   : > { %2166 = vmatpush.msra.mxu0 %v2010_v61  ;;  %v2039_v61 = vld [vmem:[#allocation3 + $0x478] sm:$0xff] }
 0x18c   : > { %1316 = vmatmul.f32.gmra.mxu2 %v1155_v32  ;;  %2053 = vmatpush.msra.mxu3 %v1994_v62 }
 0x18d   : > { %v3412_v27 = vpop.f32.mrf.mxu0  ;;  %1542 = vmatmul.f32.gmra.mxu3 %v3272_v18  ;;  %1720 = vmatmul.f32.gmra.mxu1 %v3177_v13  ;;  %v1161_v13 = vld [vmem:[#allocation2 + $0x618] sm:$0xff] }
 0x18e   : > { %4280 = vst [vmem:[#allocation24_spill] sm:$0xff] %v3412_v27  ;;  %2167 = vmatpush.msra.mxu0 %v2009_v19  ;;  %2054 = vmatpush.msra.mxu3 %v1993_v30  ;;  %v1896_v19 = vld [vmem:[#allocation2 + $0xe0] sm:$0xff]  ;;  %v2030_v27 = vld [vmem:[#allocation3 + $0x430] sm:$0xff] }
 0x18f   : > { %2266 = vmatpush.msra.mxu1 %v2039_v61 }
 0x190   : > { %1655 = vmatmul.f32.gmra.mxu0 %v3391_v51  ;;  %v3424_v51 = vpop.f32.mrf.mxu3  ;;  %2055 = vmatpush.msra.mxu3 %v1992_v3  ;;  %v1895_v3 = vld [vmem:[#allocation2 + $0xd8] sm:$0xff] }
 0x191   : > { %4284 = vst [vmem:[#allocation28_spill] sm:$0xff] %v3424_v51  ;;  %2168 = vmatpush.msra.mxu0 %v2008_v8  ;;  %v3427_v18 = vpop.f32.mrf.mxu1  ;;  %v2029_v51 = vld [vmem:[#allocation3 + $0x428] sm:$0xff] }
 0x192   : > { %4285 = vst [vmem:[#allocation29_spill] sm:$0xff] %v3427_v18  ;;  %2671 = vmatpush.msrb.mxu3 %v2039_v61  ;;  %v1899_v61 = vld [vmem:[#allocation2 + $0xf8] sm:$0xff] }
 0x194   : > { %1319 = vmatmul.f32.gmra.mxu2 %v3256_v0 }
 0x195   : > { %v3422_v59 = vpop.f32.mrf.mxu0  ;;  %1545 = vmatmul.f32.gmra.mxu3 %v1160_v48  ;;  %1723 = vmatmul.f32.gmra.mxu1 %v3187_v31  ;;  %v2038_v48 = vld [vmem:[#allocation3 + $0x470] sm:$0xff] }
 0x196   : > { %4283 = vst [vmem:[#allocation27_spill] sm:$0xff] %v3422_v59  ;;  %2267 = vmatpush.msra.mxu1 %v2038_v48  ;;  %2672 = vmatpush.msrb.mxu3 %v2038_v48  ;;  %v1902_v48 = vld [vmem:[#allocation2 + $0x140] sm:$0xff]  ;;  %v3546_v59 = vld [vmem:[#allocation2 + $0x4b8] sm:$0xff] }
 0x198   : > { %1658 = vmatmul.f32.gmra.mxu0 %v3225_v15  ;;  %v3432_v49 = vpop.f32.mrf.mxu3  ;;  %v1069_v15 = vld [vmem:[#allocation3 + $0x170] sm:$0xff] }
 0x199   : > { %4287 = vst [vmem:[#allocation31_spill] sm:$0xff] %v3432_v49  ;;  %v3434_v62 = vpop.f32.mrf.mxu1  ;;  %1782 = vmatpush.msra.mxu2 %v1069_v15  ;;  %v3557_v49 = vld [vmem:[#allocation2 + $0x500] sm:$0xff] }
 0x19a   : > { %4288 = vst [vmem:[#allocation32_spill] sm:$0xff] %v3434_v62 }
 0x19c   : > { %1322 = vmatmul.f32.gmra.mxu2 %v1161_v13 }
 0x19d   : > { %v3430_v6 = vpop.f32.mrf.mxu0  ;;  %1548 = vmatmul.f32.gmra.mxu3 %v3302_v56  ;;  %1726 = vmatmul.f32.gmra.mxu1 %v3211_v54 }
 0x19e   : > { %4286 = vst [vmem:[#allocation30_spill] sm:$0xff] %v3430_v6 }
 0x1a0   : > { %1661 = vmatmul.f32.gmra.mxu0 %v1155_v32  ;;  %v3441_v31 = vpop.f32.mrf.mxu3 }
 0x1a1   : > { %4290 = vst [vmem:[#allocation34_spill] sm:$0xff] %v3441_v31  ;;  %v3444_v32 = vpop.f32.mrf.mxu1 }
 0x1a2   : > { %4291 = vst [vmem:[#allocation35_spill] sm:$0xff] %v3444_v32 }
 0x1a4   : > { %1325 = vmatmul.f32.gmra.mxu2 %v3285_v43 }
 0x1a5   : > { %v3439_v30 = vpop.f32.mrf.mxu0  ;;  %1551 = vmatmul.f32.gmra.mxu3 %v1166_v44  ;;  %1729 = vmatmul.f32.gmra.mxu1 %v3221_v14  ;;  %v1068_v14 = vld [vmem:[#allocation3 + $0x168] sm:$0xff]  ;;  %v1898_v44 = vld [vmem:[#allocation2 + $0xf0] sm:$0xff] }
 0x1a6   : > { %4289 = vst [vmem:[#allocation33_spill] sm:$0xff] %v3439_v30  ;;  %1783 = vmatpush.msra.mxu2 %v1068_v14  ;;  %v3513_v30 = vld [vmem:[#allocation2 + $0x440] sm:$0xff] }
 0x1a8   : > { %1664 = vmatmul.f32.gmra.mxu0 %v3256_v0  ;;  %v3450_v54 = vpop.f32.mrf.mxu3 }
 0x1a9   : > { %4293 = vst [vmem:[#allocation37_spill] sm:$0xff] %v3450_v54  ;;  %v3454_v8 = vpop.f32.mrf.mxu1  ;;  %v3524_v54 = vld [vmem:[#allocation2 + $0x458] sm:$0xff] }
 0x1ac   : > { %1345 = vmatmul.f32.vlgmr.msrb.gmra.mxu2 %v3323_v9 }
 0x1ad   : > { %v3448_v56 = vpop.f32.mrf.mxu0  ;;  %2056 = vmatmul.f32.vlgmr.msra.gmra.mxu3 %v1895_v3  ;;  %1732 = vmatmul.f32.gmra.mxu1 %v3245_v37 }
 0x1ae   : > { %4292 = vst [vmem:[#allocation36_spill] sm:$0xff] %v3448_v56  ;;  %v2037_v56 = vld [vmem:[#allocation3 + $0x468] sm:$0xff] }
 0x1af   : > { %v3452_v43 = vpop.f32.mrf.mxu2  ;;  %2268 = vmatpush.msra.mxu1 %v2037_v56  ;;  %2673 = vmatpush.msrb.mxu3 %v2037_v56 }
 0x1b0   : > { %4294 = vst [vmem:[#allocation38_spill] sm:$0xff] %v3452_v43  ;;  %2169 = vmatmul.f32.vlgmr.msra.gmra.mxu0 %v1896_v19  ;;  %v3460_v9 = vpop.f32.mrf.mxu3  ;;  %v1917_v43 = vld [vmem:[#allocation2 + $0x218] sm:$0xff] }
 0x1b1   : > { %4296 = vst [vmem:[#allocation40_spill] sm:$0xff] %v3460_v9  ;;  %v3464_v15 = vpop.f32.mrf.mxu1 }
 0x1b4   : > { %1348 = vmatmul.f32.gmra.mxu2 %v3335_v17 }
 0x1b5   : > { %v3458_v0 = vpop.f32.mrf.mxu0  ;;  %2059 = vmatmul.f32.gmra.mxu3 %v1898_v44  ;;  %1735 = vmatmul.f32.gmra.mxu1 %v3252_v63  ;;  %v1067_v63 = vld [vmem:[#allocation3 + $0x160] sm:$0xff] }
 0x1b6   : > { %4295 = vst [vmem:[#allocation39_spill] sm:$0xff] %v3458_v0  ;;  %v1901_v0 = vld [vmem:[#allocation2 + $0x138] sm:$0xff]  ;;  %1784 = vmatpush.msra.mxu2 %v1067_v63 }
 0x1b7   : > { %v3462_v13 = vpop.f32.mrf.mxu2 }
 0x1b8   : > { %4297 = vst [vmem:[#allocation41_spill] sm:$0xff] %v3462_v13  ;;  %2172 = vmatmul.f32.gmra.mxu0 %v1899_v61  ;;  %v3469_v17 = vpop.f32.mrf.mxu3  ;;  %v1904_v13 = vld [vmem:[#allocation2 + $0x150] sm:$0xff] }
 0x1b9   : > { %4299 = vst [vmem:[#allocation43_spill] sm:$0xff] %v3469_v17  ;;  %v3473_v14 = vpop.f32.mrf.mxu1 }
 0x1bc   : > { %1351 = vmatmul.f32.gmra.mxu2 %v1896_v19 }
 0x1bd   : > { %v3467_v37 = vpop.f32.mrf.mxu0  ;;  %2062 = vmatmul.f32.gmra.mxu3 %v1901_v0  ;;  %1738 = vmatmul.f32.gmra.mxu1 %v3274_v22 }
 0x1be   : > { %4298 = vst [vmem:[#allocation42_spill] sm:$0xff] %v3467_v37 }
 0x1bf   : > { %v3471_v3 = vpop.f32.mrf.mxu2 }
 0x1c0   : > { %4300 = vst [vmem:[#allocation44_spill] sm:$0xff] %v3471_v3  ;;  %2175 = vmatmul.f32.gmra.mxu0 %v1902_v48  ;;  %v3478_v44 = vpop.f32.mrf.mxu3  ;;  %v1905_v3 = vld [vmem:[#allocation2 + $0x158] sm:$0xff] }
 0x1c1   : > { %4302 = vst [vmem:[#allocation46_spill] sm:$0xff] %v3478_v44  ;;  %v3482_v17 = vpop.f32.mrf.mxu1  ;;  %v3493_v44 = vld [vmem:[#allocation2 + $0x3e0] sm:$0xff] }
 0x1c4   : > { %1354 = vmatmul.f32.gmra.mxu2 %v1899_v61  ;;  %v1908_v61 = vld [vmem:[#allocation2 + $0x1a0] sm:$0xff] }
 0x1c5   : > { %v3476_v19 = vpop.f32.mrf.mxu0  ;;  %2065 = vmatmul.f32.gmra.mxu3 %v1904_v13  ;;  %1741 = vmatmul.f32.gmra.mxu1 %v3281_v42  ;;  %v1066_v42 = vld [vmem:[#allocation3 + $0x158] sm:$0xff] }
 0x1c6   : > { %4301 = vst [vmem:[#allocation45_spill] sm:$0xff] %v3476_v19  ;;  %v1907_v19 = vld [vmem:[#allocation2 + $0x198] sm:$0xff]  ;;  %1785 = vmatpush.msra.mxu2 %v1066_v42  ;;  %v1914_v42 = vld [vmem:[#allocation2 + $0x200] sm:$0xff] }
 0x1c7   : > { %v3480_v37 = vpop.f32.mrf.mxu2 }
 0x1c8   : > { %4303 = vst [vmem:[#allocation47_spill] sm:$0xff] %v3480_v37  ;;  %2178 = vmatmul.f32.gmra.mxu0 %v1905_v3  ;;  %v3487_v22 = vpop.f32.mrf.mxu3  ;;  %v2036_v37 = vld [vmem:[#allocation3 + $0x460] sm:$0xff] }
 0x1c9   : > { %4305 = vst [vmem:[#allocation49_spill] sm:$0xff] %v3487_v22  ;;  %v3491_v63 = vpop.f32.mrf.mxu1  ;;  %2269 = vmatpush.msra.mxu1 %v2036_v37  ;;  %2674 = vmatpush.msrb.mxu3 %v2036_v37  ;;  %v1910_v22 = vld [vmem:[#allocation2 + $0x1b0] sm:$0xff] }
 0x1cc   : > { %1357 = vmatmul.f32.gmra.mxu2 %v1902_v48 }
 0x1cd   : > { %v3485_v56 = vpop.f32.mrf.mxu0  ;;  %2068 = vmatmul.f32.gmra.mxu3 %v1907_v19  ;;  %1744 = vmatmul.f32.gmra.mxu1 %v3493_v44  ;;  %v3504_v19 = vld [vmem:[#allocation2 + $0x3f8] sm:$0xff] }
 0x1ce   : > { %4304 = vst [vmem:[#allocation48_spill] sm:$0xff] %v3485_v56 }
 0x1cf   : > { %v3489_v0 = vpop.f32.mrf.mxu2 }
 0x1d0   : > { %4306 = vst [vmem:[#allocation50_spill] sm:$0xff] %v3489_v0  ;;  %2181 = vmatmul.f32.gmra.mxu0 %v1908_v61  ;;  %v3498_v48 = vpop.f32.mrf.mxu3  ;;  %v1911_v0 = vld [vmem:[#allocation2 + $0x1b8] sm:$0xff] }
 0x1d1   : > { %4308 = vst [vmem:[#allocation52_spill] sm:$0xff] %v3498_v48  ;;  %v3502_v9 = vpop.f32.mrf.mxu1  ;;  %v2035_v48 = vld [vmem:[#allocation3 + $0x458] sm:$0xff] }
 0x1d2   : > { %4310 = vst [vmem:[#allocation54_spill] sm:$0xff] %v3502_v9  ;;  %2270 = vmatpush.msra.mxu1 %v2035_v48  ;;  %2675 = vmatpush.msrb.mxu3 %v2035_v48 }
 0x1d4   : > { %1360 = vmatmul.f32.gmra.mxu2 %v1905_v3 }
 0x1d5   : > { %v3496_v13 = vpop.f32.mrf.mxu0  ;;  %2071 = vmatmul.f32.gmra.mxu3 %v1910_v22  ;;  %1747 = vmatmul.f32.gmra.mxu1 %v3504_v19 }
 0x1d6   : > { %4307 = vst [vmem:[#allocation51_spill] sm:$0xff] %v3496_v13 }
 0x1d7   : > { %v3500_v56 = vpop.f32.mrf.mxu2 }
 0x1d8   : > { %4309 = vst [vmem:[#allocation53_spill] sm:$0xff] %v3500_v56  ;;  %2184 = vmatmul.f32.gmra.mxu0 %v1911_v0  ;;  %v3509_v3 = vpop.f32.mrf.mxu3  ;;  %v1913_v56 = vld [vmem:[#allocation2 + $0x1f8] sm:$0xff] }
 0x1d9   : > { %4312 = vst [vmem:[#allocation56_spill] sm:$0xff] %v3509_v3  ;;  %v3515_v22 = vpop.f32.mrf.mxu1 }
 0x1da   : > { %4314 = vst [vmem:[#allocation58_spill] sm:$0xff] %v3515_v22  ;;  %v1964_v22 = vld [vmem:[#allocation2 + $0x510] sm:$0xff] }
 0x1dc   : > { %1363 = vmatmul.f32.gmra.mxu2 %v1908_v61  ;;  %v1065_v61 = vld [vmem:[#allocation3 + $0x150] sm:$0xff] }
 0x1dd   : > { %v3507_v37 = vpop.f32.mrf.mxu0  ;;  %2074 = vmatmul.f32.gmra.mxu3 %v1913_v56  ;;  %1750 = vmatmul.f32.gmra.mxu1 %v3513_v30  ;;  %v1916_v56 = vld [vmem:[#allocation2 + $0x210] sm:$0xff] }
 0x1de   : > { %4311 = vst [vmem:[#allocation55_spill] sm:$0xff] %v3507_v37  ;;  %1786 = vmatpush.msra.mxu2 %v1065_v61  ;;  %v1920_v61 = vld [vmem:[#allocation2 + $0x260] sm:$0xff] }
 0x1df   : > { %v3511_v13 = vpop.f32.mrf.mxu2 }
 0x1e0   : > { %4313 = vst [vmem:[#allocation57_spill] sm:$0xff] %v3511_v13  ;;  %2187 = vmatmul.f32.gmra.mxu0 %v1914_v42  ;;  %v3520_v3 = vpop.f32.mrf.mxu3 }
 0x1e1   : > { %4316 = vst [vmem:[#allocation60_spill] sm:$0xff] %v3520_v3  ;;  %v3531_v6 = vpop.f32.mrf.mxu1  ;;  %v2034_v3 = vld [vmem:[#allocation3 + $0x450] sm:$0xff] }
 0x1e2   : > { %4320 = vst [vmem:[#allocation64_spill] sm:$0xff] %v3531_v6  ;;  %2271 = vmatpush.msra.mxu1 %v2034_v3  ;;  %2676 = vmatpush.msrb.mxu3 %v2034_v3 }
 0x1e4   : > { %1366 = vmatmul.f32.gmra.mxu2 %v1911_v0 }
 0x1e5   : > { %v3518_v37 = vpop.f32.mrf.mxu0  ;;  %2077 = vmatmul.f32.gmra.mxu3 %v1916_v56  ;;  %1753 = vmatmul.f32.gmra.mxu1 %v3524_v54  ;;  %v3535_v56 = vld [vmem:[#allocation2 + $0x4a0] sm:$0xff] }
 0x1e6   : > { %4315 = vst [vmem:[#allocation59_spill] sm:$0xff] %v3518_v37 }
 0x1e7   : > { %v3522_v13 = vpop.f32.mrf.mxu2 }
 0x1e8   : > { %4317 = vst [vmem:[#allocation61_spill] sm:$0xff] %v3522_v13  ;;  %2190 = vmatmul.f32.gmra.mxu0 %v1917_v43  ;;  %v3529_v0 = vpop.f32.mrf.mxu3  ;;  %v1919_v13 = vld [vmem:[#allocation2 + $0x258] sm:$0xff] }
 0x1e9   : > { %4319 = vst [vmem:[#allocation63_spill] sm:$0xff] %v3529_v0  ;;  %v3544_v31 = vpop.f32.mrf.mxu1 }
 0x1ea   : > { %4325 = vst [vmem:[#allocation69_spill] sm:$0xff] %v3544_v31 }
 0x1ec   : > { %1369 = vmatmul.f32.gmra.mxu2 %v1914_v42  ;;  %v1064_v42 = vld [vmem:[#allocation3 + $0x148] sm:$0xff] }
 0x1ed   : > { %v3527_v48 = vpop.f32.mrf.mxu0  ;;  %2080 = vmatmul.f32.gmra.mxu3 %v1919_v13  ;;  %1756 = vmatmul.f32.gmra.mxu1 %v3535_v56  ;;  %v1922_v13 = vld [vmem:[#allocation2 + $0x270] sm:$0xff] }
 0x1ee   : > { %4318 = vst [vmem:[#allocation62_spill] sm:$0xff] %v3527_v48  ;;  %1787 = vmatpush.msra.mxu2 %v1064_v42  ;;  %v1926_v42 = vld [vmem:[#allocation2 + $0x2c0] sm:$0xff] }
 0x1ef   : > { %v3533_v37 = vpop.f32.mrf.mxu2 }
 0x1f0   : > { %4321 = vst [vmem:[#allocation65_spill] sm:$0xff] %v3533_v37  ;;  %2193 = vmatmul.f32.gmra.mxu0 %v1920_v61  ;;  %v3540_v0 = vpop.f32.mrf.mxu3  ;;  %v1923_v37 = vld [vmem:[#allocation2 + $0x278] sm:$0xff] }
 0x1f1   : > { %4323 = vst [vmem:[#allocation67_spill] sm:$0xff] %v3540_v0  ;;  %v2033_v0 = vld [vmem:[#allocation3 + $0x448] sm:$0xff]  ;;  %v3555_v62 = vpop.f32.mrf.mxu1 }
 0x1f2   : > { %4329 = vst [vmem:[#allocation73_spill] sm:$0xff] %v3555_v62  ;;  %2272 = vmatpush.msra.mxu1 %v2033_v0  ;;  %2677 = vmatpush.msrb.mxu3 %v2033_v0  ;;  %v1928_v0 = vld [vmem:[#allocation2 + $0x2d0] sm:$0xff] }
 0x1f3   : > { %v1946_v62 = vld [vmem:[#allocation2 + $0x3f0] sm:$0xff] }
 0x1f4   : > { %1372 = vmatmul.f32.gmra.mxu2 %v1917_v43 }
 0x1f5   : > { %v3538_v48 = vpop.f32.mrf.mxu0  ;;  %2083 = vmatmul.f32.gmra.mxu3 %v1922_v13  ;;  %1759 = vmatmul.f32.gmra.mxu1 %v3546_v59  ;;  %v2032_v13 = vld [vmem:[#allocation3 + $0x440] sm:$0xff] }
 0x1f6   : > { %4322 = vst [vmem:[#allocation66_spill] sm:$0xff] %v3538_v48  ;;  %2273 = vmatpush.msra.mxu1 %v2032_v13  ;;  %2678 = vmatpush.msrb.mxu3 %v2032_v13  ;;  %v2027_v13 = vld [vmem:[#allocation3 + $0x418] sm:$0xff] }
 0x1f7   : > { %v3542_v32 = vpop.f32.mrf.mxu2 }
 0x1f8   : > { %4324 = vst [vmem:[#allocation68_spill] sm:$0xff] %v3542_v32  ;;  %2196 = vmatmul.f32.gmra.mxu0 %v1923_v37  ;;  %v3551_v3 = vpop.f32.mrf.mxu3  ;;  %v1925_v32 = vld [vmem:[#allocation2 + $0x2b8] sm:$0xff] }
 0x1f9   : > { %4327 = vst [vmem:[#allocation71_spill] sm:$0xff] %v3551_v3 }
 0x1fc   : > { %1375 = vmatmul.f32.gmra.mxu2 %v1920_v61  ;;  %v1063_v61 = vld [vmem:[#allocation3 + $0x140] sm:$0xff] }
 0x1fd   : > { %v3549_v43 = vpop.f32.mrf.mxu0  ;;  %2086 = vmatmul.f32.gmra.mxu3 %v1925_v32  ;;  %1762 = vmatmul.f32.gmra.mxu1 %v3557_v49  ;;  %v1929_v32 = vld [vmem:[#allocation2 + $0x2d8] sm:$0xff] }
 0x1fe   : > { %4326 = vst [vmem:[#allocation70_spill] sm:$0xff] %v3549_v43  ;;  %v2031_v43 = vld [vmem:[#allocation3 + $0x438] sm:$0xff]  ;;  %1788 = vmatpush.msra.mxu2 %v1063_v61 }
 0x1ff   : > { %v3553_v48 = vpop.f32.mrf.mxu2  ;;  %2274 = vmatpush.msra.mxu1 %v2031_v43  ;;  %2679 = vmatpush.msrb.mxu3 %v2031_v43  ;;  %v2026_v43 = vld [vmem:[#allocation3 + $0x410] sm:$0xff] }
 0x200   : > { %4328 = vst [vmem:[#allocation72_spill] sm:$0xff] %v3553_v48  ;;  %2199 = vmatmul.f32.gmra.mxu0 %v1926_v42  ;;  %v3562_v48 = vpop.f32.mrf.mxu3  ;;  %1789 = vmatpush.msra.mxu2 %v1062_v34  ;;  %v1934_v34 = vld [vmem:[#allocation2 + $0x330] sm:$0xff] }
 0x201   : > { %4331 = vst [vmem:[#allocation75_spill] sm:$0xff] %v3562_v48  ;;  %2275 = vmatpush.msra.mxu1 %v2030_v27  ;;  %2680 = vmatpush.msrb.mxu3 %v2030_v27  ;;  %v1931_v27 = vld [vmem:[#allocation2 + $0x318] sm:$0xff] }
 0x203   : > { %2276 = vmatpush.msra.mxu1 %v2029_v51  ;;  %2681 = vmatpush.msrb.mxu3 %v2029_v51 }
 0x204   : > { %1378 = vmatmul.f32.gmra.mxu2 %v1923_v37  ;;  %v2028_v37 = vld [vmem:[#allocation3 + $0x420] sm:$0xff] }
 0x205   : > { %v3560_v3 = vpop.f32.mrf.mxu0  ;;  %2089 = vmatmul.f32.gmra.mxu3 %v1928_v0  ;;  %1765 = vmatmul.f32.gmra.mxu1 %v3566_v52  ;;  %v1932_v0 = vld [vmem:[#allocation2 + $0x320] sm:$0xff] }
 0x206   : > { %4330 = vst [vmem:[#allocation74_spill] sm:$0xff] %v3560_v3  ;;  %v3568_v3 = vpop.f32.mrf.mxu1  ;;  %2277 = vmatpush.msra.mxu1 %v2028_v37  ;;  %2682 = vmatpush.msrb.mxu3 %v2028_v37 }
 0x207   : > { %v3564_v18 = vpop.f32.mrf.mxu2  ;;  %4333 = vst [vmem:[#allocation77_spill] sm:$0xff] %v3568_v3  ;;  %v2025_v3 = vld [vmem:[#allocation3 + $0x408] sm:$0xff] }
 0x208   : > { %4332 = vst [vmem:[#allocation76_spill] sm:$0xff] %v3564_v18  ;;  %2202 = vmatmul.f32.gmra.mxu0 %v1929_v32  ;;  %v3573_v18 = vpop.f32.mrf.mxu3  ;;  %2278 = vmatpush.msra.mxu1 %v2027_v13 }
 0x209   : > { %4335 = vst [vmem:[#allocation79_spill] sm:$0xff] %v3573_v18  ;;  %2683 = vmatpush.msrb.mxu3 %v2027_v13  ;;  %v1935_v13 = vld [vmem:[#allocation2 + $0x338] sm:$0xff] }
 0x20a   : > { %2279 = vmatpush.msra.mxu1 %v2026_v43 }
 0x20b   : > { %2684 = vmatpush.msrb.mxu3 %v2026_v43 }
 0x20c   : > { %1381 = vmatmul.f32.gmra.mxu2 %v1926_v42  ;;  %v2024_v42 = vld [vmem:[#allocation3 + $0x400] sm:$0xff]  ;;  %2280 = vmatpush.msra.mxu1 %v2025_v3 }
 0x20d   : > { %v3571_v61 = vpop.f32.mrf.mxu0  ;;  %2092 = vmatmul.f32.gmra.mxu3 %v1931_v27  ;;  %v3588_v27 = vld [vmem:[#allocation2 + $0x578] sm:$0xff] }
 0x20e   : > { %4334 = vst [vmem:[#allocation78_spill] sm:$0xff] %v3571_v61  ;;  %v3577_v61 = vld [vmem:[#allocation2 + $0x560] sm:$0xff]  ;;  %2281 = vmatpush.msra.mxu1 %v2024_v42  ;;  %2685 = vmatpush.msrb.mxu3 %v2025_v3  ;;  %v3584_v37 = vpop.f32.mrf.mxu1 }
 0x20f   : > { %v3575_v48 = vpop.f32.mrf.mxu2  ;;  %1768 = vmatmul.f32.gmra.mxu1 %v3577_v61  ;;  %4339 = vst [vmem:[#allocation83_spill] sm:$0xff] %v3584_v37  ;;  %v1938_v3 = vld [vmem:[#allocation2 + $0x380] sm:$0xff]  ;;  %v3611_v37 = vld [vmem:[#allocation2 + $0x5d8] sm:$0xff] }
 0x210   : > { %4336 = vst [vmem:[#allocation80_spill] sm:$0xff] %v3575_v48  ;;  %2205 = vmatmul.f32.gmra.mxu0 %v1932_v0  ;;  %v3582_v48 = vpop.f32.mrf.mxu3  ;;  %2686 = vmatpush.msrb.mxu3 %v2024_v42  ;;  %v3600_v42 = vld [vmem:[#allocation2 + $0x5c0] sm:$0xff] }
 0x211   : > { %4338 = vst [vmem:[#allocation82_spill] sm:$0xff] %v3582_v48 }
 0x214   : > { %1384 = vmatmul.f32.gmra.mxu2 %v1929_v32 }
 0x215   : > { %v3580_v51 = vpop.f32.mrf.mxu0  ;;  %2095 = vmatmul.f32.gmra.mxu3 %v1934_v34 }
 0x216   : > { %4337 = vst [vmem:[#allocation81_spill] sm:$0xff] %v3580_v51  ;;  %v3597_v48 = vpop.f32.mrf.mxu1 }
 0x217   : > { %v3586_v18 = vpop.f32.mrf.mxu2  ;;  %1771 = vmatmul.f32.gmra.mxu1 %v3588_v27  ;;  %4344 = vst [vmem:[#allocation88_spill] sm:$0xff] %v3597_v48 }
 0x218   : > { %4340 = vst [vmem:[#allocation84_spill] sm:$0xff] %v3586_v18  ;;  %2208 = vmatmul.f32.gmra.mxu0 %v1935_v13  ;;  %v3593_v43 = vpop.f32.mrf.mxu3  ;;  %v1061_v18 = vld [vmem:[#allocation3 + $0x130] sm:$0xff] }
 0x219   : > { %4342 = vst [vmem:[#allocation86_spill] sm:$0xff] %v3593_v43  ;;  %1790 = vmatpush.msra.mxu2 %v1061_v18  ;;  %v1940_v43 = vld [vmem:[#allocation2 + $0x390] sm:$0xff] }
 0x21c   : > { %1387 = vmatmul.f32.gmra.mxu2 %v1932_v0 }
 0x21d   : > { %v3591_v32 = vpop.f32.mrf.mxu0  ;;  %2098 = vmatmul.f32.gmra.mxu3 %v3290_v50 }
 0x21e   : > { %4341 = vst [vmem:[#allocation85_spill] sm:$0xff] %v3591_v32  ;;  %v3609_v48 = vpop.f32.mrf.mxu1 }
 0x21f   : > { %v3595_v51 = vpop.f32.mrf.mxu2  ;;  %1774 = vmatmul.f32.gmra.mxu1 %v3600_v42  ;;  %4348 = vst [vmem:[#allocation92_spill] sm:$0xff] %v3609_v48 }
 0x220   : > { %4343 = vst [vmem:[#allocation87_spill] sm:$0xff] %v3595_v51  ;;  %2211 = vmatmul.f32.gmra.mxu0 %v1938_v3  ;;  %v3605_v34 = vpop.f32.mrf.mxu3  ;;  %v1941_v51 = vld [vmem:[#allocation2 + $0x398] sm:$0xff] }
 0x221   : > { %4346 = vst [vmem:[#allocation90_spill] sm:$0xff] %v3605_v34 }
 0x224   : > { %1390 = vmatmul.f32.gmra.mxu2 %v1935_v13 }
 0x225   : > { %v3603_v0 = vpop.f32.mrf.mxu0  ;;  %2101 = vmatmul.f32.gmra.mxu3 %v1940_v43 }
 0x226   : > { %4345 = vst [vmem:[#allocation89_spill] sm:$0xff] %v3603_v0  ;;  %v1060_v0 = vld [vmem:[#allocation3 + $0x128] sm:$0xff]  ;;  %v3622_v34 = vpop.f32.mrf.mxu1 }
 0x227   : > { %v3607_v32 = vpop.f32.mrf.mxu2  ;;  %1777 = vmatmul.f32.gmra.mxu1 %v3611_v37  ;;  %1791 = vmatpush.msra.mxu2 %v1060_v0  ;;  %4350 = vst [vmem:[#allocation94_spill] sm:$0xff] %v3622_v34 }
 0x228   : > { %4347 = vst [vmem:[#allocation91_spill] sm:$0xff] %v3607_v32  ;;  %2214 = vmatmul.f32.gmra.mxu0 %v1941_v51  ;;  %v3614_v18 = vpop.f32.mrf.mxu3  ;;  %v3620_v32 = vld [vmem:[#allocation2 + $0xe8] sm:$0xff] }
 0x229   : > { %4349 = vst [vmem:[#allocation93_spill] sm:$0xff] %v3614_v18 }
 0x22c   : > { %1393 = vmatmul.f32.gmra.mxu2 %v1938_v3 }
 0x22d   : > { %v2170_v50 = vpop.f32.mrf.mxu0  ;;  %2104 = vmatmul.f32.gmra.mxu3 %v3312_v7 }
 0x22e   : > { %v3634_v34 = vpop.f32.mrf.mxu1 }
 0x22f   : > { %v3616_v13 = vpop.f32.mrf.mxu2  ;;  %2282 = vmatmul.f32.vlgmr.msra.gmra.mxu1 %v3620_v32  ;;  %4351 = vst [vmem:[#allocation95_spill] sm:$0xff] %v3634_v34  ;;  %v1952_v34 = vld [vmem:[#allocation2 + $0x450] sm:$0xff] }
 0x230   : > { %2217 = vmatmul.f32.gmra.mxu0 %v3493_v44  ;;  %v2057_v3 = vpop.f32.mrf.mxu3 }
 0x231   : > { %v3625_v48 = vadd.f32 %v2170_v50, %v2057_v3  ;;  %v1059_v3 = vld [vmem:[#allocation3 + $0x120] sm:$0xff] }
 0x232   : > { %1792 = vmatpush.msra.mxu2 %v1059_v3 }
 0x234   : > { %1396 = vmatmul.f32.gmra.mxu2 %v1941_v51 }
 0x235   : > { %v2173_v43 = vpop.f32.mrf.mxu0  ;;  %2107 = vmatmul.f32.gmra.mxu3 %v1946_v62  ;;  %v3642_v62 = vld [vmem:[#allocation2 + $0x148] sm:$0xff] }
 0x237   : > { %v3627_v18 = vpop.f32.mrf.mxu2  ;;  %2285 = vmatmul.f32.gmra.mxu1 %v3630_v36 }
 0x238   : > { %2220 = vmatmul.f32.gmra.mxu0 %v3504_v19  ;;  %v2060_v0 = vpop.f32.mrf.mxu3 }
 0x239   : > { %v3636_v51 = vadd.f32 %v2173_v43, %v2060_v0  ;;  %v3650_v0 = vpop.f32.mrf.mxu1 }
 0x23a   : > { %4352 = vst [vmem:[#allocation96_spill] sm:$0xff] %v3650_v0  ;;  %v1058_v0 = vld [vmem:[#allocation3 + $0x118] sm:$0xff] }
 0x23b   : > { %1793 = vmatpush.msra.mxu2 %v1058_v0 }
 0x23c   : > { %1399 = vmatmul.f32.gmra.mxu2 %v3493_v44 }
 0x23d   : > { %v2176_v7 = vpop.f32.mrf.mxu0  ;;  %2110 = vmatmul.f32.gmra.mxu3 %v3333_v26  ;;  %v3653_v26 = vld [vmem:[#allocation2 + $0x160] sm:$0xff] }
 0x23f   : > { %v3638_v50 = vpop.f32.mrf.mxu2  ;;  %2288 = vmatmul.f32.gmra.mxu1 %v3642_v62 }
 0x240   : > { %2223 = vmatmul.f32.gmra.mxu0 %v3513_v30  ;;  %v2063_v31 = vpop.f32.mrf.mxu3 }
 0x241   : > { %v3646_v33 = vadd.f32 %v2176_v7, %v2063_v31  ;;  %v1955_v7 = vld [vmem:[#allocation2 + $0x498] sm:$0xff]  ;;  %v3662_v20 = vpop.f32.mrf.mxu1 }
 0x242   : > { %4353 = vst [vmem:[#allocation97_spill] sm:$0xff] %v3662_v20  ;;  %v1057_v20 = vld [vmem:[#allocation3 + $0x110] sm:$0xff] }
 0x243   : > { %1794 = vmatpush.msra.mxu2 %v1057_v20 }
 0x244   : > { %1402 = vmatmul.f32.gmra.mxu2 %v3504_v19 }
 0x245   : > { %v2179_v44 = vpop.f32.mrf.mxu0  ;;  %2113 = vmatmul.f32.gmra.mxu3 %v1952_v34  ;;  %v3664_v34 = vld [vmem:[#allocation2 + $0x1a8] sm:$0xff] }
 0x247   : > { %v3648_v43 = vpop.f32.mrf.mxu2  ;;  %2291 = vmatmul.f32.gmra.mxu1 %v3653_v26 }
 0x248   : > { %2226 = vmatmul.f32.gmra.mxu0 %v3524_v54  ;;  %v2066_v3 = vpop.f32.mrf.mxu3 }
 0x249   : > { %v3657_v19 = vadd.f32 %v2179_v44, %v2066_v3 }
 0x24c   : > { %1405 = vmatmul.f32.gmra.mxu2 %v3513_v30 }
 0x24d   : > { %v2182_v11 = vpop.f32.mrf.mxu0  ;;  %2116 = vmatmul.f32.gmra.mxu3 %v1955_v7  ;;  %v3675_v7 = vpop.f32.mrf.mxu1 }
 0x24e   : > { %4354 = vst [vmem:[#allocation98_spill] sm:$0xff] %v3675_v7 }
 0x24f   : > { %v3659_v31 = vpop.f32.mrf.mxu2  ;;  %2294 = vmatmul.f32.gmra.mxu1 %v3664_v34 }
 0x250   : > { %2229 = vmatmul.f32.gmra.mxu0 %v3535_v56  ;;  %v2069_v30 = vpop.f32.mrf.mxu3 }
 0x251   : > { %v3668_v44 = vadd.f32 %v2182_v11, %v2069_v30  ;;  %v1961_v30 = vld [vmem:[#allocation2 + $0x4f8] sm:$0xff] }
 0x254   : > { %1408 = vmatmul.f32.gmra.mxu2 %v3524_v54 }
 0x255   : > { %v2185_v6 = vpop.f32.mrf.mxu0  ;;  %2119 = vmatmul.f32.gmra.mxu3 %v1958_v4 }
 0x257   : > { %v3670_v3 = vpop.f32.mrf.mxu2  ;;  %2297 = vmatmul.f32.gmra.mxu1 %v3673_v5 }
 0x258   : > { %2232 = vmatmul.f32.gmra.mxu0 %v3546_v59  ;;  %v2072_v0 = vpop.f32.mrf.mxu3 }
 0x259   : > { %v3679_v54 = vadd.f32 %v2185_v6, %v2072_v0 }
 0x25b   : > { %4355 = vst [vmem:[#allocation99_spill] sm:$0xff] %v3679_v54  ;;  %v938_v54 = vld [vmem:[#allocation2 + $0xa0] sm:$0xff] }
 0x25c   : > { %1411 = vmatmul.f32.gmra.mxu2 %v3535_v56  ;;  %v3688_v56 = vpop.f32.mrf.mxu1 }
 0x25d   : > { %2122 = vmatmul.f32.gmra.mxu3 %v1961_v30  ;;  %v2188_v4 = vpop.f32.mrf.mxu0  ;;  %4356 = vst [vmem:[#allocation100_spill] sm:$0xff] %v3688_v56  ;;  %v3695_v30 = vld [vmem:[#allocation2 + $0x220] sm:$0xff]  ;;  %v1056_v56 = vld [vmem:[#allocation3 + $0x108] sm:$0xff] }
 0x25e   : > { %1795 = vmatpush.msra.mxu2 %v1056_v56 }
 0x25f   : > { %v3681_v11 = vpop.f32.mrf.mxu2  ;;  %2300 = vmatmul.f32.gmra.mxu1 %v3684_v16 }
 0x260   : > { %2235 = vmatmul.f32.gmra.mxu0 %v3557_v49  ;;  %v2075_v7 = vpop.f32.mrf.mxu3 }
 0x261   : > { %v3690_v6 = vadd.f32 %v2188_v4, %v2075_v7  ;;  %v1967_v4 = vld [vmem:[#allocation2 + $0x558] sm:$0xff] }
 0x263   : > { %4357 = vst [vmem:[#allocation101_spill] sm:$0xff] %v3690_v6 }
 0x264   : > { %1414 = vmatmul.f32.gmra.mxu2 %v3546_v59  ;;  %v3703_v7 = vpop.f32.mrf.mxu1 }
 0x265   : > { %2125 = vmatmul.f32.gmra.mxu3 %v1964_v22  ;;  %v2191_v20 = vpop.f32.mrf.mxu0  ;;  %4361 = vst [vmem:[#allocation105_spill] sm:$0xff] %v3703_v7  ;;  %v3706_v22 = vld [vmem:[#allocation2 + $0x268] sm:$0xff]  ;;  %v3715_v7 = vld [vmem:[#allocation2 + $0x280] sm:$0xff] }
 0x267   : > { %v3692_v0 = vpop.f32.mrf.mxu2  ;;  %2303 = vmatmul.f32.gmra.mxu1 %v3695_v30 }
 0x268   : > { %4358 = vst [vmem:[#allocation102_spill] sm:$0xff] %v3692_v0  ;;  %2238 = vmatmul.f32.gmra.mxu0 %v3566_v52  ;;  %v2078_v57 = vpop.f32.mrf.mxu3  ;;  %v935_v0 = vld [vmem:[#allocation2 + $0x88] sm:$0xff] }
 0x269   : > { %v3699_v59 = vadd.f32 %v2191_v20, %v2078_v57  ;;  %v1970_v57 = vld [vmem:[#allocation2 + $0x570] sm:$0xff] }
 0x26b   : > { %4359 = vst [vmem:[#allocation103_spill] sm:$0xff] %v3699_v59 }
 0x26c   : > { %1417 = vmatmul.f32.gmra.mxu2 %v3557_v49  ;;  %v3713_v20 = vpop.f32.mrf.mxu1 }
 0x26d   : > { %2128 = vmatmul.f32.gmra.mxu3 %v1967_v4  ;;  %4363 = vst [vmem:[#allocation107_spill] sm:$0xff] %v3713_v20  ;;  %v1973_v4 = vld [vmem:[#allocation2 + $0x5b8] sm:$0xff]  ;;  %v3731_v20 = vld [vmem:[#allocation2 + $0x2e0] sm:$0xff] }
 0x26f   : > { %v3701_v46 = vpop.f32.mrf.mxu2  ;;  %2306 = vmatmul.f32.gmra.mxu1 %v3706_v22 }
 0x270   : > { %4360 = vst [vmem:[#allocation104_spill] sm:$0xff] %v3701_v46  ;;  %2241 = vmatmul.f32.gmra.mxu0 %v3577_v61 }
 0x274   : > { %1420 = vmatmul.f32.gmra.mxu2 %v3566_v52  ;;  %v1055_v52 = vld [vmem:[#allocation3 + $0x100] sm:$0xff]  ;;  %v3724_v59 = vpop.f32.mrf.mxu1 }
 0x275   : > { %2131 = vmatmul.f32.gmra.mxu3 %v1970_v57  ;;  %1796 = vmatpush.msra.mxu2 %v1055_v52  ;;  %4365 = vst [vmem:[#allocation109_spill] sm:$0xff] %v3724_v59  ;;  %v1980_v59 = vld [vmem:[#allocation2 + $0x620] sm:$0xff] }
 0x277   : > { %v3710_v49 = vpop.f32.mrf.mxu2  ;;  %2309 = vmatmul.f32.gmra.mxu1 %v3715_v7 }
 0x278   : > { %4362 = vst [vmem:[#allocation106_spill] sm:$0xff] %v3710_v49  ;;  %2244 = vmatmul.f32.gmra.mxu0 %v3588_v27  ;;  %v3722_v49 = vld [vmem:[#allocation2 + $0x2c8] sm:$0xff] }
 0x27c   : > { %1423 = vmatmul.f32.gmra.mxu2 %v3577_v61  ;;  %v1976_v61 = vld [vmem:[#allocation2 + $0x5d0] sm:$0xff] }
 0x27d   : > { %2134 = vmatmul.f32.gmra.mxu3 %v1973_v4  ;;  %v3735_v4 = vpop.f32.mrf.mxu1 }
 0x27e   : > { %4367 = vst [vmem:[#allocation111_spill] sm:$0xff] %v3735_v4  ;;  %v3747_v4 = vld [vmem:[#allocation2 + $0x340] sm:$0xff] }
 0x27f   : > { %v3719_v56 = vpop.f32.mrf.mxu2  ;;  %2312 = vmatmul.f32.gmra.mxu1 %v3722_v49 }
 0x280   : > { %4364 = vst [vmem:[#allocation108_spill] sm:$0xff] %v3719_v56  ;;  %2247 = vmatmul.f32.gmra.mxu0 %v3600_v42  ;;  %v1979_v56 = vld [vmem:[#allocation2 + $0x618] sm:$0xff] }
 0x284   : > { %1426 = vmatmul.f32.gmra.mxu2 %v3588_v27  ;;  %v3739_v27 = vld [vmem:[#allocation2 + $0x328] sm:$0xff] }
 0x285   : > { %2137 = vmatmul.f32.gmra.mxu3 %v1976_v61  ;;  %v3745_v46 = vpop.f32.mrf.mxu1 }
 0x286   : > { %4370 = vst [vmem:[#allocation114_spill] sm:$0xff] %v3745_v46 }
 0x287   : > { %v3728_v57 = vpop.f32.mrf.mxu2  ;;  %2315 = vmatmul.f32.gmra.mxu1 %v3731_v20 }
 0x288   : > { %4366 = vst [vmem:[#allocation110_spill] sm:$0xff] %v3728_v57  ;;  %2250 = vmatmul.f32.gmra.mxu0 %v3611_v37  ;;  %v1983_v57 = vld [vmem:[#allocation2 + $0x638] sm:$0xff] }
 0x28c   : > { %1429 = vmatmul.f32.gmra.mxu2 %v3600_v42  ;;  %v1982_v42 = vld [vmem:[#allocation2 + $0x630] sm:$0xff] }
 0x28d   : > { %2140 = vmatmul.f32.gmra.mxu3 %v1979_v56 }
 0x28f   : > { %v3737_v52 = vpop.f32.mrf.mxu2  ;;  %2318 = vmatmul.f32.gmra.mxu1 %v3739_v27 }
 0x290   : > { %4368 = vst [vmem:[#allocation112_spill] sm:$0xff] %v3737_v52  ;;  %2253 = vmatmul.f32.gmra.mxu0 %v1980_v59  ;;  %v3752_v52 = vld [vmem:[#allocation2 + $0x18] sm:$0xff] }
 0x294   : > { %1432 = vmatmul.f32.gmra.mxu2 %v3611_v37  ;;  %v3755_v37 = vpop.f32.mrf.mxu1 }
 0x295   : > { %2143 = vmatmul.f32.gmra.mxu3 %v1982_v42  ;;  %4372 = vst [vmem:[#allocation116_spill] sm:$0xff] %v3755_v37 }
 0x297   : > { %v3743_v61 = vpop.f32.mrf.mxu2  ;;  %2321 = vmatmul.f32.gmra.mxu1 %v3747_v4 }
 0x298   : > { %4369 = vst [vmem:[#allocation113_spill] sm:$0xff] %v3743_v61  ;;  %2256 = vmatmul.f32.gmra.mxu0 %v1983_v57  ;;  %v3758_v61 = vld [vmem:[#allocation2 + $0x388] sm:$0xff] }
 0x29c   : > { %1435 = vmatmul.f32.gmra.mxu2 %v1980_v59  ;;  %v3765_v59 = vld [vmem:[#allocation2 + $0x3a0] sm:$0xff]  ;;  %v3767_v46 = vpop.f32.mrf.mxu1 }
 0x29d   : > { %2146 = vmatmul.f32.gmra.mxu3 %v3752_v52  ;;  %4374 = vst [vmem:[#allocation118_spill] sm:$0xff] %v3767_v46  ;;  %v3784_v46 = vld [vmem:[#allocation2 + $0x400] sm:$0xff] }
 0x29f   : > { %v3750_v56 = vpop.f32.mrf.mxu2  ;;  %2324 = vmatmul.f32.gmra.mxu1 %v3758_v61 }
 0x2a0   : > { %4371 = vst [vmem:[#allocation115_spill] sm:$0xff] %v3750_v56  ;;  %2259 = vmatmul.f32.gmra.mxu0 %v3752_v52  ;;  %v3773_v56 = vpop.f32.mrf.mxu3 }
 0x2a1   : > { %4376 = vst [vmem:[#allocation120_spill] sm:$0xff] %v3773_v56 }
 0x2a4   : > { %1438 = vmatmul.f32.gmra.mxu2 %v1983_v57  ;;  %v3776_v57 = vld [vmem:[#allocation2 + $0x3e8] sm:$0xff] }
 0x2a5   : > { %2149 = vmatmul.f32.gmra.mxu3 %v3752_v52 }
 0x2a7   : > { %v3761_v42 = vpop.f32.mrf.mxu2  ;;  %2327 = vmatmul.f32.gmra.mxu1 %v3765_v59 }
 0x2a8   : > { %4373 = vst [vmem:[#allocation117_spill] sm:$0xff] %v3761_v42  ;;  %2262 = vmatmul.f32.gmra.mxu0 %v3752_v52  ;;  %v3780_v42 = vpop.f32.mrf.mxu1 }
 0x2a9   : > { %4377 = vst [vmem:[#allocation121_spill] sm:$0xff] %v3780_v42 }
 0x2ac   : > { %1797 = vmatmul.f32.vlgmr.msra.gmra.mxu2 %v3752_v52 }
 0x2ad   : > { %2375 = vmatmul.f32.vlgmr.msrb.gmra.mxu3 %v3752_v52 }
 0x2af   : > { %v3771_v37 = vpop.f32.mrf.mxu2  ;;  %2330 = vmatmul.f32.gmra.mxu1 %v3776_v57 }
 0x2b0   : > { %4375 = vst [vmem:[#allocation119_spill] sm:$0xff] %v3771_v37  ;;  %v3789_v56 = vpop.f32.mrf.mxu1 }
 0x2b1   : > { %4380 = vst [vmem:[#allocation124_spill] sm:$0xff] %v3789_v56 }
 0x2b4   : > { %1800 = vmatmul.f32.gmra.mxu2 %v3752_v52 }
 0x2b7   : > { %v3782_v6 = vpop.f32.mrf.mxu2  ;;  %2333 = vmatmul.f32.gmra.mxu1 %v3784_v46 }
 0x2b8   : > { %4378 = vst [vmem:[#allocation122_spill] sm:$0xff] %v3782_v6  ;;  %v3796_v42 = vpop.f32.mrf.mxu1  ;;  %v3798_v6 = vld [vmem:[#allocation2 + $0x460] sm:$0xff] }
 0x2b9   : > { %4382 = vst [vmem:[#allocation126_spill] sm:$0xff] %v3796_v42 }
 0x2bc   : > { %1803 = vmatmul.f32.gmra.mxu2 %v935_v0 }
 0x2bf   : > { %v3787_v37 = vpop.f32.mrf.mxu2  ;;  %2336 = vmatmul.f32.gmra.mxu1 %v3791_v60 }
 0x2c0   : > { %4379 = vst [vmem:[#allocation123_spill] sm:$0xff] %v3787_v37  ;;  %v3804_v37 = vld [vmem:[#allocation2 + $0x4a8] sm:$0xff]  ;;  %v3806_v56 = vpop.f32.mrf.mxu1 }
 0x2c1   : > { %4384 = vst [vmem:[#allocation128_spill] sm:$0xff] %v3806_v56 }
 0x2c4   : > { %1806 = vmatmul.f32.gmra.mxu2 %v938_v54 }
 0x2c7   : > { %v3794_v9 = vpop.f32.mrf.mxu2  ;;  %2339 = vmatmul.f32.gmra.mxu1 %v3798_v6 }
 0x2c8   : > { %4381 = vst [vmem:[#allocation125_spill] sm:$0xff] %v3794_v9  ;;  %v3812_v9 = vld [vmem:[#allocation2 + $0x4c0] sm:$0xff]  ;;  %v3816_v42 = vpop.f32.mrf.mxu1 }
 0x2c9   : > { %4386 = vst [vmem:[#allocation130_spill] sm:$0xff] %v3812_v9 }
 0x2ca   : > { %4387 = vst [vmem:[#allocation131_spill] sm:$0xff] %v3816_v42 }
 0x2cc   : > { %1809 = vmatmul.f32.gmra.mxu2 %v3620_v32 }
 0x2cf   : > { %v3802_v0 = vpop.f32.mrf.mxu2  ;;  %2342 = vmatmul.f32.gmra.mxu1 %v3804_v37 }
 0x2d0   : > { %4383 = vst [vmem:[#allocation127_spill] sm:$0xff] %v3802_v0  ;;  %v3820_v0 = vld [vmem:[#allocation2 + $0x508] sm:$0xff] }
 0x2d4   : > { %1812 = vmatmul.f32.gmra.mxu2 %v3630_v36  ;;  %v2283_v36 = vpop.f32.mrf.mxu1 }
 0x2d7   : > { %v3810_v54 = vpop.f32.mrf.mxu2  ;;  %2345 = vmatmul.f32.gmra.mxu1 %v3812_v9  ;;  %v3832_v9 = vld [vmem:[#allocation2 + $0x568] sm:$0xff] }
 0x2d8   : > { %4385 = vst [vmem:[#allocation129_spill] sm:$0xff] %v3810_v54  ;;  %v3826_v54 = vld [vmem:[#allocation2 + $0x520] sm:$0xff] }
 0x2d9   : > { %4391 = vst [vmem:[#allocation135_spill] sm:$0xff] %v3832_v9 }
 0x2dc   : > { %1815 = vmatmul.f32.gmra.mxu2 %v3642_v62  ;;  %v2286_v42 = vpop.f32.mrf.mxu1 }
 0x2df   : > { %v3818_v32 = vpop.f32.mrf.mxu2  ;;  %2348 = vmatmul.f32.gmra.mxu1 %v3820_v0 }
 0x2e0   : > { %4388 = vst [vmem:[#allocation132_spill] sm:$0xff] %v3818_v32 }
 0x2e4   : > { %1818 = vmatmul.f32.gmra.mxu2 %v3653_v26  ;;  %v3838_v26 = vld [vmem:[#allocation2 + $0x580] sm:$0xff] }
 0x2e5   : > { %4393 = vst [vmem:[#allocation137_spill] sm:$0xff] %v3838_v26 }
 0x2e7   : > { %v3824_v56 = vpop.f32.mrf.mxu2  ;;  %2351 = vmatmul.f32.gmra.mxu1 %v3826_v54 }
 0x2e8   : > { %4389 = vst [vmem:[#allocation133_spill] sm:$0xff] %v3824_v56  ;;  %v3840_v56 = vpop.f32.mrf.mxu1 }
 0x2ec   : > { %1821 = vmatmul.f32.gmra.mxu2 %v3664_v34 }
 0x2ef   : > { %v3830_v62 = vpop.f32.mrf.mxu2  ;;  %2354 = vmatmul.f32.gmra.mxu1 %v3832_v9 }
 0x2f0   : > { %4390 = vst [vmem:[#allocation134_spill] sm:$0xff] %v3830_v62  ;;  %v3846_v62 = vld [vmem:[#allocation2 + $0x5c8] sm:$0xff]  ;;  %v3850_v9 = vpop.f32.mrf.mxu1 }
 0x2f1   : > { %4395 = vst [vmem:[#allocation139_spill] sm:$0xff] %v3846_v62 }
 0x2f4   : > { %1824 = vmatmul.f32.gmra.mxu2 %v3673_v5 }
 0x2f7   : > { %v3836_v32 = vpop.f32.mrf.mxu2  ;;  %2357 = vmatmul.f32.gmra.mxu1 %v3838_v26 }
 0x2f8   : > { %4392 = vst [vmem:[#allocation136_spill] sm:$0xff] %v3836_v32  ;;  %v3854_v32 = vld [vmem:[#allocation2 + $0x5e0] sm:$0xff] }
 0x2f9   : > { %4397 = vst [vmem:[#allocation141_spill] sm:$0xff] %v3854_v32 }
 0x2fc   : > { %1827 = vmatmul.f32.gmra.mxu2 %v3684_v16  ;;  %v3860_v16 = vpop.f32.mrf.mxu1 }
 0x2ff   : > { %v3844_v34 = vpop.f32.mrf.mxu2  ;;  %2360 = vmatmul.f32.gmra.mxu1 %v3846_v62 }
 0x300   : > { %4394 = vst [vmem:[#allocation138_spill] sm:$0xff] %v3844_v34  ;;  %v1981_v34 = vld [vmem:[#allocation2 + $0x628] sm:$0xff] }
 0x304   : > { %1830 = vmatmul.f32.gmra.mxu2 %v3695_v30  ;;  %v3865_v30 = vpop.f32.mrf.mxu1 }
 0x307   : > { %v3852_v5 = vpop.f32.mrf.mxu2  ;;  %2363 = vmatmul.f32.gmra.mxu1 %v3854_v32 }
 0x308   : > { %4396 = vst [vmem:[#allocation140_spill] sm:$0xff] %v3852_v5  ;;  %v1984_v5 = vld [vmem:[#allocation2 + $0x640] sm:$0xff] }
 0x30c   : > { %1833 = vmatmul.f32.gmra.mxu2 %v3706_v22  ;;  %v1347_v22 = vadd.f32 %v3616_v13, %v3297_v53 }
 0x30f   : > { %v3858_v26 = vpop.f32.mrf.mxu2  ;;  %2366 = vmatmul.f32.gmra.mxu1 %v1981_v34 }
 0x310   : > { %4398 = vst [vmem:[#allocation142_spill] sm:$0xff] %v3858_v26  ;;  %v3872_v26 = vpop.f32.mrf.mxu1 }
 0x314   : > { %1836 = vmatmul.f32.gmra.mxu2 %v3715_v7  ;;  %v1460_v7 = vadd.f32 %v3304_v58, %v1347_v22  ;;  %v3890_v58 = vld [vmem:[%s4256_s4] ss:$0 sm:$0xff] }
 0x317   : > { %v3863_v62 = vpop.f32.mrf.mxu2  ;;  %2369 = vmatmul.f32.gmra.mxu1 %v1984_v5  ;;  %v1350_v5 = vadd.f32 %v3627_v18, %v3309_v2  ;;  %v1353_v2 = vadd.f32 %v3638_v50, %v3320_v12 }
 0x318   : > { %v3905_v50 = vpop.f32.mrf.mxu1 }
 0x319   : > { %v1463_v53 = vadd.f32 %v3314_v41, %v1350_v5 }
 0x31b   : > { %v1576_v41 = vadd.f32 %v3307_v1, %v1463_v53  ;;  %v1356_v1 = vadd.f32 %v3648_v43, %v3331_v25  ;;  %v3919_v43 = vpop.f32.mrf.mxu3 }
 0x31c   : > { %1839 = vmatmul.f32.gmra.mxu2 %v3722_v49  ;;  %v1573_v49 = vadd.f32 %v3299_v55, %v1460_v7 }
 0x31e   : > { %v1686_v13 = vadd.f32 %v3454_v8, %v1573_v49  ;;  %v2290_v49 = vadd.f32 %v3840_v56, %v3646_v33 }
 0x31f   : > { %v3868_v32 = vpop.f32.mrf.mxu2  ;;  %2372 = vmatmul.f32.gmra.mxu1 %v3752_v52 }
 0x320   : > { %4399 = vst [vmem:[#allocation143_spill] sm:$0xff] %v3868_v32 }
 0x324   : > { %1842 = vmatmul.f32.gmra.mxu2 %v3731_v20  ;;  %v2284_v20 = vadd.f32 %v2283_v36, %v3625_v48  ;;  %v1466_v48 = vadd.f32 %v3325_v21, %v1353_v2  ;;  %v2287_v36 = vadd.f32 %v2286_v42, %v3636_v51  ;;  %v1469_v51 = vadd.f32 %v3341_v29, %v1356_v1  ;;  %v4401_v1 = vld [vmem:[#allocation99_spill] sm:$0xff] }
 0x326   : > { %v1579_v21 = vadd.f32 %v3317_v10, %v1466_v48  ;;  %v1359_v10 = vadd.f32 %v3659_v31, %v3344_v35  ;;  %v1582_v53 = vadd.f32 %v3329_v23, %v1469_v51  ;;  %v2293_v35 = vadd.f32 %v3850_v9, %v3657_v19 }
 0x327   : > { %v3877_v34 = vpop.f32.mrf.mxu2  ;;  %v1362_v31 = vadd.f32 %v3670_v3, %v3354_v47  ;;  %v2296_v47 = vadd.f32 %v3860_v16, %v3668_v44  ;;  %v1365_v48 = vadd.f32 %v3681_v11, %v3362_v24  ;;  %v4400_v16 = vld [vmem:[#allocation54_spill] sm:$0xff]  ;;  %v2299_v24 = vadd.f32 %v3865_v30, %v4401_v1  ;;  %v4402_v11 = vld [vmem:[#allocation11_spill] sm:$0xff] }
 0x328   : > { %v1692_v7 = vadd.f32 %v3473_v14, %v1579_v21  ;;  %v1472_v14 = vadd.f32 %v3351_v39, %v1359_v10  ;;  %v1695_v56 = vadd.f32 %v3482_v17, %v1582_v53  ;;  %v4407_v53 = vld [vmem:[#allocation101_spill] sm:$0xff]  ;;  %v4417_v1 = vld [vmem:[#allocation19_spill] sm:$0xff] }
 0x32c   : > { %1845 = vmatmul.f32.gmra.mxu2 %v3739_v27  ;;  %v1689_v27 = vadd.f32 %v3464_v15, %v1576_v41  ;;  %v3912_v15 = vpop.f32.mrf.mxu0  ;;  %v1475_v41 = vadd.f32 %v3359_v40, %v1362_v31 }
 0x32f   : > { %v1798_v32 = vpop.f32.mrf.mxu2 }
 0x330   : > { %v1799_v52 = vadd.f32 %v1798_v32, %v1686_v13  ;;  %v3924_v13 = vpop.f32.mrf.mxu1 }
 0x332   : > { %v2379_v55 = vadd.f32 %v2284_v20, %v1799_v52 }
 0x334   : > { %v2415_v8 = vadd.f32 %v3890_v58, %v2379_v55  ;;  %1848 = vmatmul.f32.gmra.mxu2 %v3747_v4  ;;  %v3930_v20 = vpop.f32.mrf.mxu0  ;;  %v3938_v55 = vpop.f32.mrf.mxu3 }
 0x336   : > { %v2447_v18 = vmax.f32 %v2415_v8, 0.0 }
 0x337   : > { %v1801_v32 = vpop.f32.mrf.mxu2 }
 0x338   : > { %2479 = vst [vmem:[%s3902_s17] sm:$0xff] %v2447_v18  ;;  %v1802_v12 = vadd.f32 %v1801_v32, %v1689_v27  ;;  %v3942_v17 = vpop.f32.mrf.mxu1  ;;  %v1588_v18 = vadd.f32 %v3349_v38, %v1475_v41  ;;  %v1478_v27 = vadd.f32 %v3369_v45, %v1365_v48 }
 0x33a   : > { %v2380_v4 = vadd.f32 %v2287_v36, %v1802_v12  ;;  %v1701_v32 = vadd.f32 %v4400_v16, %v1588_v18  ;;  %v4414_v18 = vld [vmem:[#allocation17_spill] sm:$0xff] }
 0x33c   : > { %v2416_v22 = vadd.f32 %v3890_v58, %v2380_v4  ;;  %1851 = vmatmul.f32.gmra.mxu2 %v3758_v61  ;;  %v3949_v3 = vpop.f32.mrf.mxu0  ;;  %v4403_v4 = vld [vmem:[#allocation102_spill] sm:$0xff] }
 0x33d   : > { %v1368_v21 = vadd.f32 %v4403_v4, %v4402_v11  ;;  %v4419_v4 = vld [vmem:[#allocation69_spill] sm:$0xff] }
 0x33e   : > { %v2448_v42 = vmax.f32 %v2416_v22, 0.0  ;;  %v4404_v22 = vld [vmem:[#allocation9_spill] sm:$0xff] }
 0x33f   : > { %v1804_v5 = vpop.f32.mrf.mxu2  ;;  %v1591_v51 = vadd.f32 %v4404_v22, %v1478_v27 }
 0x340   : > { %2480 = vst [vmem:[%s3902_s17 + $0x8] sm:$0xff] %v2448_v42  ;;  %v1805_v25 = vadd.f32 %v1804_v5, %v1692_v7  ;;  %v3960_v36 = vpop.f32.mrf.mxu1  ;;  %v4405_v7 = vld [vmem:[#allocation13_spill] sm:$0xff] }
 0x341   : > { %v1481_v5 = vadd.f32 %v4405_v7, %v1368_v21  ;;  %v4420_v7 = vld [vmem:[#allocation20_spill] sm:$0xff] }
 0x342   : > { %v2381_v61 = vadd.f32 %v2290_v49, %v1805_v25  ;;  %v4406_v25 = vld [vmem:[#allocation58_spill] sm:$0xff] }
 0x343   : > { %v1704_v10 = vadd.f32 %v4406_v25, %v1591_v51  ;;  %v4422_v25 = vld [vmem:[#allocation15_spill] sm:$0xff] }
 0x344   : > { %v2417_v29 = vadd.f32 %v3890_v58, %v2381_v61  ;;  %1854 = vmatmul.f32.gmra.mxu2 %v3765_v59  ;;  %v1585_v59 = vadd.f32 %v3339_v28, %v1472_v14  ;;  %v3968_v42 = vpop.f32.mrf.mxu0 }
 0x346   : > { %v2449_v33 = vmax.f32 %v2417_v29, 0.0  ;;  %v1698_v9 = vadd.f32 %v3491_v63, %v1585_v59  ;;  %v3956_v63 = vpop.f32.mrf.mxu3  ;;  %v2302_v29 = vadd.f32 %v3872_v26, %v4407_v53  ;;  %v4412_v26 = vld [vmem:[#allocation64_spill] sm:$0xff]  ;;  %v4423_v53 = vld [vmem:[#allocation130_spill] sm:$0xff] }
 0x347   : > { %v1807_v52 = vpop.f32.mrf.mxu2 }
 0x348   : > { %2481 = vst [vmem:[%s3902_s17 + $0x10] sm:$0xff] %v2449_v33  ;;  %v1808_v23 = vadd.f32 %v1807_v52, %v1695_v56  ;;  %v3979_v33 = vpop.f32.mrf.mxu1  ;;  %v4408_v56 = vld [vmem:[#allocation14_spill] sm:$0xff]  ;;  %v4409_v52 = vld [vmem:[#allocation104_spill] sm:$0xff] }
 0x34a   : > { %v2382_v2 = vadd.f32 %v2293_v35, %v1808_v23  ;;  %v1371_v35 = vadd.f32 %v4409_v52, %v4408_v56  ;;  %v4410_v23 = vld [vmem:[#allocation10_spill] sm:$0xff] }
 0x34b   : > { %v1594_v31 = vadd.f32 %v4410_v23, %v1481_v5  ;;  %v4421_v5 = vld [vmem:[#allocation108_spill] sm:$0xff] }
 0x34c   : > { %v2418_v39 = vadd.f32 %v3890_v58, %v2382_v2  ;;  %1857 = vmatmul.f32.gmra.mxu2 %v3776_v57  ;;  %v3986_v59 = vpop.f32.mrf.mxu0 }
 0x34e   : > { %v2450_v8 = vmax.f32 %v2418_v39, 0.0  ;;  %v3974_v30 = vpop.f32.mrf.mxu3  ;;  %v4411_v39 = vld [vmem:[#allocation16_spill] sm:$0xff] }
 0x34f   : > { %v1810_v19 = vpop.f32.mrf.mxu2  ;;  %v1484_v41 = vadd.f32 %v4411_v39, %v1371_v35  ;;  %v4425_v35 = vld [vmem:[#allocation73_spill] sm:$0xff] }
 0x350   : > { %2482 = vst [vmem:[%s3902_s17 + $0x18] sm:$0xff] %v2450_v8  ;;  %v1811_v28 = vadd.f32 %v1810_v19, %v1698_v9  ;;  %v1707_v9 = vadd.f32 %v4412_v26, %v1594_v31 }
 0x352   : > { %v2383_v57 = vadd.f32 %v2296_v47, %v1811_v28  ;;  %v4413_v47 = vld [vmem:[#allocation103_spill] sm:$0xff] }
 0x353   : > { %v2305_v28 = vadd.f32 %v3905_v50, %v4413_v47  ;;  %v4418_v50 = vld [vmem:[#allocation120_spill] sm:$0xff] }
 0x354   : > { %v2419_v40 = vadd.f32 %v3890_v58, %v2383_v57  ;;  %1860 = vmatmul.f32.gmra.mxu2 %v3784_v46 }
 0x356   : > { %v2451_v44 = vmax.f32 %v2419_v40, 0.0  ;;  %v3993_v57 = vpop.f32.mrf.mxu3  ;;  %v4415_v40 = vld [vmem:[#allocation106_spill] sm:$0xff] }
 0x357   : > { %v1813_v12 = vpop.f32.mrf.mxu2  ;;  %v1374_v27 = vadd.f32 %v4415_v40, %v4414_v18  ;;  %v4430_v40 = vld [vmem:[#allocation77_spill] sm:$0xff] }
 0x358   : > { %2483 = vst [vmem:[%s3902_s17 + $0x20] sm:$0xff] %v2451_v44  ;;  %v1814_v38 = vadd.f32 %v1813_v12, %v1701_v32  ;;  %v4416_v44 = vld [vmem:[#allocation12_spill] sm:$0xff]  ;;  %v3998_v32 = vpop.f32.mrf.mxu1 }
 0x359   : > { %v1597_v16 = vadd.f32 %v4416_v44, %v1484_v41  ;;  %v4426_v41 = vld [vmem:[#allocation23_spill] sm:$0xff] }
 0x35a   : > { %v2384_v46 = vadd.f32 %v2299_v24, %v1814_v38  ;;  %v1487_v24 = vadd.f32 %v4417_v1, %v1374_v27  ;;  %v2195_v38 = vadd.f32 %v3912_v15, %v4418_v50  ;;  %v4431_v1 = vld [vmem:[#allocation26_spill] sm:$0xff] }
 0x35b   : > { %v1710_v21 = vadd.f32 %v4419_v4, %v1597_v16 }
 0x35c   : > { %v2420_v45 = vadd.f32 %v3890_v58, %v2384_v46  ;;  %1863 = vmatmul.f32.gmra.mxu2 %v3791_v60  ;;  %v4006_v46 = vpop.f32.mrf.mxu0  ;;  %v2308_v51 = vadd.f32 %v3924_v13, %v2195_v38  ;;  %v2198_v13 = vadd.f32 %v3930_v20, %v3919_v43  ;;  %v4429_v20 = vld [vmem:[#allocation25_spill] sm:$0xff] }
 0x35d   : > { %v4433_v38 = vld [vmem:[#allocation21_spill] sm:$0xff] }
 0x35e   : > { %v2452_v49 = vmax.f32 %v2420_v45, 0.0  ;;  %v2311_v31 = vadd.f32 %v3942_v17, %v2198_v13  ;;  %v2201_v17 = vadd.f32 %v3949_v3, %v3938_v55  ;;  %v4434_v3 = vld [vmem:[#allocation28_spill] sm:$0xff] }
 0x35f   : > { %v1816_v61 = vpop.f32.mrf.mxu2 }
 0x360   : > { %2484 = vst [vmem:[%s3902_s17 + $0x28] sm:$0xff] %v2452_v49  ;;  %v1817_v14 = vadd.f32 %v1816_v61, %v1704_v10  ;;  %v1377_v49 = vadd.f32 %v4421_v5, %v4420_v7  ;;  %v1600_v10 = vadd.f32 %v4422_v25, %v1487_v24  ;;  %v4013_v61 = vpop.f32.mrf.mxu3  ;;  %v2314_v16 = vadd.f32 %v3960_v36, %v2201_v17 }
 0x361   : > { %v2204_v36 = vadd.f32 %v3968_v42, %v3956_v63  ;;  %v4439_v42 = vld [vmem:[#allocation135_spill] sm:$0xff] }
 0x362   : > { %v2385_v60 = vadd.f32 %v2302_v29, %v1817_v14  ;;  %v4017_v29 = vpop.f32.mrf.mxu1  ;;  %v4424_v14 = vld [vmem:[#allocation22_spill] sm:$0xff] }
 0x363   : > { %v1490_v56 = vadd.f32 %v4424_v14, %v1377_v49  ;;  %v2317_v49 = vadd.f32 %v3979_v33, %v2204_v36  ;;  %v4438_v14 = vld [vmem:[#allocation24_spill] sm:$0xff]  ;;  %v2207_v33 = vadd.f32 %v3986_v59, %v3974_v30  ;;  %v4445_v59 = vld [vmem:[#allocation137_spill] sm:$0xff] }
 0x364   : > { %v2421_v2 = vadd.f32 %v3890_v58, %v2385_v60  ;;  %1866 = vmatmul.f32.gmra.mxu2 %v3798_v6  ;;  %v1713_v60 = vadd.f32 %v4425_v35, %v1600_v10  ;;  %v4025_v39 = vpop.f32.mrf.mxu0  ;;  %v4436_v10 = vld [vmem:[#allocation29_spill] sm:$0xff] }
 0x366   : > { %v2453_v8 = vmax.f32 %v2421_v2, 0.0 }
 0x367   : > { %v1819_v19 = vpop.f32.mrf.mxu2 }
 0x368   : > { %2485 = vst [vmem:[%s3902_s17 + $0x30] sm:$0xff] %v2453_v8  ;;  %v1820_v48 = vadd.f32 %v1819_v19, %v1707_v9  ;;  %v4427_v8 = vld [vmem:[#allocation110_spill] sm:$0xff]  ;;  %v4032_v43 = vpop.f32.mrf.mxu3 }
 0x369   : > { %v1380_v26 = vadd.f32 %v4427_v8, %v4426_v41  ;;  %v4428_v19 = vld [vmem:[#allocation18_spill] sm:$0xff]  ;;  %v2320_v41 = vadd.f32 %v3998_v32, %v2207_v33  ;;  %v2210_v32 = vadd.f32 %v4006_v46, %v3993_v57  ;;  %v4451_v46 = vld [vmem:[#allocation139_spill] sm:$0xff] }
 0x36a   : > { %v2386_v6 = vadd.f32 %v2305_v28, %v1820_v48  ;;  %v1603_v47 = vadd.f32 %v4428_v19, %v1490_v56  ;;  %v4443_v19 = vld [vmem:[#allocation115_spill] sm:$0xff] }
 0x36b   : > { %v1493_v48 = vadd.f32 %v4429_v20, %v1380_v26  ;;  %v4444_v20 = vld [vmem:[#allocation27_spill] sm:$0xff] }
 0x36c   : > { %v2422_v12 = vadd.f32 %v3890_v58, %v2386_v6  ;;  %1869 = vmatmul.f32.gmra.mxu2 %v3804_v37  ;;  %v1716_v27 = vadd.f32 %v4430_v40, %v1603_v47  ;;  %v4038_v6 = vpop.f32.mrf.mxu1  ;;  %v4045_v4 = vpop.f32.mrf.mxu0 }
 0x36e   : > { %v2454_v11 = vmax.f32 %v2422_v12, 0.0 }
 0x36f   : > { %v1822_v22 = vpop.f32.mrf.mxu2 }
 0x370   : > { %2486 = vst [vmem:[%s3902_s17 + $0x38] sm:$0xff] %v2454_v11  ;;  %v1823_v45 = vadd.f32 %v1822_v22, %v1710_v21  ;;  %v1606_v11 = vadd.f32 %v4433_v38, %v1493_v48  ;;  %v4053_v7 = vpop.f32.mrf.mxu3  ;;  %v4449_v38 = vld [vmem:[#allocation117_spill] sm:$0xff] }
 0x372   : > { %v2387_v37 = vadd.f32 %v2308_v51, %v1823_v45  ;;  %v4435_v51 = vld [vmem:[#allocation83_spill] sm:$0xff] }
 0x373   : > { %v1719_v45 = vadd.f32 %v4435_v51, %v1606_v11  ;;  %v4452_v51 = vld [vmem:[#allocation37_spill] sm:$0xff] }
 0x374   : > { %v2423_v15 = vadd.f32 %v3890_v58, %v2387_v37  ;;  %1872 = vmatmul.f32.gmra.mxu2 %v4423_v53  ;;  %v2328_v25 = vpop.f32.mrf.mxu1  ;;  %v2218_v13 = vpop.f32.mrf.mxu0 }
 0x376   : > { %v2455_v52 = vmax.f32 %v2423_v15, 0.0  ;;  %v4437_v15 = vld [vmem:[#allocation113_spill] sm:$0xff] }
 0x377   : > { %v1825_v23 = vpop.f32.mrf.mxu2 }
 0x378   : > { %2487 = vst [vmem:[%s3902_s17 + $0x40] sm:$0xff] %v2455_v52  ;;  %v1826_v2 = vadd.f32 %v1825_v23, %v1713_v60  ;;  %v4440_v52 = vld [vmem:[#allocation31_spill] sm:$0xff]  ;;  %v4441_v23 = vld [vmem:[#allocation88_spill] sm:$0xff]  ;;  %v4068_v26 = vpop.f32.mrf.mxu3 }
 0x37a   : > { %v2388_v9 = vadd.f32 %v2311_v31, %v1826_v2 }
 0x37c   : > { %v2424_v28 = vadd.f32 %v3890_v58, %v2388_v9  ;;  %1875 = vmatmul.f32.gmra.mxu2 %v3820_v0  ;;  %v4432_v0 = vld [vmem:[#allocation112_spill] sm:$0xff]  ;;  %v2331_v17 = vpop.f32.mrf.mxu1 }
 0x37d   : > { %v1383_v24 = vadd.f32 %v4432_v0, %v4431_v1  ;;  %v4442_v9 = vld [vmem:[#allocation32_spill] sm:$0xff]  ;;  %v2323_v0 = vadd.f32 %v4017_v29, %v2210_v32  ;;  %v2213_v29 = vadd.f32 %v4025_v39, %v4013_v61 }
 0x37e   : > { %v2456_v18 = vmax.f32 %v2424_v28, 0.0  ;;  %v1389_v47 = vadd.f32 %v4443_v19, %v4442_v9  ;;  %v4458_v39 = vld [vmem:[#allocation40_spill] sm:$0xff] }
 0x37f   : > { %v1828_v44 = vpop.f32.mrf.mxu2  ;;  %v1496_v21 = vadd.f32 %v4434_v3, %v1383_v24  ;;  %v4450_v3 = vld [vmem:[#allocation30_spill] sm:$0xff] }
 0x380   : > { %2488 = vst [vmem:[%s3902_s17 + $0x48] sm:$0xff] %v2456_v18  ;;  %v1829_v12 = vadd.f32 %v1828_v44, %v1716_v27  ;;  %v4446_v18 = vld [vmem:[#allocation34_spill] sm:$0xff]  ;;  %v4447_v44 = vld [vmem:[#allocation92_spill] sm:$0xff]  ;;  %v4084_v36 = vpop.f32.mrf.mxu3 }
 0x381   : > { %v1609_v56 = vadd.f32 %v4438_v14, %v1496_v21  ;;  %v1502_v40 = vadd.f32 %v4446_v18, %v1389_v47  ;;  %v4454_v14 = vld [vmem:[#allocation38_spill] sm:$0xff] }
 0x382   : > { %v2389_v50 = vadd.f32 %v2314_v16, %v1829_v12  ;;  %v2221_v12 = vpop.f32.mrf.mxu0 }
 0x383   : > { %v1722_v31 = vadd.f32 %v4441_v23, %v1609_v56  ;;  %v1615_v21 = vadd.f32 %v4450_v3, %v1502_v40  ;;  %v4455_v56 = vld [vmem:[#allocation119_spill] sm:$0xff] }
 0x384   : > { %v2425_v55 = vadd.f32 %v3890_v58, %v2389_v50  ;;  %1878 = vmatmul.f32.gmra.mxu2 %v3826_v54  ;;  %v1386_v54 = vadd.f32 %v4437_v15, %v4436_v10  ;;  %v4448_v50 = vld [vmem:[#allocation35_spill] sm:$0xff]  ;;  %v2326_v15 = vadd.f32 %v4038_v6, %v2213_v29  ;;  %v2216_v6 = vadd.f32 %v4045_v4, %v4032_v43 }
 0x385   : > { %v1392_v11 = vadd.f32 %v4449_v38, %v4448_v50  ;;  %v2219_v4 = vadd.f32 %v2218_v13, %v4053_v7  ;;  %v4468_v7 = vld [vmem:[#allocation46_spill] sm:$0xff]  ;;  %v2222_v29 = vadd.f32 %v2221_v12, %v4068_v26 }
 0x386   : > { %v2457_v22 = vmax.f32 %v2425_v55, 0.0  ;;  %v1499_v35 = vadd.f32 %v4440_v52, %v1386_v54  ;;  %v4456_v52 = vld [vmem:[#allocation33_spill] sm:$0xff]  ;;  %v2329_v19 = vadd.f32 %v2328_v25, %v2216_v6  ;;  %v4474_v6 = vld [vmem:[#allocation98_spill] sm:$0xff] }
 0x387   : > { %v1831_v5 = vpop.f32.mrf.mxu2 }
 0x388   : > { %2489 = vst [vmem:[%s3902_s17 + $0x50] sm:$0xff] %v2457_v22  ;;  %v1832_v37 = vadd.f32 %v1831_v5, %v1719_v45  ;;  %v1612_v48 = vadd.f32 %v4444_v20, %v1499_v35  ;;  %v2334_v22 = vpop.f32.mrf.mxu1  ;;  %v1505_v45 = vadd.f32 %v4452_v51, %v1392_v11  ;;  %v2114_v61 = vpop.f32.mrf.mxu3  ;;  %v4461_v20 = vld [vmem:[#allocation122_spill] sm:$0xff]  ;;  %v4465_v11 = vld [vmem:[#allocation44_spill] sm:$0xff] }
 0x38a   : > { %v2390_v53 = vadd.f32 %v2317_v49, %v1832_v37  ;;  %v1725_v16 = vadd.f32 %v4447_v44, %v1612_v48  ;;  %v4453_v49 = vld [vmem:[#allocation94_spill] sm:$0xff]  ;;  %v1618_v35 = vadd.f32 %v4456_v52, %v1505_v45 }
 0x38b   : > { %v1728_v37 = vadd.f32 %v4453_v49, %v1615_v21  ;;  %v4469_v49 = vld [vmem:[#allocation97_spill] sm:$0xff]  ;;  %v4472_v52 = vld [vmem:[#allocation42_spill] sm:$0xff] }
 0x38c   : > { %v2426_v63 = vadd.f32 %v3890_v58, %v2390_v53  ;;  %1881 = vmatmul.f32.gmra.mxu2 %v4439_v42  ;;  %v2224_v53 = vpop.f32.mrf.mxu0 }
 0x38d   : > { %v2225_v12 = vadd.f32 %v2224_v53, %v4084_v36  ;;  %v4478_v36 = vld [vmem:[#allocation52_spill] sm:$0xff] }
 0x38e   : > { %v2458_v60 = vmax.f32 %v2426_v63, 0.0  ;;  %v1395_v63 = vadd.f32 %v4455_v56, %v4454_v14  ;;  %v4470_v14 = vld [vmem:[#allocation47_spill] sm:$0xff]  ;;  %v4471_v56 = vld [vmem:[#allocation125_spill] sm:$0xff] }
 0x38f   : > { %v1834_v2 = vpop.f32.mrf.mxu2 }
 0x390   : > { %2490 = vst [vmem:[%s3902_s17 + $0x58] sm:$0xff] %v2458_v60  ;;  %v1835_v8 = vadd.f32 %v1834_v2, %v1722_v31  ;;  %v4457_v60 = vld [vmem:[#allocation141_spill] sm:$0xff]  ;;  %v1508_v23 = vadd.f32 %v4458_v39, %v1395_v63  ;;  %v4459_v2 = vld [vmem:[#allocation95_spill] sm:$0xff]  ;;  %v1404_v63 = vadd.f32 %v4471_v56, %v4470_v14 }
 0x391   : > { %v4473_v39 = vld [vmem:[#allocation49_spill] sm:$0xff]  ;;  %v4487_v56 = vld [vmem:[#allocation51_spill] sm:$0xff] }
 0x392   : > { %v2391_v28 = vadd.f32 %v2320_v41, %v1835_v8  ;;  %v1731_v41 = vadd.f32 %v4459_v2, %v1618_v35  ;;  %v2337_v8 = vpop.f32.mrf.mxu1  ;;  %v1517_v26 = vadd.f32 %v4473_v39, %v1404_v63  ;;  %v4489_v39 = vld [vmem:[#allocation107_spill] sm:$0xff] }
 0x394   : > { %v2427_v30 = vadd.f32 %v3890_v58, %v2391_v28  ;;  %1884 = vmatmul.f32.gmra.mxu2 %v4445_v59  ;;  %v4460_v28 = vld [vmem:[#allocation41_spill] sm:$0xff]  ;;  %v4462_v59 = vld [vmem:[#allocation36_spill] sm:$0xff]  ;;  %v2227_v40 = vpop.f32.mrf.mxu0 }
 0x395   : > { %v1398_v48 = vadd.f32 %v4461_v20, %v4460_v28  ;;  %v1621_v18 = vadd.f32 %v4462_v59, %v1508_v23 }
 0x396   : > { %v2459_v27 = vmax.f32 %v2427_v30, 0.0 }
 0x397   : > { %v1837_v1 = vpop.f32.mrf.mxu2 }
 0x398   : > { %2491 = vst [vmem:[%s3902_s17 + $0x60] sm:$0xff] %v2459_v27  ;;  %v1838_v24 = vadd.f32 %v1837_v1, %v1725_v16  ;;  %v4463_v27 = vld [vmem:[#allocation43_spill] sm:$0xff]  ;;  %v4464_v16 = vld [vmem:[#allocation96_spill] sm:$0xff] }
 0x399   : > { %v1511_v43 = vadd.f32 %v4463_v27, %v1398_v48  ;;  %v1734_v1 = vadd.f32 %v4464_v16, %v1621_v18  ;;  %v4477_v48 = vld [vmem:[#allocation45_spill] sm:$0xff]  ;;  %v2228_v27 = vadd.f32 %v2227_v40, %v2114_v61 }
 0x39a   : > { %v2392_v55 = vadd.f32 %v2323_v0, %v1838_v24  ;;  %v2117_v0 = vpop.f32.mrf.mxu3  ;;  %v2332_v24 = vadd.f32 %v2331_v17, %v2219_v4  ;;  %v2340_v38 = vpop.f32.mrf.mxu1  ;;  %v4479_v4 = vld [vmem:[#allocation100_spill] sm:$0xff] }
 0x39c   : > { %v2428_v57 = vadd.f32 %v3890_v58, %v2392_v55  ;;  %1887 = vmatmul.f32.gmra.mxu2 %v4451_v46  ;;  %v4466_v55 = vld [vmem:[#allocation123_spill] sm:$0xff]  ;;  %v2230_v45 = vpop.f32.mrf.mxu0 }
 0x39d   : > { %v1401_v3 = vadd.f32 %v4466_v55, %v4465_v11  ;;  %v2231_v40 = vadd.f32 %v2230_v45, %v2117_v0 }
 0x39e   : > { %v2460_v5 = vmax.f32 %v2428_v57, 0.0  ;;  %v4467_v57 = vld [vmem:[#allocation39_spill] sm:$0xff] }
 0x39f   : > { %v1840_v10 = vpop.f32.mrf.mxu2  ;;  %v1624_v46 = vadd.f32 %v4467_v57, %v1511_v43  ;;  %v1514_v13 = vadd.f32 %v4468_v7, %v1401_v3  ;;  %v4482_v3 = vld [vmem:[#allocation48_spill] sm:$0xff] }
 0x3a0   : > { %2492 = vst [vmem:[%s3902_s17 + $0x68] sm:$0xff] %v2460_v5  ;;  %v1841_v54 = vadd.f32 %v1840_v10, %v1728_v37  ;;  %v2335_v10 = vadd.f32 %v2334_v22, %v2222_v29 }
 0x3a1   : > { %v1737_v37 = vadd.f32 %v4469_v49, %v1624_v46  ;;  %v1627_v35 = vadd.f32 %v4472_v52, %v1514_v13  ;;  %v4484_v13 = vld [vmem:[#allocation105_spill] sm:$0xff] }
 0x3a2   : > { %v2393_v42 = vadd.f32 %v2326_v15, %v1841_v54  ;;  %v2120_v54 = vpop.f32.mrf.mxu3 }
 0x3a3   : > { %v1740_v22 = vadd.f32 %v4474_v6, %v1627_v35  ;;  %v4488_v35 = vld [vmem:[#allocation60_spill] sm:$0xff] }
 0x3a4   : > { %v2429_v33 = vadd.f32 %v3890_v58, %v2393_v42  ;;  %1890 = vmatmul.f32.gmra.mxu2 %v4457_v60 }
 0x3a6   : > { %v2461_v31 = vmax.f32 %v2429_v33, 0.0  ;;  %v2343_v33 = vpop.f32.mrf.mxu1 }
 0x3a7   : > { %v1843_v9 = vpop.f32.mrf.mxu2  ;;  %v2344_v49 = vadd.f32 %v2343_v33, %v2231_v40 }
 0x3a8   : > { %2493 = vst [vmem:[%s3902_s17 + $0x70] sm:$0xff] %v2461_v31  ;;  %v1844_v47 = vadd.f32 %v1843_v9, %v1731_v41  ;;  %v2233_v31 = vpop.f32.mrf.mxu0  ;;  %v2338_v41 = vadd.f32 %v2337_v8, %v2225_v12  ;;  %v2341_v8 = vadd.f32 %v2340_v38, %v2228_v27 }
 0x3a9   : > { %v2234_v45 = vadd.f32 %v2233_v31, %v2120_v54  ;;  %v4493_v54 = vld [vmem:[#allocation63_spill] sm:$0xff] }
 0x3aa   : > { %v2394_v30 = vadd.f32 %v2329_v19, %v1844_v47  ;;  %v4475_v19 = vld [vmem:[#allocation50_spill] sm:$0xff]  ;;  %v4476_v47 = vld [vmem:[#allocation127_spill] sm:$0xff]  ;;  %v2123_v59 = vpop.f32.mrf.mxu3 }
 0x3ab   : > { %v1407_v28 = vadd.f32 %v4476_v47, %v4475_v19  ;;  %v4492_v47 = vld [vmem:[#allocation55_spill] sm:$0xff] }
 0x3ac   : > { %v2430_v32 = vadd.f32 %v3890_v58, %v2394_v30  ;;  %v1630_v30 = vadd.f32 %v4477_v48, %v1517_v26 }
 0x3ad   : > { %v1520_v53 = vadd.f32 %v4478_v36, %v1407_v28  ;;  %v4494_v36 = vld [vmem:[#allocation109_spill] sm:$0xff] }
 0x3ae   : > { %v2462_v44 = vmax.f32 %v2430_v32, 0.0  ;;  %v2346_v32 = vpop.f32.mrf.mxu1 }
 0x3af   : > { %v1846_v25 = vpop.f32.mrf.mxu2  ;;  %v2347_v33 = vadd.f32 %v2346_v32, %v2234_v45 }
 0x3b0   : > { %2494 = vst [vmem:[%s3902_s17 + $0x78] sm:$0xff] %v2462_v44  ;;  %v1847_v50 = vadd.f32 %v1846_v25, %v1734_v1  ;;  %v1743_v44 = vadd.f32 %v4479_v4, %v1630_v30  ;;  %v2236_v25 = vpop.f32.mrf.mxu0 }
 0x3b1   : > { %v2237_v30 = vadd.f32 %v2236_v25, %v2123_v59 }
 0x3b2   : > { %v2395_v21 = vadd.f32 %v2332_v24, %v1847_v50  ;;  %v4480_v24 = vld [vmem:[#allocation53_spill] sm:$0xff]  ;;  %v2126_v46 = vpop.f32.mrf.mxu3 }
 0x3b3   : > { %v4481_v50 = vld [vmem:[#allocation129_spill] sm:$0xff] }
 0x3b4   : > { %v2431_v51 = vadd.f32 %v3890_v58, %v2395_v21  ;;  %v1410_v11 = vadd.f32 %v4481_v50, %v4480_v24  ;;  %v1633_v21 = vadd.f32 %v4482_v3, %v1520_v53  ;;  %v4497_v24 = vld [vmem:[#allocation59_spill] sm:$0xff] }
 0x3b5   : > { %v4498_v3 = vld [vmem:[#allocation67_spill] sm:$0xff] }
 0x3b6   : > { %v2463_v5 = vmax.f32 %v2431_v51, 0.0  ;;  %v4483_v51 = vld [vmem:[#allocation56_spill] sm:$0xff]  ;;  %v1746_v29 = vadd.f32 %v4484_v13, %v1633_v21  ;;  %v2349_v38 = vpop.f32.mrf.mxu1 }
 0x3b7   : > { %v1849_v17 = vpop.f32.mrf.mxu2  ;;  %v1523_v61 = vadd.f32 %v4483_v51, %v1410_v11  ;;  %v2350_v32 = vadd.f32 %v2349_v38, %v2237_v30  ;;  %v4501_v38 = vld [vmem:[#allocation136_spill] sm:$0xff] }
 0x3b8   : > { %2495 = vst [vmem:[%s3902_s17 + $0x80] sm:$0xff] %v2463_v5  ;;  %v1850_v15 = vadd.f32 %v1849_v17, %v1737_v37  ;;  %v4485_v17 = vld [vmem:[#allocation57_spill] sm:$0xff] }
 0x3b9   : > { %v1636_v63 = vadd.f32 %v4487_v56, %v1523_v61 }
 0x3ba   : > { %v2396_v42 = vadd.f32 %v2335_v10, %v1850_v15  ;;  %v4486_v10 = vld [vmem:[#allocation132_spill] sm:$0xff]  ;;  %v2129_v12 = vpop.f32.mrf.mxu3 }
 0x3bb   : > { %v1413_v15 = vadd.f32 %v4486_v10, %v4485_v17  ;;  %v1749_v26 = vadd.f32 %v4489_v39, %v1636_v63 }
 0x3bc   : > { %v2432_v60 = vadd.f32 %v3890_v58, %v2396_v42  ;;  %v2239_v42 = vpop.f32.mrf.mxu0 }
 0x3bd   : > { %v1526_v0 = vadd.f32 %v4488_v35, %v1413_v15  ;;  %v2240_v25 = vadd.f32 %v2239_v42, %v2126_v46  ;;  %v4503_v46 = vld [vmem:[#allocation71_spill] sm:$0xff] }
 0x3be   : > { %v2464_v23 = vmax.f32 %v2432_v60, 0.0 }
 0x3bf   : > { %v1852_v2 = vpop.f32.mrf.mxu2  ;;  %v1639_v28 = vadd.f32 %v4492_v47, %v1526_v0 }
 0x3c0   : > { %2496 = vst [vmem:[%s3902_s17 + $0x88] sm:$0xff] %v2464_v23  ;;  %v1853_v9 = vadd.f32 %v1852_v2, %v1740_v22  ;;  %v2352_v22 = vpop.f32.mrf.mxu1  ;;  %v4490_v2 = vld [vmem:[#allocation61_spill] sm:$0xff] }
 0x3c1   : > { %v1752_v53 = vadd.f32 %v4494_v36, %v1639_v28  ;;  %v4510_v36 = vld [vmem:[#allocation76_spill] sm:$0xff] }
 0x3c2   : > { %v2397_v20 = vadd.f32 %v2338_v41, %v1853_v9  ;;  %v4491_v41 = vld [vmem:[#allocation133_spill] sm:$0xff]  ;;  %v2132_v4 = vpop.f32.mrf.mxu3 }
 0x3c3   : > { %v1416_v9 = vadd.f32 %v4491_v41, %v4490_v2 }
 0x3c4   : > { %v2433_v18 = vadd.f32 %v3890_v58, %v2397_v20  ;;  %v2242_v48 = vpop.f32.mrf.mxu0 }
 0x3c5   : > { %v1529_v31 = vadd.f32 %v4493_v54, %v1416_v9  ;;  %v2243_v63 = vadd.f32 %v2242_v48, %v2129_v12 }
 0x3c6   : > { %v2465_v43 = vmax.f32 %v2433_v18, 0.0 }
 0x3c7   : > { %v1855_v16 = vpop.f32.mrf.mxu2  ;;  %v1642_v50 = vadd.f32 %v4497_v24, %v1529_v31 }
 0x3c8   : > { %2497 = vst [vmem:[%s3902_s17 + $0x90] sm:$0xff] %v2465_v43  ;;  %v1856_v1 = vadd.f32 %v1855_v16, %v1743_v44  ;;  %v4495_v44 = vld [vmem:[#allocation65_spill] sm:$0xff]  ;;  %v4496_v16 = vld [vmem:[#allocation134_spill] sm:$0xff]  ;;  %v2355_v11 = vpop.f32.mrf.mxu1 }
 0x3c9   : > { %v2356_v45 = vadd.f32 %v2355_v11, %v2243_v63  ;;  %v4514_v11 = vld [vmem:[#allocation118_spill] sm:$0xff] }
 0x3ca   : > { %v2398_v55 = vadd.f32 %v2341_v8, %v1856_v1  ;;  %v1419_v8 = vadd.f32 %v4496_v16, %v4495_v44  ;;  %v2135_v10 = vpop.f32.mrf.mxu3 }
 0x3cc   : > { %v2434_v57 = vadd.f32 %v3890_v58, %v2398_v55  ;;  %v1532_v59 = vadd.f32 %v4498_v3, %v1419_v8  ;;  %v2245_v61 = vpop.f32.mrf.mxu0 }
 0x3cd   : > { %v2246_v47 = vadd.f32 %v2245_v61, %v2132_v4  ;;  %v4516_v61 = vld [vmem:[#allocation142_spill] sm:$0xff] }
 0x3ce   : > { %v2466_v7 = vmax.f32 %v2434_v57, 0.0  ;;  %v4499_v57 = vld [vmem:[#allocation111_spill] sm:$0xff] }
 0x3cf   : > { %v1858_v5 = vpop.f32.mrf.mxu2  ;;  %v1755_v51 = vadd.f32 %v4499_v57, %v1642_v50 }
 0x3d0   : > { %2498 = vst [vmem:[%s3902_s17 + $0x98] sm:$0xff] %v2466_v7  ;;  %v1859_v37 = vadd.f32 %v1858_v5, %v1746_v29  ;;  %v2353_v7 = vadd.f32 %v2352_v22, %v2240_v25  ;;  %v4500_v29 = vld [vmem:[#allocation68_spill] sm:$0xff]  ;;  %v4507_v22 = vld [vmem:[#allocation66_spill] sm:$0xff] }
 0x3d1   : > { %v1422_v5 = vadd.f32 %v4501_v38, %v4500_v29 }
 0x3d2   : > { %v2399_v14 = vadd.f32 %v2344_v49, %v1859_v37  ;;  %v4502_v37 = vld [vmem:[#allocation62_spill] sm:$0xff]  ;;  %v2138_v9 = vpop.f32.mrf.mxu3 }
 0x3d3   : > { %v1645_v17 = vadd.f32 %v4502_v37, %v1532_v59  ;;  %v1535_v56 = vadd.f32 %v4503_v46, %v1422_v5 }
 0x3d4   : > { %v2435_v52 = vadd.f32 %v3890_v58, %v2399_v14  ;;  %v2358_v14 = vpop.f32.mrf.mxu1  ;;  %v2248_v39 = vpop.f32.mrf.mxu0 }
 0x3d5   : > { %v1648_v2 = vadd.f32 %v4507_v22, %v1535_v56  ;;  %v2359_v30 = vadd.f32 %v2358_v14, %v2246_v47  ;;  %v2249_v24 = vadd.f32 %v2248_v39, %v2135_v10 }
 0x3d6   : > { %v2467_v60 = vmax.f32 %v2435_v52, 0.0  ;;  %v4504_v52 = vld [vmem:[#allocation114_spill] sm:$0xff] }
 0x3d7   : > { %v1861_v23 = vpop.f32.mrf.mxu2  ;;  %v1758_v35 = vadd.f32 %v4504_v52, %v1645_v17  ;;  %v4520_v52 = vld [vmem:[#allocation84_spill] sm:$0xff] }
 0x3d8   : > { %2499 = vst [vmem:[%s3902_s17 + $0xa0] sm:$0xff] %v2467_v60  ;;  %v1862_v6 = vadd.f32 %v1861_v23, %v1749_v26  ;;  %v4505_v26 = vld [vmem:[#allocation72_spill] sm:$0xff]  ;;  %v4506_v23 = vld [vmem:[#allocation138_spill] sm:$0xff] }
 0x3da   : > { %v2400_v19 = vadd.f32 %v2347_v33, %v1862_v6  ;;  %v1425_v33 = vadd.f32 %v4506_v23, %v4505_v26  ;;  %v2141_v3 = vpop.f32.mrf.mxu3  ;;  %v4522_v23 = vld [vmem:[#allocation86_spill] sm:$0xff] }
 0x3dc   : > { %v2436_v20 = vadd.f32 %v3890_v58, %v2400_v19  ;;  %v4508_v19 = vld [vmem:[#allocation75_spill] sm:$0xff]  ;;  %v2361_v54 = vpop.f32.mrf.mxu1  ;;  %v2251_v16 = vpop.f32.mrf.mxu0 }
 0x3dd   : > { %v1538_v12 = vadd.f32 %v4508_v19, %v1425_v33  ;;  %v2362_v25 = vadd.f32 %v2361_v54, %v2249_v24  ;;  %v2252_v17 = vadd.f32 %v2251_v16, %v2138_v9 }
 0x3de   : > { %v2468_v18 = vmax.f32 %v2436_v20, 0.0  ;;  %v4509_v20 = vld [vmem:[#allocation116_spill] sm:$0xff] }
 0x3df   : > { %v1864_v27 = vpop.f32.mrf.mxu2  ;;  %v1761_v48 = vadd.f32 %v4509_v20, %v1648_v2  ;;  %v4523_v2 = vld [vmem:[#allocation124_spill] sm:$0xff]  ;;  %v4525_v20 = vld [vmem:[#allocation143_spill] sm:$0xff] }
 0x3e0   : > { %2500 = vst [vmem:[%s3902_s17 + $0xa8] sm:$0xff] %v2468_v18  ;;  %v1865_v43 = vadd.f32 %v1864_v27, %v1752_v53  ;;  %v4511_v53 = vld [vmem:[#allocation140_spill] sm:$0xff] }
 0x3e1   : > { %v1428_v27 = vadd.f32 %v4511_v53, %v4510_v36  ;;  %v4527_v53 = vld [vmem:[#allocation90_spill] sm:$0xff] }
 0x3e2   : > { %v2401_v1 = vadd.f32 %v2350_v32, %v1865_v43  ;;  %v4512_v43 = vld [vmem:[#allocation70_spill] sm:$0xff] }
 0x3e3   : > { %v1651_v44 = vadd.f32 %v4512_v43, %v1538_v12 }
 0x3e4   : > { %v2437_v55 = vadd.f32 %v3890_v58, %v2401_v1  ;;  %v4513_v1 = vld [vmem:[#allocation79_spill] sm:$0xff]  ;;  %v2364_v57 = vpop.f32.mrf.mxu1  ;;  %v2254_v5 = vpop.f32.mrf.mxu0 }
 0x3e5   : > { %v1541_v4 = vadd.f32 %v4513_v1, %v1428_v27  ;;  %v2365_v56 = vadd.f32 %v2364_v57, %v2252_v17  ;;  %v4533_v17 = vld [vmem:[#allocation89_spill] sm:$0xff] }
 0x3e6   : > { %v2469_v21 = vmax.f32 %v2437_v55, 0.0  ;;  %v1764_v55 = vadd.f32 %v4514_v11, %v1651_v44  ;;  %v4528_v44 = vld [vmem:[#allocation126_spill] sm:$0xff] }
 0x3e7   : > { %v1867_v40 = vpop.f32.mrf.mxu2 }
 0x3e8   : > { %2501 = vst [vmem:[%s3902_s17 + $0xb0] sm:$0xff] %v2469_v21  ;;  %v1868_v13 = vadd.f32 %v1867_v40, %v1755_v51  ;;  %v4515_v51 = vld [vmem:[#allocation80_spill] sm:$0xff] }
 0x3e9   : > { %v1431_v40 = vadd.f32 %v4516_v61, %v4515_v51  ;;  %v4531_v61 = vld [vmem:[#allocation93_spill] sm:$0xff] }
 0x3ea   : > { %v2402_v49 = vadd.f32 %v2353_v7, %v1868_v13  ;;  %v4517_v13 = vld [vmem:[#allocation74_spill] sm:$0xff] }
 0x3eb   : > { %v1654_v29 = vadd.f32 %v4517_v13, %v1541_v4  ;;  %v4532_v13 = vld [vmem:[#allocation128_spill] sm:$0xff] }
 0x3ec   : > { %v2438_v15 = vadd.f32 %v3890_v58, %v2402_v49  ;;  %v4518_v49 = vld [vmem:[#allocation82_spill] sm:$0xff]  ;;  %v2367_v39 = vpop.f32.mrf.mxu1  ;;  %v2257_v9 = vpop.f32.mrf.mxu0 }
 0x3ed   : > { %v1544_v37 = vadd.f32 %v4518_v49, %v1431_v40 }
 0x3ee   : > { %v2470_v42 = vmax.f32 %v2438_v15, 0.0  ;;  %v4519_v15 = vld [vmem:[#allocation121_spill] sm:$0xff] }
 0x3ef   : > { %v1870_v0 = vpop.f32.mrf.mxu2  ;;  %v1767_v14 = vadd.f32 %v4519_v15, %v1654_v29 }
 0x3f0   : > { %2502 = vst [vmem:[%s3902_s17 + $0xb8] sm:$0xff] %v2470_v42  ;;  %v1871_v60 = vadd.f32 %v1870_v0, %v1758_v35  ;;  %v2144_v42 = vpop.f32.mrf.mxu3  ;;  %v1434_v35 = vadd.f32 %v3863_v62, %v4520_v52  ;;  %v4524_v62 = vld [vmem:[#allocation87_spill] sm:$0xff] }
 0x3f2   : > { %v2403_v6 = vadd.f32 %v2356_v45, %v1871_v60  ;;  %v4521_v45 = vld [vmem:[#allocation78_spill] sm:$0xff]  ;;  %v1547_v33 = vadd.f32 %v4522_v23, %v1434_v35 }
 0x3f3   : > { %v1657_v60 = vadd.f32 %v4521_v45, %v1544_v37 }
 0x3f4   : > { %v2439_v41 = vadd.f32 %v3890_v58, %v2403_v6  ;;  %v2255_v6 = vadd.f32 %v2254_v5, %v2141_v3  ;;  %v2370_v36 = vpop.f32.mrf.mxu1  ;;  %v2260_v1 = vpop.f32.mrf.mxu0  ;;  %v4530_v3 = vld [vmem:[#allocation85_spill] sm:$0xff] }
 0x3f6   : > { %v2471_v28 = vmax.f32 %v2439_v41, 0.0  ;;  %v1770_v41 = vadd.f32 %v4523_v2, %v1657_v60  ;;  %v2368_v12 = vadd.f32 %v2367_v39, %v2255_v6 }
 0x3f7   : > { %v1873_v31 = vpop.f32.mrf.mxu2 }
 0x3f8   : > { %2503 = vst [vmem:[%s3902_s17 + $0xc0] sm:$0xff] %v2471_v28  ;;  %v1874_v18 = vadd.f32 %v1873_v31, %v1761_v48  ;;  %v2147_v28 = vpop.f32.mrf.mxu3  ;;  %v1437_v48 = vadd.f32 %v4525_v20, %v4524_v62  ;;  %v4526_v31 = vld [vmem:[#allocation81_spill] sm:$0xff] }
 0x3f9   : > { %v2261_v57 = vadd.f32 %v2260_v1, %v2147_v28 }
 0x3fa   : > { %v2404_v32 = vadd.f32 %v2359_v30, %v1874_v18  ;;  %v1660_v30 = vadd.f32 %v4526_v31, %v1547_v33  ;;  %v1550_v27 = vadd.f32 %v4527_v53, %v1437_v48 }
 0x3fc   : > { %v2440_v8 = vadd.f32 %v3890_v58, %v2404_v32  ;;  %v2258_v32 = vadd.f32 %v2257_v9, %v2144_v42  ;;  %v1773_v16 = vadd.f32 %v4528_v44, %v1660_v30  ;;  %v2373_v51 = vpop.f32.mrf.mxu1 }
 0x3fd   : > { %v2374_v5 = vadd.f32 %v2373_v51, %v2261_v57 }
 0x3fe   : > { %v2472_v50 = vmax.f32 %v2440_v8, 0.0  ;;  %v2371_v4 = vadd.f32 %v2370_v36, %v2258_v32 }
 0x3ff   : > { %v1876_v59 = vpop.f32.mrf.mxu2 }
 0x400   : > { %2504 = vst [vmem:[%s3902_s17 + $0xc8] sm:$0xff] %v2472_v50  ;;  %v1877_v21 = vadd.f32 %v1876_v59, %v1764_v55  ;;  %v4529_v50 = vld [vmem:[#allocation91_spill] sm:$0xff]  ;;  %v1663_v59 = vadd.f32 %v4530_v3, %v1550_v27 }
 0x401   : > { %v1440_v11 = vadd.f32 %v3877_v34, %v4529_v50  ;;  %v2263_v34 = vpop.f32.mrf.mxu0 }
 0x402   : > { %v2405_v7 = vadd.f32 %v2362_v25, %v1877_v21  ;;  %v2150_v25 = vpop.f32.mrf.mxu3  ;;  %v1776_v29 = vadd.f32 %v4532_v13, %v1663_v59 }
 0x403   : > { %v1553_v40 = vadd.f32 %v4531_v61, %v1440_v11 }
 0x404   : > { %v2441_v38 = vadd.f32 %v3890_v58, %v2405_v7 }
 0x406   : > { %v2473_v10 = vmax.f32 %v2441_v38, 0.0 }
 0x407   : > { %v1879_v46 = vpop.f32.mrf.mxu2 }
 0x408   : > { %2505 = vst [vmem:[%s3902_s17 + $0xd0] sm:$0xff] %v2473_v10  ;;  %v1880_v63 = vadd.f32 %v1879_v46, %v1767_v14  ;;  %v1666_v10 = vadd.f32 %v4533_v17, %v1553_v40  ;;  %v2264_v14 = vadd.f32 %v2263_v34, %v2150_v25 }
 0x40a   : > { %v2406_v0 = vadd.f32 %v2365_v56, %v1880_v63  ;;  %v2376_v46 = vpop.f32.mrf.mxu3  ;;  %v4534_v63 = vld [vmem:[#allocation131_spill] sm:$0xff] }
 0x40b   : > { %v1779_v42 = vadd.f32 %v4534_v63, %v1666_v10  ;;  %v2377_v35 = vadd.f32 %v2376_v46, %v2264_v14 }
 0x40c   : > { %v2442_v26 = vadd.f32 %v3890_v58, %v2406_v0 }
 0x40e   : > { %v2474_v22 = vmax.f32 %v2442_v26, 0.0 }
 0x40f   : > { %v1882_v19 = vpop.f32.mrf.mxu2 }
 0x410   : > { %2506 = vst [vmem:[%s3902_s17 + $0xd8] sm:$0xff] %v2474_v22  ;;  %v1883_v47 = vadd.f32 %v1882_v19, %v1770_v41 }
 0x412   : > { %v2407_v54 = vadd.f32 %v2368_v12, %v1883_v47 }
 0x414   : > { %v2443_v18 = vadd.f32 %v3890_v58, %v2407_v54 }
 0x416   : > { %v2475_v43 = vmax.f32 %v2443_v18, 0.0 }
 0x417   : > { %v1885_v8 = vpop.f32.mrf.mxu2 }
 0x418   : > { %2507 = vst [vmem:[%s3902_s17 + $0xe0] sm:$0xff] %v2475_v43  ;;  %v1886_v24 = vadd.f32 %v1885_v8, %v1773_v16 }
 0x41a   : > { %v2408_v55 = vadd.f32 %v2371_v4, %v1886_v24 }
 0x41c   : > { %v2444_v21 = vadd.f32 %v3890_v58, %v2408_v55 }
 0x41e   : > { %v2476_v7 = vmax.f32 %v2444_v21, 0.0 }
 0x41f   : > { %v1888_v38 = vpop.f32.mrf.mxu2 }
 0x420   : > { %2508 = vst [vmem:[%s3902_s17 + $0xe8] sm:$0xff] %v2476_v7  ;;  %v1889_v49 = vadd.f32 %v1888_v38, %v1776_v29 }
 0x422   : > { %v2409_v37 = vadd.f32 %v2374_v5, %v1889_v49 }
 0x424   : > { %v2445_v15 = vadd.f32 %v3890_v58, %v2409_v37 }
 0x426   : > { %v2477_v56 = vmax.f32 %v2445_v15, 0.0 }
 0x427   : > { %v1891_v52 = vpop.f32.mrf.mxu2 }
 0x428   : > { %2509 = vst [vmem:[%s3902_s17 + $0xf0] sm:$0xff] %v2477_v56  ;;  %v1892_v0 = vadd.f32 %v1891_v52, %v1779_v42 }
 0x42a   : > { %v2410_v45 = vadd.f32 %v2377_v35, %v1892_v0 }
 0x42c   : > { %v2446_v60 = vadd.f32 %v3890_v58, %v2410_v45 }
 0x42e   : > { %v2478_v39 = vmax.f32 %v2446_v60, 0.0 }
 0x430   : > { %2510 = vst [vmem:[%s3902_s17 + $0xf8] sm:$0xff] %v2478_v39 }
 0x431   : > { %2803 = shalt.err (!%p2800_p8)
}
 0x432   : > { %s2848_s13 = smov 128   ;;  %s2849_s16 = smov 8  }
 0x433   : > { %2691 = dma.vmem_to_hbm [thread:$0]  (%p2918_p5), %s2525_s6, 4096, %s2527_s7, %s2512_s22, %s2848_s13, %s2848_s13, %s2849_s16  }
 0x434 PF: > { %p2703_p9 = scmp.ge.s32.totalorder %s2842_s21, 2  ;;  %s2541_s17 = sand.u32 1, %s2830_s18  }
 0x435   : > { %s2542_s23 = scalar_lea.sflag [#allocation5], %s2541_s17 }
 0x436   : > { %p2698_p10 = pnand %p2703_p9, %p2922_p6 }
 0x438   : > { %p2699_p11 = pneg %p2698_p10 }
 0x43a   : > { %2825 = dma.done.wait (%p2699_p11), %s2542_s23, 4096  }
 0x43b   : > { %2827 = vsyncadd (%p2699_p11), %s2542_s23, 4294963200  ;;  %p16_p12 = scmp.ge.s32.totalorder %s2905_s24, 4   ;;  %s4535_s18 = smov %s2834_s19 }
 0x43c   : > { %s4536_s19 = smov %s2838_s20  ;;  %s4537_s20 = smov %s2916_s27 }
 0x43d   : > { %s4538_s21 = smov %s2905_s24  ;;  %18 = sbr.rel (!%p16_p12) target bundleno = 4 (0x4), region = 85 }
 0x442   :  { %2548 = vsyncpa [#allocation4], 1 }
 0x443   :  { %2550 = vsyncpa [#allocation4 + $0x1], 1 }
 0x444   :  { %2551 = vsyncpa [#allocation5], 1 }
 0x445   :  { %2553 = vsyncpa [#allocation5 + $0x1], 1 }

</bundles_post_ra>
